<compile_context>
chip_gen: v6e
topology: v6e:2x2x1
jax: 0.10.0
libtpu: 0.0.40
codegen_flags: <defaults>
</compile_context>

<pallas_src>
import functools

import jax
import jax.numpy as jnp
from jax import lax
from jax.experimental import pallas as pl
from jax.experimental.pallas import tpu as pltpu

EPS = 1e-5
KSIZE = 4
LANE = 128                      # pad output channels to this -> lane-dense stores
TM_MAX = 512                    # M-tile (rows per block)
VMEM_LIMIT = 48 * 1024 * 1024   # scoped VMEM with headroom (v7x physical = 64 MiB)


def _round_up(x, m):
    return (x + m - 1) // m * m


def _pick_tile(m):
    # keep tiles a multiple of 16 (bf16 sublane packing); cap at TM_MAX
    return _round_up(m, 16) if m <= TM_MAX else TM_MAX


def _pad_rows(a, mp):
    g, m, k = a.shape
    if mp == m:
        return a
    return jnp.pad(a, ((0, 0), (0, mp - m), (0, 0)))


# ----------------------------------------------------------------------------
# Pallas kernels
# ----------------------------------------------------------------------------
def _matmul_stats_kernel(p_ref, w_ref, y_ref, sum_ref, sq_ref):
    """bf16 [tm,K]@[K,Cp] matmul (f32 acc) + per-channel sum / sum-of-squares
    accumulated across the whole (G, M) grid (both axes 'arbitrary')."""
    y = jnp.dot(p_ref[0], w_ref[0], preferred_element_type=jnp.float32)
    y_ref[0] = y

    @pl.when((pl.program_id(0) == 0) & (pl.program_id(1) == 0))
    def _():
        sum_ref[...] = jnp.zeros_like(sum_ref)
        sq_ref[...] = jnp.zeros_like(sq_ref)

    sum_ref[...] += jnp.sum(y, axis=0, keepdims=True)
    sq_ref[...] += jnp.sum(y * y, axis=0, keepdims=True)


def _bn_relu_kernel(y_ref, sum_ref, sq_ref, g_ref, b_ref, o_ref, *, count):
    """Batch-stat BatchNorm (training mode, biased var) + ReLU, all in f32."""
    inv_n = 1.0 / count
    mean = sum_ref[...] * inv_n
    var = jnp.maximum(sq_ref[...] * inv_n - mean * mean, 0.0)
    scale = g_ref[...] * lax.rsqrt(var + EPS)
    shift = b_ref[...] - mean * scale
    o_ref[0] = jnp.maximum(y_ref[0] * scale + shift, 0.0)


def _matmul_bias_tanh_kernel(p_ref, w_ref, b_ref, o_ref):
    y = jnp.dot(p_ref[0], w_ref[0], preferred_element_type=jnp.float32)
    o_ref[0] = jnp.tanh(y + b_ref[...])


# ----------------------------------------------------------------------------
# pallas_call wrappers
# ----------------------------------------------------------------------------
def grouped_matmul_stats(patches, weights, tm):
    """patches [G, Mp, K] bf16, weights [G, K, Cp] bf16 ->
       (Y [G, Mp, Cp] f32, sum [1, Cp] f32, sumsq [1, Cp] f32)."""
    g, mp, k = patches.shape
    cp = weights.shape[2]
    grid = (g, mp // tm)
    return pl.pallas_call(
        _matmul_stats_kernel,
        out_shape=(
            jax.ShapeDtypeStruct((g, mp, cp), jnp.float32),
            jax.ShapeDtypeStruct((1, cp), jnp.float32),
            jax.ShapeDtypeStruct((1, cp), jnp.float32),
        ),
        grid=grid,
        in_specs=[
            pl.BlockSpec((1, tm, k), lambda gi, i: (gi, i, 0)),
            pl.BlockSpec((1, k, cp), lambda gi, i: (gi, 0, 0)),
        ],
        out_specs=(
            pl.BlockSpec((1, tm, cp), lambda gi, i: (gi, i, 0)),
            pl.BlockSpec((1, cp), lambda gi, i: (0, 0)),
            pl.BlockSpec((1, cp), lambda gi, i: (0, 0)),
        ),
        compiler_params=pltpu.CompilerParams(
            dimension_semantics=("arbitrary", "arbitrary"),
            vmem_limit_bytes=VMEM_LIMIT,
        ),
    )(patches, weights)


def bn_relu_apply(y, s, sq, gamma, beta, count, tm):
    g, mp, cp = y.shape
    grid = (g, mp // tm)
    kern = functools.partial(_bn_relu_kernel, count=count)
    return pl.pallas_call(
        kern,
        out_shape=jax.ShapeDtypeStruct((g, mp, cp), jnp.float32),
        grid=grid,
        in_specs=[
            pl.BlockSpec((1, tm, cp), lambda gi, i: (gi, i, 0)),
            pl.BlockSpec((1, cp), lambda gi, i: (0, 0)),
            pl.BlockSpec((1, cp), lambda gi, i: (0, 0)),
            pl.BlockSpec((1, cp), lambda gi, i: (0, 0)),
            pl.BlockSpec((1, cp), lambda gi, i: (0, 0)),
        ],
        out_specs=pl.BlockSpec((1, tm, cp), lambda gi, i: (gi, i, 0)),
        compiler_params=pltpu.CompilerParams(
            dimension_semantics=("parallel", "parallel"),
            vmem_limit_bytes=VMEM_LIMIT,
        ),
    )(y, s, sq, gamma, beta)


def matmul_bias_tanh(patches, weights, bias, tm):
    g, mp, k = patches.shape
    cp = weights.shape[2]
    grid = (g, mp // tm)
    return pl.pallas_call(
        _matmul_bias_tanh_kernel,
        out_shape=jax.ShapeDtypeStruct((g, mp, cp), jnp.float32),
        grid=grid,
        in_specs=[
            pl.BlockSpec((1, tm, k), lambda gi, i: (gi, i, 0)),
            pl.BlockSpec((1, k, cp), lambda gi, i: (gi, 0, 0)),
            pl.BlockSpec((1, cp), lambda gi, i: (0, 0)),
        ],
        out_specs=pl.BlockSpec((1, tm, cp), lambda gi, i: (gi, i, 0)),
        compiler_params=pltpu.CompilerParams(
            dimension_semantics=("parallel", "parallel"),
            vmem_limit_bytes=VMEM_LIMIT,
        ),
    )(patches, weights, bias)


# ----------------------------------------------------------------------------
# Host-side glue: sub-pixel decomposition of ConvTranspose2d(k=4, s=2, p=1)
# ----------------------------------------------------------------------------
def _subpixel_patches(x_nhwc):
    """NHWC activation -> per-phase 2x2 im2col patches [4, N*H*W, 4*C].

    out[2m+py, 2n+px] only touches input rows {m+py-1, m+py} and cols
    {n+px-1, n+px} with kernel taps kh = 3-py-2*dr, kw = 3-px-2*dc."""
    n, h, w, c = x_nhwc.shape
    xp = jnp.pad(x_nhwc, ((0, 0), (1, 1), (1, 1), (0, 0)))
    phases = []
    for py in range(2):
        for px in range(2):
            wins = []
            for dr in range(2):
                for dc in range(2):
                    wins.append(xp[:, py + dr:py + dr + h, px + dc:px + dc + w, :])
            p = jnp.stack(wins, axis=3)            # [N, H, W, 4, C] (dr,dc order)
            phases.append(p.reshape(n * h * w, 4 * c))
    return jnp.stack(phases, axis=0)               # [4, N*H*W, 4*C]


def _interleave_phases(y, n, h, w, c):
    """[4, N*H*W, C] phase outputs -> NHWC [N, 2H, 2W, C]."""
    y = y.reshape(2, 2, n, h, w, c)
    y = jnp.transpose(y, (2, 3, 0, 4, 1, 5))       # [N, H, py, W, px, C]
    return y.reshape(n, 2 * h, 2 * w, c)


def _bn_block(patches, wg, gamma, beta):
    """matmul + batch-stat BN + ReLU over a grouped [G, M, K] slab."""
    g, m, _ = patches.shape
    tm = _pick_tile(m)
    mp = _round_up(m, tm)
    p = _pad_rows(patches, mp).astype(jnp.bfloat16)  # zero rows don't bias stats
    y, s, sq = grouped_matmul_stats(p, wg, tm)
    out = bn_relu_apply(y, s, sq, gamma, beta, count=float(g * m), tm=tm)
    return out[:, :m, :]


# ----------------------------------------------------------------------------
# Parameter preparation (hoisted out of the jitted forward)
# ----------------------------------------------------------------------------
def _subpixel_weight(w):
    """PyTorch ConvT weight [Cin, Cout, 4, 4] -> [4, 4*Cin, Cp] bf16 phase mats."""
    cin, cout = w.shape[0], w.shape[1]
    cp = _round_up(cout, LANE)
    mats = []
    for py in range(2):
        for px in range(2):
            rows = []
            for dr in range(2):
                for dc in range(2):
                    kh = 3 - py - 2 * dr
                    kw = 3 - px - 2 * dc
                    rows.append(w[:, :, kh, kw])                 # [Cin, Cout]
            mats.append(jnp.concatenate(rows, axis=0))           # [4*Cin, Cout]
    wg = jnp.stack(mats, axis=0)                                 # [4, 4*Cin, Cout]
    wg = jnp.pad(wg, ((0, 0), (0, 0), (0, cp - cout))).astype(jnp.bfloat16)
    return wg, cp, cout


def prepare_params(params):
    """One-time flatten/flip/pad/bf16-cast of all ConvTranspose2d weights."""
    prepped = []

    # layer 0: ConvT(nz, 8ngf, 4, 1, 0) on a 1x1 input -> 16 output-pixel groups
    w, _, g, bt = params[0]
    cin, cout = w.shape[0], w.shape[1]
    cp = _round_up(cout, LANE)
    wg = jnp.transpose(w, (2, 3, 0, 1)).reshape(16, cin, cout)   # g = kh*4 + kw
    wg = jnp.pad(wg, ((0, 0), (0, 0), (0, cp - cout))).astype(jnp.bfloat16)
    gamma = jnp.pad(g, (0, cp - cout), constant_values=1.0).reshape(1, cp)
    beta = jnp.pad(bt, (0, cp - cout)).reshape(1, cp)
    prepped.append((wg, gamma, beta))          # bias dropped: cancelled by BN mean

    # layers 1..3: stride-2 ConvT + BN + ReLU
    for w, _, g, bt in params[1:4]:
        wg, cp, cout = _subpixel_weight(w)
        gamma = jnp.pad(g, (0, cp - cout), constant_values=1.0).reshape(1, cp)
        beta = jnp.pad(bt, (0, cp - cout)).reshape(1, cp)
        prepped.append((wg, gamma, beta))

    # layer 4: stride-2 ConvT + bias + Tanh
    w, b, _, _ = params[4]
    wg, cp, cout = _subpixel_weight(w)
    bias = jnp.pad(b, (0, cp - cout)).reshape(1, cp)
    prepped.append((wg, bias))

    return tuple(prepped)


# ----------------------------------------------------------------------------
# Full GANDecoder forward (training-mode BatchNorm, matches nn.Sequential)
# ----------------------------------------------------------------------------
def gan_decoder_forward(x_nchw, prepped, out_channels):
    n, nz = x_nchw.shape[0], x_nchw.shape[1]

    # layer 0: ConvT(nz, 8ngf, 4, 1, 0) + BN + ReLU  -> [N, 4, 4, 8ngf]
    wg, gamma, beta = prepped[0]
    c0 = out_channels[0]
    x_flat = x_nchw.reshape(n, nz)
    patches = jnp.broadcast_to(x_flat, (16, n, nz))        # one group per (kh,kw)
    y = _bn_block(patches, wg, gamma, beta)                # [16, n, Cp]
    y = y[:, :, :c0].reshape(4, 4, n, c0)
    x = jnp.transpose(y, (2, 0, 1, 3))                     # [N, 4, 4, 8ngf]

    # layers 1..3: sub-pixel ConvT(s=2, p=1) + BN + ReLU
    for li in range(1, 4):
        wg, gamma, beta = prepped[li]
        c = out_channels[li]
        nb, h, wd, _ = x.shape
        patches = _subpixel_patches(x)                     # [4, N*H*W, 4*Cin]
        y = _bn_block(patches, wg, gamma, beta)            # [4, N*H*W, Cp]
        x = _interleave_phases(y[:, :, :c], nb, h, wd, c)  # [N, 2H, 2W, C]

    # layer 4: sub-pixel ConvT(s=2, p=1) + bias + Tanh
    wg, bias = prepped[4]
    c = out_channels[4]
    nb, h, wd, _ = x.shape
    patches = _subpixel_patches(x)
    _, m, _ = patches.shape
    tm = _pick_tile(m)
    mp = _round_up(m, tm)
    p = _pad_rows(patches, mp).astype(jnp.bfloat16)
    y = matmul_bias_tanh(p, wg, bias, tm)[:, :m, :c]
    x = _interleave_phases(y, nb, h, wd, c)
    return jnp.transpose(x, (0, 3, 1, 2))                  # NHWC -> NCHW


# ----------------------------------------------------------------------------
# Pure-JAX f32 reference (for correctness check only)
# ----------------------------------------------------------------------------
def _ref_convT(x, w, b, stride, pad):
    wf = jnp.flip(w, (2, 3))
    wf = jnp.transpose(wf, (1, 0, 2, 3))                   # -> OIHW
    out = lax.conv_general_dilated(
        x, wf, window_strides=(1, 1),
        padding=[(KSIZE - 1 - pad, KSIZE - 1 - pad)] * 2,
        lhs_dilation=(stride, stride),
        dimension_numbers=("NCHW", "OIHW", "NCHW"))
    return out + b.reshape(1, -1, 1, 1)


def _ref_bn_relu(y, gamma, beta):
    mean = jnp.mean(y, axis=(0, 2, 3), keepdims=True)
    var = jnp.mean((y - mean) ** 2, axis=(0, 2, 3), keepdims=True)
    yn = (y - mean) * lax.rsqrt(var + EPS)
    return jnp.maximum(gamma.reshape(1, -1, 1, 1) * yn + beta.reshape(1, -1, 1, 1), 0.0)


def ref_forward(x, params):
    cfgs = [(1, 0, "bn"), (2, 1, "bn"), (2, 1, "bn"), (2, 1, "bn"), (2, 1, "tanh")]
    y = x
    for (s, p, mode), (w, b, g, bt) in zip(cfgs, params):
        y = _ref_convT(y, w, b, s, p)
        y = _ref_bn_relu(y, g, bt) if mode == "bn" else jnp.tanh(y)
    return y


# ----------------------------------------------------------------------------
def init_params(key, nz, ngf, nc):
    dims = [(nz, ngf * 8), (ngf * 8, ngf * 4), (ngf * 4, ngf * 2),
            (ngf * 2, ngf), (ngf, nc)]
    params = []
    for cin, cout in dims:
        key, k1, k2, k3, k4 = jax.random.split(key, 5)
        w = 0.02 * jax.random.normal(k1, (cin, cout, KSIZE, KSIZE), jnp.float32)
        b = 0.01 * jax.random.normal(k2, (cout,), jnp.float32)
        g = 1.0 + 0.1 * jax.random.normal(k3, (cout,), jnp.float32)
        bt = 0.1 * jax.random.normal(k4, (cout,), jnp.float32)
        params.append((w, b, g, bt))
    return params


if __name__ == "__main__":
    key = jax.random.PRNGKey(0)
    kx, kp = jax.random.split(key)

    N, nz, ngf, nc = 2, 16, 8, 3
    x = jax.random.normal(kx, (N, nz, 1, 1), jnp.float32)
    params = init_params(kp, nz, ngf, nc)

    prepped = prepare_params(params)                       # hoisted out of jit
    out_channels = (ngf * 8, ngf * 4, ngf * 2, ngf, nc)
    fwd = jax.jit(functools.partial(gan_decoder_forward, out_channels=out_channels))

    out = jax.block_until_ready(fwd(x, prepped))

    assert out.shape == (N, nc, 64, 64), out.shape
    assert bool(jnp.all(jnp.isfinite(out)))
    assert bool(jnp.all(jnp.abs(out) <= 1.0 + 1e-6))       # tanh output range

    ref = jax.block_until_ready(jax.jit(ref_forward)(x, params))
    rel = float(jnp.linalg.norm(out - ref) / (jnp.linalg.norm(ref) + 1e-12))
    assert rel < 5e-2, f"relative L2 error too high: {rel}"

    print("KERNEL_OK")
</pallas_src>

<mosaic_0001>
module attributes {stable_mosaic.version = 11 : i64} {
  func.func @_bn_relu_kernel(%arg0: i32, %arg1: i32, %arg2: memref<1x16x128xf32, #tpu.memory_space<vmem>>, %arg3: memref<1x128xf32, #tpu.memory_space<vmem>>, %arg4: memref<1x128xf32, #tpu.memory_space<vmem>>, %arg5: memref<1x128xf32, #tpu.memory_space<vmem>>, %arg6: memref<1x128xf32, #tpu.memory_space<vmem>>, %arg7: memref<1x16x128xf32, #tpu.memory_space<vmem>>) attributes {dimension_semantics = [#tpu.dimension_semantics<parallel>, #tpu.dimension_semantics<parallel>], iteration_bounds = array<i64: 16, 1>, scalar_prefetch = 0 : i64, scratch_operands = 0 : i64, tpu.core_type = #tpu.core_type<tc>, window_params = [{transform_indices = @transform_0, window_bounds = array<i64: 1, 16, 128>}, {pipeline_mode = #tpu.pipeline_mode<synchronous>, transform_indices = @transform_1, window_bounds = array<i64: 1, 128>}, {pipeline_mode = #tpu.pipeline_mode<synchronous>, transform_indices = @transform_2, window_bounds = array<i64: 1, 128>}, {pipeline_mode = #tpu.pipeline_mode<synchronous>, transform_indices = @transform_3, window_bounds = array<i64: 1, 128>}, {pipeline_mode = #tpu.pipeline_mode<synchronous>, transform_indices = @transform_4, window_bounds = array<i64: 1, 128>}, {transform_indices = @transform_5, window_bounds = array<i64: 1, 16, 128>}]} {
    %c0 = arith.constant 0 : index
    %c0_0 = arith.constant 0 : index
    %0 = vector.load %arg3[%c0, %c0_0] : memref<1x128xf32, #tpu.memory_space<vmem>>, vector<1x128xf32>
    %cst = arith.constant 3.125000e-02 : f32
    %1 = vector.broadcast %cst : f32 to vector<1x128xf32>
    %2 = arith.mulf %0, %1 : vector<1x128xf32>
    %c0_1 = arith.constant 0 : index
    %c0_2 = arith.constant 0 : index
    %3 = vector.load %arg4[%c0_1, %c0_2] : memref<1x128xf32, #tpu.memory_space<vmem>>, vector<1x128xf32>
    %cst_3 = arith.constant 3.125000e-02 : f32
    %4 = vector.broadcast %cst_3 : f32 to vector<1x128xf32>
    %5 = arith.mulf %3, %4 : vector<1x128xf32>
    %6 = arith.mulf %2, %2 : vector<1x128xf32>
    %7 = arith.subf %5, %6 : vector<1x128xf32>
    %cst_4 = arith.constant 0.000000e+00 : f32
    %8 = vector.broadcast %cst_4 : f32 to vector<1x128xf32>
    %9 = arith.maximumf %7, %8 : vector<1x128xf32>
    %c0_5 = arith.constant 0 : index
    %c0_6 = arith.constant 0 : index
    %10 = vector.load %arg5[%c0_5, %c0_6] : memref<1x128xf32, #tpu.memory_space<vmem>>, vector<1x128xf32>
    %cst_7 = arith.constant 9.99999974E-6 : f32
    %11 = vector.broadcast %cst_7 : f32 to vector<1x128xf32>
    %12 = arith.addf %9, %11 : vector<1x128xf32>
    %13 = math.rsqrt %12 : vector<1x128xf32>
    %14 = arith.mulf %10, %13 : vector<1x128xf32>
    %c0_8 = arith.constant 0 : index
    %c0_9 = arith.constant 0 : index
    %15 = vector.load %arg6[%c0_8, %c0_9] : memref<1x128xf32, #tpu.memory_space<vmem>>, vector<1x128xf32>
    %16 = arith.mulf %2, %14 : vector<1x128xf32>
    %17 = arith.subf %15, %16 : vector<1x128xf32>
    %c0_10 = arith.constant 0 : index
    %c0_11 = arith.constant 0 : index
    %c0_12 = arith.constant 0 : index
    %18 = vector.load %arg2[%c0_10, %c0_11, %c0_12] : memref<1x16x128xf32, #tpu.memory_space<vmem>>, vector<1x16x128xf32>
    %19 = vector.shape_cast %18 : vector<1x16x128xf32> to vector<16x128xf32>
    %20 = vector.broadcast %14 : vector<1x128xf32> to vector<16x128xf32>
    %21 = arith.mulf %19, %20 : vector<16x128xf32>
    %22 = vector.broadcast %17 : vector<1x128xf32> to vector<16x128xf32>
    %23 = arith.addf %21, %22 : vector<16x128xf32>
    %cst_13 = arith.constant 0.000000e+00 : f32
    %24 = vector.broadcast %cst_13 : f32 to vector<16x128xf32>
    %25 = arith.maximumf %23, %24 : vector<16x128xf32>
    %c0_14 = arith.constant 0 : index
    %c0_15 = arith.constant 0 : index
    %c0_16 = arith.constant 0 : index
    %26 = vector.load %arg7[%c0_14, %c0_15, %c0_16] : memref<1x16x128xf32, #tpu.memory_space<vmem>>, vector<1x16x128xf32>
    %27 = vector.shape_cast %26 : vector<1x16x128xf32> to vector<16x128xf32>
    %28 = vector.shape_cast %25 : vector<16x128xf32> to vector<1x16x128xf32>
    tpu.vector_store %arg7[%c0_14, %c0_15, %c0_16], %28 {strides = array<i32>} : memref<1x16x128xf32, #tpu.memory_space<vmem>>, vector<1x16x128xf32>,
    return
  }
  func.func @transform_0(%arg0: i32, %arg1: i32) -> (i32, i32, i32) {
    %c0_i32 = arith.constant 0 : i32
    %c0_i32_0 = arith.constant 0 : i32
    return %arg0, %arg1, %c0_i32 : i32, i32, i32
  }
  func.func @transform_1(%arg0: i32, %arg1: i32) -> (i32, i32) {
    %c0_i32 = arith.constant 0 : i32
    %c0_i32_0 = arith.constant 0 : i32
    %c0_i32_1 = arith.constant 0 : i32
    return %c0_i32, %c0_i32_0 : i32, i32
  }
  func.func @transform_2(%arg0: i32, %arg1: i32) -> (i32, i32) {
    %c0_i32 = arith.constant 0 : i32
    %c0_i32_0 = arith.constant 0 : i32
    %c0_i32_1 = arith.constant 0 : i32
    return %c0_i32, %c0_i32_0 : i32, i32
  }
  func.func @transform_3(%arg0: i32, %arg1: i32) -> (i32, i32) {
    %c0_i32 = arith.constant 0 : i32
    %c0_i32_0 = arith.constant 0 : i32
    %c0_i32_1 = arith.constant 0 : i32
    return %c0_i32, %c0_i32_0 : i32, i32
  }
  func.func @transform_4(%arg0: i32, %arg1: i32) -> (i32, i32) {
    %c0_i32 = arith.constant 0 : i32
    %c0_i32_0 = arith.constant 0 : i32
    %c0_i32_1 = arith.constant 0 : i32
    return %c0_i32, %c0_i32_0 : i32, i32
  }
  func.func @transform_5(%arg0: i32, %arg1: i32) -> (i32, i32, i32) {
    %c0_i32 = arith.constant 0 : i32
    %c0_i32_0 = arith.constant 0 : i32
    return %arg0, %arg1, %c0_i32 : i32, i32, i32
  }
}

module attributes {stable_mosaic.version = 11 : i64} {
  func.func @_matmul_stats_kernel(%arg0: i32, %arg1: i32, %arg2: memref<1x16x16xbf16, #tpu.memory_space<vmem>>, %arg3: memref<1x16x128xbf16, #tpu.memory_space<vmem>>, %arg4: memref<1x16x128xf32, #tpu.memory_space<vmem>>, %arg5: memref<1x128xf32, #tpu.memory_space<vmem>>, %arg6: memref<1x128xf32, #tpu.memory_space<vmem>>) attributes {dimension_semantics = [#tpu.dimension_semantics<arbitrary>, #tpu.dimension_semantics<arbitrary>], iteration_bounds = array<i64: 16, 1>, scalar_prefetch = 0 : i64, scratch_operands = 0 : i64, tpu.core_type = #tpu.core_type<tc>, window_params = [{transform_indices = @transform_0, window_bounds = array<i64: 1, 16, 16>}, {transform_indices = @transform_1, window_bounds = array<i64: 1, 16, 128>}, {transform_indices = @transform_2, window_bounds = array<i64: 1, 16, 128>}, {pipeline_mode = #tpu.pipeline_mode<synchronous>, transform_indices = @transform_3, window_bounds = array<i64: 1, 128>}, {pipeline_mode = #tpu.pipeline_mode<synchronous>, transform_indices = @transform_4, window_bounds = array<i64: 1, 128>}]} {
    %c0 = arith.constant 0 : index
    %c0_0 = arith.constant 0 : index
    %c0_1 = arith.constant 0 : index
    %0 = vector.load %arg2[%c0, %c0_0, %c0_1] : memref<1x16x16xbf16, #tpu.memory_space<vmem>>, vector<1x16x16xbf16>
    %1 = vector.shape_cast %0 : vector<1x16x16xbf16> to vector<16x16xbf16>
    %c0_2 = arith.constant 0 : index
    %c0_3 = arith.constant 0 : index
    %c0_4 = arith.constant 0 : index
    %2 = vector.load %arg3[%c0_2, %c0_3, %c0_4] : memref<1x16x128xbf16, #tpu.memory_space<vmem>>, vector<1x16x128xbf16>
    %3 = vector.shape_cast %2 : vector<1x16x128xbf16> to vector<16x128xbf16>
    %cst = arith.constant dense<0.000000e+00> : vector<16x128xf32>
    %4 = tpu.matmul %1, %3, %cst {dimension_numbers = #tpu.dot_dimension_numbers<[1], [0], [0], [1], [0, 0, 1, 1], [], []>} : vector<16x16xbf16>, vector<16x128xbf16>, vector<16x128xf32> -> vector<16x128xf32>
    %c0_5 = arith.constant 0 : index
    %c0_6 = arith.constant 0 : index
    %c0_7 = arith.constant 0 : index
    %5 = vector.load %arg4[%c0_5, %c0_6, %c0_7] : memref<1x16x128xf32, #tpu.memory_space<vmem>>, vector<1x16x128xf32>
    %6 = vector.shape_cast %5 : vector<1x16x128xf32> to vector<16x128xf32>
    %7 = vector.shape_cast %4 : vector<16x128xf32> to vector<1x16x128xf32>
    tpu.vector_store %arg4[%c0_5, %c0_6, %c0_7], %7 {strides = array<i32>} : memref<1x16x128xf32, #tpu.memory_space<vmem>>, vector<1x16x128xf32>,
    %c0_i32 = arith.constant 0 : i32
    %8 = arith.cmpi eq, %arg0, %c0_i32 : i32
    %c0_i32_8 = arith.constant 0 : i32
    %9 = arith.cmpi eq, %arg1, %c0_i32_8 : i32
    %10 = arith.andi %8, %9 : i1
    %11 = arith.extui %10 : i1 to i32
    %c0_i32_9 = arith.constant 0 : i32
    %12 = arith.cmpi ne, %11, %c0_i32_9 : i32
    scf.if %12 {
      %cst_20 = arith.constant 0.000000e+00 : f32
      %24 = vector.broadcast %cst_20 : f32 to vector<1x128xf32>
      %c0_21 = arith.constant 0 : index
      %c0_22 = arith.constant 0 : index
      %25 = vector.load %arg5[%c0_21, %c0_22] : memref<1x128xf32, #tpu.memory_space<vmem>>, vector<1x128xf32>
      tpu.vector_store %arg5[%c0_21, %c0_22], %24 {strides = array<i32>} : memref<1x128xf32, #tpu.memory_space<vmem>>, vector<1x128xf32>,
      %cst_23 = arith.constant 0.000000e+00 : f32
      %26 = vector.broadcast %cst_23 : f32 to vector<1x128xf32>
      %c0_24 = arith.constant 0 : index
      %c0_25 = arith.constant 0 : index
      %27 = vector.load %arg6[%c0_24, %c0_25] : memref<1x128xf32, #tpu.memory_space<vmem>>, vector<1x128xf32>
      tpu.vector_store %arg6[%c0_24, %c0_25], %26 {strides = array<i32>} : memref<1x128xf32, #tpu.memory_space<vmem>>, vector<1x128xf32>,
    } else {
    }
    %c0_10 = arith.constant 0 : index
    %c0_11 = arith.constant 0 : index
    %13 = vector.load %arg5[%c0_10, %c0_11] : memref<1x128xf32, #tpu.memory_space<vmem>>, vector<1x128xf32>
    %cst_12 = arith.constant dense<0.000000e+00> : vector<128xf32>
    %14 = vector.multi_reduction <add>, %4, %cst_12 [0] : vector<16x128xf32> to vector<128xf32>
    %15 = vector.shape_cast %14 : vector<128xf32> to vector<1x128xf32>
    %16 = arith.addf %13, %15 : vector<1x128xf32>
    %c0_13 = arith.constant 0 : index
    %c0_14 = arith.constant 0 : index
    %17 = vector.load %arg5[%c0_13, %c0_14] : memref<1x128xf32, #tpu.memory_space<vmem>>, vector<1x128xf32>
    tpu.vector_store %arg5[%c0_13, %c0_14], %16 {strides = array<i32>} : memref<1x128xf32, #tpu.memory_space<vmem>>, vector<1x128xf32>,
    %c0_15 = arith.constant 0 : index
    %c0_16 = arith.constant 0 : index
    %18 = vector.load %arg6[%c0_15, %c0_16] : memref<1x128xf32, #tpu.memory_space<vmem>>, vector<1x128xf32>
    %19 = arith.mulf %4, %4 : vector<16x128xf32>
    %cst_17 = arith.constant dense<0.000000e+00> : vector<128xf32>
    %20 = vector.multi_reduction <add>, %19, %cst_17 [0] : vector<16x128xf32> to vector<128xf32>
    %21 = vector.shape_cast %20 : vector<128xf32> to vector<1x128xf32>
    %22 = arith.addf %18, %21 : vector<1x128xf32>
    %c0_18 = arith.constant 0 : index
    %c0_19 = arith.constant 0 : index
    %23 = vector.load %arg6[%c0_18, %c0_19] : memref<1x128xf32, #tpu.memory_space<vmem>>, vector<1x128xf32>
    tpu.vector_store %arg6[%c0_18, %c0_19], %22 {strides = array<i32>} : memref<1x128xf32, #tpu.memory_space<vmem>>, vector<1x128xf32>,
    return
  }
  func.func @transform_0(%arg0: i32, %arg1: i32) -> (i32, i32, i32) {
    %c0_i32 = arith.constant 0 : i32
    %c0_i32_0 = arith.constant 0 : i32
    return %arg0, %arg1, %c0_i32 : i32, i32, i32
  }
  func.func @transform_1(%arg0: i32, %arg1: i32) -> (i32, i32, i32) {
    %c0_i32 = arith.constant 0 : i32
    %c0_i32_0 = arith.constant 0 : i32
    %c0_i32_1 = arith.constant 0 : i32
    return %arg0, %c0_i32, %c0_i32_0 : i32, i32, i32
  }
  func.func @transform_2(%arg0: i32, %arg1: i32) -> (i32, i32, i32) {
    %c0_i32 = arith.constant 0 : i32
    %c0_i32_0 = arith.constant 0 : i32
    return %arg0, %arg1, %c0_i32 : i32, i32, i32
  }
  func.func @transform_3(%arg0: i32, %arg1: i32) -> (i32, i32) {
    %c0_i32 = arith.constant 0 : i32
    %c0_i32_0 = arith.constant 0 : i32
    %c0_i32_1 = arith.constant 0 : i32
    return %c0_i32, %c0_i32_0 : i32, i32
  }
  func.func @transform_4(%arg0: i32, %arg1: i32) -> (i32, i32) {
    %c0_i32 = arith.constant 0 : i32
    %c0_i32_0 = arith.constant 0 : i32
    %c0_i32_1 = arith.constant 0 : i32
    return %c0_i32, %c0_i32_0 : i32, i32
  }
}

module attributes {stable_mosaic.version = 11 : i64} {
  func.func @_bn_relu_kernel(%arg0: i32, %arg1: i32, %arg2: memref<1x32x128xf32, #tpu.memory_space<vmem>>, %arg3: memref<1x128xf32, #tpu.memory_space<vmem>>, %arg4: memref<1x128xf32, #tpu.memory_space<vmem>>, %arg5: memref<1x128xf32, #tpu.memory_space<vmem>>, %arg6: memref<1x128xf32, #tpu.memory_space<vmem>>, %arg7: memref<1x32x128xf32, #tpu.memory_space<vmem>>) attributes {dimension_semantics = [#tpu.dimension_semantics<parallel>, #tpu.dimension_semantics<parallel>], iteration_bounds = array<i64: 4, 1>, scalar_prefetch = 0 : i64, scratch_operands = 0 : i64, tpu.core_type = #tpu.core_type<tc>, window_params = [{transform_indices = @transform_0, window_bounds = array<i64: 1, 32, 128>}, {pipeline_mode = #tpu.pipeline_mode<synchronous>, transform_indices = @transform_1, window_bounds = array<i64: 1, 128>}, {pipeline_mode = #tpu.pipeline_mode<synchronous>, transform_indices = @transform_2, window_bounds = array<i64: 1, 128>}, {pipeline_mode = #tpu.pipeline_mode<synchronous>, transform_indices = @transform_3, window_bounds = array<i64: 1, 128>}, {pipeline_mode = #tpu.pipeline_mode<synchronous>, transform_indices = @transform_4, window_bounds = array<i64: 1, 128>}, {transform_indices = @transform_5, window_bounds = array<i64: 1, 32, 128>}]} {
    %c0 = arith.constant 0 : index
    %c0_0 = arith.constant 0 : index
    %0 = vector.load %arg3[%c0, %c0_0] : memref<1x128xf32, #tpu.memory_space<vmem>>, vector<1x128xf32>
    %cst = arith.constant 7.812500e-03 : f32
    %1 = vector.broadcast %cst : f32 to vector<1x128xf32>
    %2 = arith.mulf %0, %1 : vector<1x128xf32>
    %c0_1 = arith.constant 0 : index
    %c0_2 = arith.constant 0 : index
    %3 = vector.load %arg4[%c0_1, %c0_2] : memref<1x128xf32, #tpu.memory_space<vmem>>, vector<1x128xf32>
    %cst_3 = arith.constant 7.812500e-03 : f32
    %4 = vector.broadcast %cst_3 : f32 to vector<1x128xf32>
    %5 = arith.mulf %3, %4 : vector<1x128xf32>
    %6 = arith.mulf %2, %2 : vector<1x128xf32>
    %7 = arith.subf %5, %6 : vector<1x128xf32>
    %cst_4 = arith.constant 0.000000e+00 : f32
    %8 = vector.broadcast %cst_4 : f32 to vector<1x128xf32>
    %9 = arith.maximumf %7, %8 : vector<1x128xf32>
    %c0_5 = arith.constant 0 : index
    %c0_6 = arith.constant 0 : index
    %10 = vector.load %arg5[%c0_5, %c0_6] : memref<1x128xf32, #tpu.memory_space<vmem>>, vector<1x128xf32>
    %cst_7 = arith.constant 9.99999974E-6 : f32
    %11 = vector.broadcast %cst_7 : f32 to vector<1x128xf32>
    %12 = arith.addf %9, %11 : vector<1x128xf32>
    %13 = math.rsqrt %12 : vector<1x128xf32>
    %14 = arith.mulf %10, %13 : vector<1x128xf32>
    %c0_8 = arith.constant 0 : index
    %c0_9 = arith.constant 0 : index
    %15 = vector.load %arg6[%c0_8, %c0_9] : memref<1x128xf32, #tpu.memory_space<vmem>>, vector<1x128xf32>
    %16 = arith.mulf %2, %14 : vector<1x128xf32>
    %17 = arith.subf %15, %16 : vector<1x128xf32>
    %c0_10 = arith.constant 0 : index
    %c0_11 = arith.constant 0 : index
    %c0_12 = arith.constant 0 : index
    %18 = vector.load %arg2[%c0_10, %c0_11, %c0_12] : memref<1x32x128xf32, #tpu.memory_space<vmem>>, vector<1x32x128xf32>
    %19 = vector.shape_cast %18 : vector<1x32x128xf32> to vector<32x128xf32>
    %20 = vector.broadcast %14 : vector<1x128xf32> to vector<32x128xf32>
    %21 = arith.mulf %19, %20 : vector<32x128xf32>
    %22 = vector.broadcast %17 : vector<1x128xf32> to vector<32x128xf32>
    %23 = arith.addf %21, %22 : vector<32x128xf32>
    %cst_13 = arith.constant 0.000000e+00 : f32
    %24 = vector.broadcast %cst_13 : f32 to vector<32x128xf32>
    %25 = arith.maximumf %23, %24 : vector<32x128xf32>
    %c0_14 = arith.constant 0 : index
    %c0_15 = arith.constant 0 : index
    %c0_16 = arith.constant 0 : index
    %26 = vector.load %arg7[%c0_14, %c0_15, %c0_16] : memref<1x32x128xf32, #tpu.memory_space<vmem>>, vector<1x32x128xf32>
    %27 = vector.shape_cast %26 : vector<1x32x128xf32> to vector<32x128xf32>
    %28 = vector.shape_cast %25 : vector<32x128xf32> to vector<1x32x128xf32>
    tpu.vector_store %arg7[%c0_14, %c0_15, %c0_16], %28 {strides = array<i32>} : memref<1x32x128xf32, #tpu.memory_space<vmem>>, vector<1x32x128xf32>,
    return
  }
  func.func @transform_0(%arg0: i32, %arg1: i32) -> (i32, i32, i32) {
    %c0_i32 = arith.constant 0 : i32
    %c0_i32_0 = arith.constant 0 : i32
    return %arg0, %arg1, %c0_i32 : i32, i32, i32
  }
  func.func @transform_1(%arg0: i32, %arg1: i32) -> (i32, i32) {
    %c0_i32 = arith.constant 0 : i32
    %c0_i32_0 = arith.constant 0 : i32
    %c0_i32_1 = arith.constant 0 : i32
    return %c0_i32, %c0_i32_0 : i32, i32
  }
  func.func @transform_2(%arg0: i32, %arg1: i32) -> (i32, i32) {
    %c0_i32 = arith.constant 0 : i32
    %c0_i32_0 = arith.constant 0 : i32
    %c0_i32_1 = arith.constant 0 : i32
    return %c0_i32, %c0_i32_0 : i32, i32
  }
  func.func @transform_3(%arg0: i32, %arg1: i32) -> (i32, i32) {
    %c0_i32 = arith.constant 0 : i32
    %c0_i32_0 = arith.constant 0 : i32
    %c0_i32_1 = arith.constant 0 : i32
    return %c0_i32, %c0_i32_0 : i32, i32
  }
  func.func @transform_4(%arg0: i32, %arg1: i32) -> (i32, i32) {
    %c0_i32 = arith.constant 0 : i32
    %c0_i32_0 = arith.constant 0 : i32
    %c0_i32_1 = arith.constant 0 : i32
    return %c0_i32, %c0_i32_0 : i32, i32
  }
  func.func @transform_5(%arg0: i32, %arg1: i32) -> (i32, i32, i32) {
    %c0_i32 = arith.constant 0 : i32
    %c0_i32_0 = arith.constant 0 : i32
    return %arg0, %arg1, %c0_i32 : i32, i32, i32
  }
}

module attributes {stable_mosaic.version = 11 : i64} {
  func.func @_matmul_stats_kernel(%arg0: i32, %arg1: i32, %arg2: memref<1x32x256xbf16, #tpu.memory_space<vmem>>, %arg3: memref<1x256x128xbf16, #tpu.memory_space<vmem>>, %arg4: memref<1x32x128xf32, #tpu.memory_space<vmem>>, %arg5: memref<1x128xf32, #tpu.memory_space<vmem>>, %arg6: memref<1x128xf32, #tpu.memory_space<vmem>>) attributes {dimension_semantics = [#tpu.dimension_semantics<arbitrary>, #tpu.dimension_semantics<arbitrary>], iteration_bounds = array<i64: 4, 1>, scalar_prefetch = 0 : i64, scratch_operands = 0 : i64, tpu.core_type = #tpu.core_type<tc>, window_params = [{transform_indices = @transform_0, window_bounds = array<i64: 1, 32, 256>}, {transform_indices = @transform_1, window_bounds = array<i64: 1, 256, 128>}, {transform_indices = @transform_2, window_bounds = array<i64: 1, 32, 128>}, {pipeline_mode = #tpu.pipeline_mode<synchronous>, transform_indices = @transform_3, window_bounds = array<i64: 1, 128>}, {pipeline_mode = #tpu.pipeline_mode<synchronous>, transform_indices = @transform_4, window_bounds = array<i64: 1, 128>}]} {
    %c0 = arith.constant 0 : index
    %c0_0 = arith.constant 0 : index
    %c0_1 = arith.constant 0 : index
    %0 = vector.load %arg2[%c0, %c0_0, %c0_1] : memref<1x32x256xbf16, #tpu.memory_space<vmem>>, vector<1x32x256xbf16>
    %1 = vector.shape_cast %0 : vector<1x32x256xbf16> to vector<32x256xbf16>
    %c0_2 = arith.constant 0 : index
    %c0_3 = arith.constant 0 : index
    %c0_4 = arith.constant 0 : index
    %2 = vector.load %arg3[%c0_2, %c0_3, %c0_4] : memref<1x256x128xbf16, #tpu.memory_space<vmem>>, vector<1x256x128xbf16>
    %3 = vector.shape_cast %2 : vector<1x256x128xbf16> to vector<256x128xbf16>
    %cst = arith.constant dense<0.000000e+00> : vector<32x128xf32>
    %4 = tpu.matmul %1, %3, %cst {dimension_numbers = #tpu.dot_dimension_numbers<[1], [0], [0], [1], [0, 0, 1, 1], [], []>} : vector<32x256xbf16>, vector<256x128xbf16>, vector<32x128xf32> -> vector<32x128xf32>
    %c0_5 = arith.constant 0 : index
    %c0_6 = arith.constant 0 : index
    %c0_7 = arith.constant 0 : index
    %5 = vector.load %arg4[%c0_5, %c0_6, %c0_7] : memref<1x32x128xf32, #tpu.memory_space<vmem>>, vector<1x32x128xf32>
    %6 = vector.shape_cast %5 : vector<1x32x128xf32> to vector<32x128xf32>
    %7 = vector.shape_cast %4 : vector<32x128xf32> to vector<1x32x128xf32>
    tpu.vector_store %arg4[%c0_5, %c0_6, %c0_7], %7 {strides = array<i32>} : memref<1x32x128xf32, #tpu.memory_space<vmem>>, vector<1x32x128xf32>,
    %c0_i32 = arith.constant 0 : i32
    %8 = arith.cmpi eq, %arg0, %c0_i32 : i32
    %c0_i32_8 = arith.constant 0 : i32
    %9 = arith.cmpi eq, %arg1, %c0_i32_8 : i32
    %10 = arith.andi %8, %9 : i1
    %11 = arith.extui %10 : i1 to i32
    %c0_i32_9 = arith.constant 0 : i32
    %12 = arith.cmpi ne, %11, %c0_i32_9 : i32
    scf.if %12 {
      %cst_20 = arith.constant 0.000000e+00 : f32
      %24 = vector.broadcast %cst_20 : f32 to vector<1x128xf32>
      %c0_21 = arith.constant 0 : index
      %c0_22 = arith.constant 0 : index
      %25 = vector.load %arg5[%c0_21, %c0_22] : memref<1x128xf32, #tpu.memory_space<vmem>>, vector<1x128xf32>
      tpu.vector_store %arg5[%c0_21, %c0_22], %24 {strides = array<i32>} : memref<1x128xf32, #tpu.memory_space<vmem>>, vector<1x128xf32>,
      %cst_23 = arith.constant 0.000000e+00 : f32
      %26 = vector.broadcast %cst_23 : f32 to vector<1x128xf32>
      %c0_24 = arith.constant 0 : index
      %c0_25 = arith.constant 0 : index
      %27 = vector.load %arg6[%c0_24, %c0_25] : memref<1x128xf32, #tpu.memory_space<vmem>>, vector<1x128xf32>
      tpu.vector_store %arg6[%c0_24, %c0_25], %26 {strides = array<i32>} : memref<1x128xf32, #tpu.memory_space<vmem>>, vector<1x128xf32>,
    } else {
    }
    %c0_10 = arith.constant 0 : index
    %c0_11 = arith.constant 0 : index
    %13 = vector.load %arg5[%c0_10, %c0_11] : memref<1x128xf32, #tpu.memory_space<vmem>>, vector<1x128xf32>
    %cst_12 = arith.constant dense<0.000000e+00> : vector<128xf32>
    %14 = vector.multi_reduction <add>, %4, %cst_12 [0] : vector<32x128xf32> to vector<128xf32>
    %15 = vector.shape_cast %14 : vector<128xf32> to vector<1x128xf32>
    %16 = arith.addf %13, %15 : vector<1x128xf32>
    %c0_13 = arith.constant 0 : index
    %c0_14 = arith.constant 0 : index
    %17 = vector.load %arg5[%c0_13, %c0_14] : memref<1x128xf32, #tpu.memory_space<vmem>>, vector<1x128xf32>
    tpu.vector_store %arg5[%c0_13, %c0_14], %16 {strides = array<i32>} : memref<1x128xf32, #tpu.memory_space<vmem>>, vector<1x128xf32>,
    %c0_15 = arith.constant 0 : index
    %c0_16 = arith.constant 0 : index
    %18 = vector.load %arg6[%c0_15, %c0_16] : memref<1x128xf32, #tpu.memory_space<vmem>>, vector<1x128xf32>
    %19 = arith.mulf %4, %4 : vector<32x128xf32>
    %cst_17 = arith.constant dense<0.000000e+00> : vector<128xf32>
    %20 = vector.multi_reduction <add>, %19, %cst_17 [0] : vector<32x128xf32> to vector<128xf32>
    %21 = vector.shape_cast %20 : vector<128xf32> to vector<1x128xf32>
    %22 = arith.addf %18, %21 : vector<1x128xf32>
    %c0_18 = arith.constant 0 : index
    %c0_19 = arith.constant 0 : index
    %23 = vector.load %arg6[%c0_18, %c0_19] : memref<1x128xf32, #tpu.memory_space<vmem>>, vector<1x128xf32>
    tpu.vector_store %arg6[%c0_18, %c0_19], %22 {strides = array<i32>} : memref<1x128xf32, #tpu.memory_space<vmem>>, vector<1x128xf32>,
    return
  }
  func.func @transform_0(%arg0: i32, %arg1: i32) -> (i32, i32, i32) {
    %c0_i32 = arith.constant 0 : i32
    %c0_i32_0 = arith.constant 0 : i32
    return %arg0, %arg1, %c0_i32 : i32, i32, i32
  }
  func.func @transform_1(%arg0: i32, %arg1: i32) -> (i32, i32, i32) {
    %c0_i32 = arith.constant 0 : i32
    %c0_i32_0 = arith.constant 0 : i32
    %c0_i32_1 = arith.constant 0 : i32
    return %arg0, %c0_i32, %c0_i32_0 : i32, i32, i32
  }
  func.func @transform_2(%arg0: i32, %arg1: i32) -> (i32, i32, i32) {
    %c0_i32 = arith.constant 0 : i32
    %c0_i32_0 = arith.constant 0 : i32
    return %arg0, %arg1, %c0_i32 : i32, i32, i32
  }
  func.func @transform_3(%arg0: i32, %arg1: i32) -> (i32, i32) {
    %c0_i32 = arith.constant 0 : i32
    %c0_i32_0 = arith.constant 0 : i32
    %c0_i32_1 = arith.constant 0 : i32
    return %c0_i32, %c0_i32_0 : i32, i32
  }
  func.func @transform_4(%arg0: i32, %arg1: i32) -> (i32, i32) {
    %c0_i32 = arith.constant 0 : i32
    %c0_i32_0 = arith.constant 0 : i32
    %c0_i32_1 = arith.constant 0 : i32
    return %c0_i32, %c0_i32_0 : i32, i32
  }
}

module attributes {stable_mosaic.version = 11 : i64} {
  func.func @_matmul_stats_kernel(%arg0: i32, %arg1: i32, %arg2: memref<1x128x128xbf16, #tpu.memory_space<vmem>>, %arg3: memref<1x128x128xbf16, #tpu.memory_space<vmem>>, %arg4: memref<1x128x128xf32, #tpu.memory_space<vmem>>, %arg5: memref<1x128xf32, #tpu.memory_space<vmem>>, %arg6: memref<1x128xf32, #tpu.memory_space<vmem>>) attributes {dimension_semantics = [#tpu.dimension_semantics<arbitrary>, #tpu.dimension_semantics<arbitrary>], iteration_bounds = array<i64: 4, 1>, scalar_prefetch = 0 : i64, scratch_operands = 0 : i64, tpu.core_type = #tpu.core_type<tc>, window_params = [{transform_indices = @transform_0, window_bounds = array<i64: 1, 128, 128>}, {transform_indices = @transform_1, window_bounds = array<i64: 1, 128, 128>}, {transform_indices = @transform_2, window_bounds = array<i64: 1, 128, 128>}, {pipeline_mode = #tpu.pipeline_mode<synchronous>, transform_indices = @transform_3, window_bounds = array<i64: 1, 128>}, {pipeline_mode = #tpu.pipeline_mode<synchronous>, transform_indices = @transform_4, window_bounds = array<i64: 1, 128>}]} {
    %c0 = arith.constant 0 : index
    %c0_0 = arith.constant 0 : index
    %c0_1 = arith.constant 0 : index
    %0 = vector.load %arg2[%c0, %c0_0, %c0_1] : memref<1x128x128xbf16, #tpu.memory_space<vmem>>, vector<1x128x128xbf16>
    %1 = vector.shape_cast %0 : vector<1x128x128xbf16> to vector<128x128xbf16>
    %c0_2 = arith.constant 0 : index
    %c0_3 = arith.constant 0 : index
    %c0_4 = arith.constant 0 : index
    %2 = vector.load %arg3[%c0_2, %c0_3, %c0_4] : memref<1x128x128xbf16, #tpu.memory_space<vmem>>, vector<1x128x128xbf16>
    %3 = vector.shape_cast %2 : vector<1x128x128xbf16> to vector<128x128xbf16>
    %cst = arith.constant dense<0.000000e+00> : vector<128x128xf32>
    %4 = tpu.matmul %1, %3, %cst {dimension_numbers = #tpu.dot_dimension_numbers<[1], [0], [0], [1], [0, 0, 1, 1], [], []>} : vector<128x128xbf16>, vector<128x128xbf16>, vector<128x128xf32> -> vector<128x128xf32>
    %c0_5 = arith.constant 0 : index
    %c0_6 = arith.constant 0 : index
    %c0_7 = arith.constant 0 : index
    %5 = vector.load %arg4[%c0_5, %c0_6, %c0_7] : memref<1x128x128xf32, #tpu.memory_space<vmem>>, vector<1x128x128xf32>
    %6 = vector.shape_cast %5 : vector<1x128x128xf32> to vector<128x128xf32>
    %7 = vector.shape_cast %4 : vector<128x128xf32> to vector<1x128x128xf32>
    tpu.vector_store %arg4[%c0_5, %c0_6, %c0_7], %7 {strides = array<i32>} : memref<1x128x128xf32, #tpu.memory_space<vmem>>, vector<1x128x128xf32>,
    %c0_i32 = arith.constant 0 : i32
    %8 = arith.cmpi eq, %arg0, %c0_i32 : i32
    %c0_i32_8 = arith.constant 0 : i32
    %9 = arith.cmpi eq, %arg1, %c0_i32_8 : i32
    %10 = arith.andi %8, %9 : i1
    %11 = arith.extui %10 : i1 to i32
    %c0_i32_9 = arith.constant 0 : i32
    %12 = arith.cmpi ne, %11, %c0_i32_9 : i32
    scf.if %12 {
      %cst_20 = arith.constant 0.000000e+00 : f32
      %24 = vector.broadcast %cst_20 : f32 to vector<1x128xf32>
      %c0_21 = arith.constant 0 : index
      %c0_22 = arith.constant 0 : index
      %25 = vector.load %arg5[%c0_21, %c0_22] : memref<1x128xf32, #tpu.memory_space<vmem>>, vector<1x128xf32>
      tpu.vector_store %arg5[%c0_21, %c0_22], %24 {strides = array<i32>} : memref<1x128xf32, #tpu.memory_space<vmem>>, vector<1x128xf32>,
      %cst_23 = arith.constant 0.000000e+00 : f32
      %26 = vector.broadcast %cst_23 : f32 to vector<1x128xf32>
      %c0_24 = arith.constant 0 : index
      %c0_25 = arith.constant 0 : index
      %27 = vector.load %arg6[%c0_24, %c0_25] : memref<1x128xf32, #tpu.memory_space<vmem>>, vector<1x128xf32>
      tpu.vector_store %arg6[%c0_24, %c0_25], %26 {strides = array<i32>} : memref<1x128xf32, #tpu.memory_space<vmem>>, vector<1x128xf32>,
    } else {
    }
    %c0_10 = arith.constant 0 : index
    %c0_11 = arith.constant 0 : index
    %13 = vector.load %arg5[%c0_10, %c0_11] : memref<1x128xf32, #tpu.memory_space<vmem>>, vector<1x128xf32>
    %cst_12 = arith.constant dense<0.000000e+00> : vector<128xf32>
    %14 = vector.multi_reduction <add>, %4, %cst_12 [0] : vector<128x128xf32> to vector<128xf32>
    %15 = vector.shape_cast %14 : vector<128xf32> to vector<1x128xf32>
    %16 = arith.addf %13, %15 : vector<1x128xf32>
    %c0_13 = arith.constant 0 : index
    %c0_14 = arith.constant 0 : index
    %17 = vector.load %arg5[%c0_13, %c0_14] : memref<1x128xf32, #tpu.memory_space<vmem>>, vector<1x128xf32>
    tpu.vector_store %arg5[%c0_13, %c0_14], %16 {strides = array<i32>} : memref<1x128xf32, #tpu.memory_space<vmem>>, vector<1x128xf32>,
    %c0_15 = arith.constant 0 : index
    %c0_16 = arith.constant 0 : index
    %18 = vector.load %arg6[%c0_15, %c0_16] : memref<1x128xf32, #tpu.memory_space<vmem>>, vector<1x128xf32>
    %19 = arith.mulf %4, %4 : vector<128x128xf32>
    %cst_17 = arith.constant dense<0.000000e+00> : vector<128xf32>
    %20 = vector.multi_reduction <add>, %19, %cst_17 [0] : vector<128x128xf32> to vector<128xf32>
    %21 = vector.shape_cast %20 : vector<128xf32> to vector<1x128xf32>
    %22 = arith.addf %18, %21 : vector<1x128xf32>
    %c0_18 = arith.constant 0 : index
    %c0_19 = arith.constant 0 : index
    %23 = vector.load %arg6[%c0_18, %c0_19] : memref<1x128xf32, #tpu.memory_space<vmem>>, vector<1x128xf32>
    tpu.vector_store %arg6[%c0_18, %c0_19], %22 {strides = array<i32>} : memref<1x128xf32, #tpu.memory_space<vmem>>, vector<1x128xf32>,
    return
  }
  func.func @transform_0(%arg0: i32, %arg1: i32) -> (i32, i32, i32) {
    %c0_i32 = arith.constant 0 : i32
    %c0_i32_0 = arith.constant 0 : i32
    return %arg0, %arg1, %c0_i32 : i32, i32, i32
  }
  func.func @transform_1(%arg0: i32, %arg1: i32) -> (i32, i32, i32) {
    %c0_i32 = arith.constant 0 : i32
    %c0_i32_0 = arith.constant 0 : i32
    %c0_i32_1 = arith.constant 0 : i32
    return %arg0, %c0_i32, %c0_i32_0 : i32, i32, i32
  }
  func.func @transform_2(%arg0: i32, %arg1: i32) -> (i32, i32, i32) {
    %c0_i32 = arith.constant 0 : i32
    %c0_i32_0 = arith.constant 0 : i32
    return %arg0, %arg1, %c0_i32 : i32, i32, i32
  }
  func.func @transform_3(%arg0: i32, %arg1: i32) -> (i32, i32) {
    %c0_i32 = arith.constant 0 : i32
    %c0_i32_0 = arith.constant 0 : i32
    %c0_i32_1 = arith.constant 0 : i32
    return %c0_i32, %c0_i32_0 : i32, i32
  }
  func.func @transform_4(%arg0: i32, %arg1: i32) -> (i32, i32) {
    %c0_i32 = arith.constant 0 : i32
    %c0_i32_0 = arith.constant 0 : i32
    %c0_i32_1 = arith.constant 0 : i32
    return %c0_i32, %c0_i32_0 : i32, i32
  }
}

module attributes {stable_mosaic.version = 11 : i64} {
  func.func @_bn_relu_kernel(%arg0: i32, %arg1: i32, %arg2: memref<1x128x128xf32, #tpu.memory_space<vmem>>, %arg3: memref<1x128xf32, #tpu.memory_space<vmem>>, %arg4: memref<1x128xf32, #tpu.memory_space<vmem>>, %arg5: memref<1x128xf32, #tpu.memory_space<vmem>>, %arg6: memref<1x128xf32, #tpu.memory_space<vmem>>, %arg7: memref<1x128x128xf32, #tpu.memory_space<vmem>>) attributes {dimension_semantics = [#tpu.dimension_semantics<parallel>, #tpu.dimension_semantics<parallel>], iteration_bounds = array<i64: 4, 1>, scalar_prefetch = 0 : i64, scratch_operands = 0 : i64, tpu.core_type = #tpu.core_type<tc>, window_params = [{transform_indices = @transform_0, window_bounds = array<i64: 1, 128, 128>}, {pipeline_mode = #tpu.pipeline_mode<synchronous>, transform_indices = @transform_1, window_bounds = array<i64: 1, 128>}, {pipeline_mode = #tpu.pipeline_mode<synchronous>, transform_indices = @transform_2, window_bounds = array<i64: 1, 128>}, {pipeline_mode = #tpu.pipeline_mode<synchronous>, transform_indices = @transform_3, window_bounds = array<i64: 1, 128>}, {pipeline_mode = #tpu.pipeline_mode<synchronous>, transform_indices = @transform_4, window_bounds = array<i64: 1, 128>}, {transform_indices = @transform_5, window_bounds = array<i64: 1, 128, 128>}]} {
    %c0 = arith.constant 0 : index
    %c0_0 = arith.constant 0 : index
    %0 = vector.load %arg3[%c0, %c0_0] : memref<1x128xf32, #tpu.memory_space<vmem>>, vector<1x128xf32>
    %cst = arith.constant 0.001953125 : f32
    %1 = vector.broadcast %cst : f32 to vector<1x128xf32>
    %2 = arith.mulf %0, %1 : vector<1x128xf32>
    %c0_1 = arith.constant 0 : index
    %c0_2 = arith.constant 0 : index
    %3 = vector.load %arg4[%c0_1, %c0_2] : memref<1x128xf32, #tpu.memory_space<vmem>>, vector<1x128xf32>
    %cst_3 = arith.constant 0.001953125 : f32
    %4 = vector.broadcast %cst_3 : f32 to vector<1x128xf32>
    %5 = arith.mulf %3, %4 : vector<1x128xf32>
    %6 = arith.mulf %2, %2 : vector<1x128xf32>
    %7 = arith.subf %5, %6 : vector<1x128xf32>
    %cst_4 = arith.constant 0.000000e+00 : f32
    %8 = vector.broadcast %cst_4 : f32 to vector<1x128xf32>
    %9 = arith.maximumf %7, %8 : vector<1x128xf32>
    %c0_5 = arith.constant 0 : index
    %c0_6 = arith.constant 0 : index
    %10 = vector.load %arg5[%c0_5, %c0_6] : memref<1x128xf32, #tpu.memory_space<vmem>>, vector<1x128xf32>
    %cst_7 = arith.constant 9.99999974E-6 : f32
    %11 = vector.broadcast %cst_7 : f32 to vector<1x128xf32>
    %12 = arith.addf %9, %11 : vector<1x128xf32>
    %13 = math.rsqrt %12 : vector<1x128xf32>
    %14 = arith.mulf %10, %13 : vector<1x128xf32>
    %c0_8 = arith.constant 0 : index
    %c0_9 = arith.constant 0 : index
    %15 = vector.load %arg6[%c0_8, %c0_9] : memref<1x128xf32, #tpu.memory_space<vmem>>, vector<1x128xf32>
    %16 = arith.mulf %2, %14 : vector<1x128xf32>
    %17 = arith.subf %15, %16 : vector<1x128xf32>
    %c0_10 = arith.constant 0 : index
    %c0_11 = arith.constant 0 : index
    %c0_12 = arith.constant 0 : index
    %18 = vector.load %arg2[%c0_10, %c0_11, %c0_12] : memref<1x128x128xf32, #tpu.memory_space<vmem>>, vector<1x128x128xf32>
    %19 = vector.shape_cast %18 : vector<1x128x128xf32> to vector<128x128xf32>
    %20 = vector.broadcast %14 : vector<1x128xf32> to vector<128x128xf32>
    %21 = arith.mulf %19, %20 : vector<128x128xf32>
    %22 = vector.broadcast %17 : vector<1x128xf32> to vector<128x128xf32>
    %23 = arith.addf %21, %22 : vector<128x128xf32>
    %cst_13 = arith.constant 0.000000e+00 : f32
    %24 = vector.broadcast %cst_13 : f32 to vector<128x128xf32>
    %25 = arith.maximumf %23, %24 : vector<128x128xf32>
    %c0_14 = arith.constant 0 : index
    %c0_15 = arith.constant 0 : index
    %c0_16 = arith.constant 0 : index
    %26 = vector.load %arg7[%c0_14, %c0_15, %c0_16] : memref<1x128x128xf32, #tpu.memory_space<vmem>>, vector<1x128x128xf32>
    %27 = vector.shape_cast %26 : vector<1x128x128xf32> to vector<128x128xf32>
    %28 = vector.shape_cast %25 : vector<128x128xf32> to vector<1x128x128xf32>
    tpu.vector_store %arg7[%c0_14, %c0_15, %c0_16], %28 {strides = array<i32>} : memref<1x128x128xf32, #tpu.memory_space<vmem>>, vector<1x128x128xf32>,
    return
  }
  func.func @transform_0(%arg0: i32, %arg1: i32) -> (i32, i32, i32) {
    %c0_i32 = arith.constant 0 : i32
    %c0_i32_0 = arith.constant 0 : i32
    return %arg0, %arg1, %c0_i32 : i32, i32, i32
  }
  func.func @transform_1(%arg0: i32, %arg1: i32) -> (i32, i32) {
    %c0_i32 = arith.constant 0 : i32
    %c0_i32_0 = arith.constant 0 : i32
    %c0_i32_1 = arith.constant 0 : i32
    return %c0_i32, %c0_i32_0 : i32, i32
  }
  func.func @transform_2(%arg0: i32, %arg1: i32) -> (i32, i32) {
    %c0_i32 = arith.constant 0 : i32
    %c0_i32_0 = arith.constant 0 : i32
    %c0_i32_1 = arith.constant 0 : i32
    return %c0_i32, %c0_i32_0 : i32, i32
  }
  func.func @transform_3(%arg0: i32, %arg1: i32) -> (i32, i32) {
    %c0_i32 = arith.constant 0 : i32
    %c0_i32_0 = arith.constant 0 : i32
    %c0_i32_1 = arith.constant 0 : i32
    return %c0_i32, %c0_i32_0 : i32, i32
  }
  func.func @transform_4(%arg0: i32, %arg1: i32) -> (i32, i32) {
    %c0_i32 = arith.constant 0 : i32
    %c0_i32_0 = arith.constant 0 : i32
    %c0_i32_1 = arith.constant 0 : i32
    return %c0_i32, %c0_i32_0 : i32, i32
  }
  func.func @transform_5(%arg0: i32, %arg1: i32) -> (i32, i32, i32) {
    %c0_i32 = arith.constant 0 : i32
    %c0_i32_0 = arith.constant 0 : i32
    return %arg0, %arg1, %c0_i32 : i32, i32, i32
  }
}

module attributes {stable_mosaic.version = 11 : i64} {
  func.func @_matmul_stats_kernel(%arg0: i32, %arg1: i32, %arg2: memref<1x512x64xbf16, #tpu.memory_space<vmem>>, %arg3: memref<1x64x128xbf16, #tpu.memory_space<vmem>>, %arg4: memref<1x512x128xf32, #tpu.memory_space<vmem>>, %arg5: memref<1x128xf32, #tpu.memory_space<vmem>>, %arg6: memref<1x128xf32, #tpu.memory_space<vmem>>) attributes {dimension_semantics = [#tpu.dimension_semantics<arbitrary>, #tpu.dimension_semantics<arbitrary>], iteration_bounds = array<i64: 4, 1>, scalar_prefetch = 0 : i64, scratch_operands = 0 : i64, tpu.core_type = #tpu.core_type<tc>, window_params = [{transform_indices = @transform_0, window_bounds = array<i64: 1, 512, 64>}, {transform_indices = @transform_1, window_bounds = array<i64: 1, 64, 128>}, {transform_indices = @transform_2, window_bounds = array<i64: 1, 512, 128>}, {pipeline_mode = #tpu.pipeline_mode<synchronous>, transform_indices = @transform_3, window_bounds = array<i64: 1, 128>}, {pipeline_mode = #tpu.pipeline_mode<synchronous>, transform_indices = @transform_4, window_bounds = array<i64: 1, 128>}]} {
    %c0 = arith.constant 0 : index
    %c0_0 = arith.constant 0 : index
    %c0_1 = arith.constant 0 : index
    %0 = vector.load %arg2[%c0, %c0_0, %c0_1] : memref<1x512x64xbf16, #tpu.memory_space<vmem>>, vector<1x512x64xbf16>
    %1 = vector.shape_cast %0 : vector<1x512x64xbf16> to vector<512x64xbf16>
    %c0_2 = arith.constant 0 : index
    %c0_3 = arith.constant 0 : index
    %c0_4 = arith.constant 0 : index
    %2 = vector.load %arg3[%c0_2, %c0_3, %c0_4] : memref<1x64x128xbf16, #tpu.memory_space<vmem>>, vector<1x64x128xbf16>
    %3 = vector.shape_cast %2 : vector<1x64x128xbf16> to vector<64x128xbf16>
    %cst = arith.constant dense<0.000000e+00> : vector<512x128xf32>
    %4 = tpu.matmul %1, %3, %cst {dimension_numbers = #tpu.dot_dimension_numbers<[1], [0], [0], [1], [0, 0, 1, 1], [], []>} : vector<512x64xbf16>, vector<64x128xbf16>, vector<512x128xf32> -> vector<512x128xf32>
    %c0_5 = arith.constant 0 : index
    %c0_6 = arith.constant 0 : index
    %c0_7 = arith.constant 0 : index
    %5 = vector.load %arg4[%c0_5, %c0_6, %c0_7] : memref<1x512x128xf32, #tpu.memory_space<vmem>>, vector<1x512x128xf32>
    %6 = vector.shape_cast %5 : vector<1x512x128xf32> to vector<512x128xf32>
    %7 = vector.shape_cast %4 : vector<512x128xf32> to vector<1x512x128xf32>
    tpu.vector_store %arg4[%c0_5, %c0_6, %c0_7], %7 {strides = array<i32>} : memref<1x512x128xf32, #tpu.memory_space<vmem>>, vector<1x512x128xf32>,
    %c0_i32 = arith.constant 0 : i32
    %8 = arith.cmpi eq, %arg0, %c0_i32 : i32
    %c0_i32_8 = arith.constant 0 : i32
    %9 = arith.cmpi eq, %arg1, %c0_i32_8 : i32
    %10 = arith.andi %8, %9 : i1
    %11 = arith.extui %10 : i1 to i32
    %c0_i32_9 = arith.constant 0 : i32
    %12 = arith.cmpi ne, %11, %c0_i32_9 : i32
    scf.if %12 {
      %cst_20 = arith.constant 0.000000e+00 : f32
      %24 = vector.broadcast %cst_20 : f32 to vector<1x128xf32>
      %c0_21 = arith.constant 0 : index
      %c0_22 = arith.constant 0 : index
      %25 = vector.load %arg5[%c0_21, %c0_22] : memref<1x128xf32, #tpu.memory_space<vmem>>, vector<1x128xf32>
      tpu.vector_store %arg5[%c0_21, %c0_22], %24 {strides = array<i32>} : memref<1x128xf32, #tpu.memory_space<vmem>>, vector<1x128xf32>,
      %cst_23 = arith.constant 0.000000e+00 : f32
      %26 = vector.broadcast %cst_23 : f32 to vector<1x128xf32>
      %c0_24 = arith.constant 0 : index
      %c0_25 = arith.constant 0 : index
      %27 = vector.load %arg6[%c0_24, %c0_25] : memref<1x128xf32, #tpu.memory_space<vmem>>, vector<1x128xf32>
      tpu.vector_store %arg6[%c0_24, %c0_25], %26 {strides = array<i32>} : memref<1x128xf32, #tpu.memory_space<vmem>>, vector<1x128xf32>,
    } else {
    }
    %c0_10 = arith.constant 0 : index
    %c0_11 = arith.constant 0 : index
    %13 = vector.load %arg5[%c0_10, %c0_11] : memref<1x128xf32, #tpu.memory_space<vmem>>, vector<1x128xf32>
    %cst_12 = arith.constant dense<0.000000e+00> : vector<128xf32>
    %14 = vector.multi_reduction <add>, %4, %cst_12 [0] : vector<512x128xf32> to vector<128xf32>
    %15 = vector.shape_cast %14 : vector<128xf32> to vector<1x128xf32>
    %16 = arith.addf %13, %15 : vector<1x128xf32>
    %c0_13 = arith.constant 0 : index
    %c0_14 = arith.constant 0 : index
    %17 = vector.load %arg5[%c0_13, %c0_14] : memref<1x128xf32, #tpu.memory_space<vmem>>, vector<1x128xf32>
    tpu.vector_store %arg5[%c0_13, %c0_14], %16 {strides = array<i32>} : memref<1x128xf32, #tpu.memory_space<vmem>>, vector<1x128xf32>,
    %c0_15 = arith.constant 0 : index
    %c0_16 = arith.constant 0 : index
    %18 = vector.load %arg6[%c0_15, %c0_16] : memref<1x128xf32, #tpu.memory_space<vmem>>, vector<1x128xf32>
    %19 = arith.mulf %4, %4 : vector<512x128xf32>
    %cst_17 = arith.constant dense<0.000000e+00> : vector<128xf32>
    %20 = vector.multi_reduction <add>, %19, %cst_17 [0] : vector<512x128xf32> to vector<128xf32>
    %21 = vector.shape_cast %20 : vector<128xf32> to vector<1x128xf32>
    %22 = arith.addf %18, %21 : vector<1x128xf32>
    %c0_18 = arith.constant 0 : index
    %c0_19 = arith.constant 0 : index
    %23 = vector.load %arg6[%c0_18, %c0_19] : memref<1x128xf32, #tpu.memory_space<vmem>>, vector<1x128xf32>
    tpu.vector_store %arg6[%c0_18, %c0_19], %22 {strides = array<i32>} : memref<1x128xf32, #tpu.memory_space<vmem>>, vector<1x128xf32>,
    return
  }
  func.func @transform_0(%arg0: i32, %arg1: i32) -> (i32, i32, i32) {
    %c0_i32 = arith.constant 0 : i32
    %c0_i32_0 = arith.constant 0 : i32
    return %arg0, %arg1, %c0_i32 : i32, i32, i32
  }
  func.func @transform_1(%arg0: i32, %arg1: i32) -> (i32, i32, i32) {
    %c0_i32 = arith.constant 0 : i32
    %c0_i32_0 = arith.constant 0 : i32
    %c0_i32_1 = arith.constant 0 : i32
    return %arg0, %c0_i32, %c0_i32_0 : i32, i32, i32
  }
  func.func @transform_2(%arg0: i32, %arg1: i32) -> (i32, i32, i32) {
    %c0_i32 = arith.constant 0 : i32
    %c0_i32_0 = arith.constant 0 : i32
    return %arg0, %arg1, %c0_i32 : i32, i32, i32
  }
  func.func @transform_3(%arg0: i32, %arg1: i32) -> (i32, i32) {
    %c0_i32 = arith.constant 0 : i32
    %c0_i32_0 = arith.constant 0 : i32
    %c0_i32_1 = arith.constant 0 : i32
    return %c0_i32, %c0_i32_0 : i32, i32
  }
  func.func @transform_4(%arg0: i32, %arg1: i32) -> (i32, i32) {
    %c0_i32 = arith.constant 0 : i32
    %c0_i32_0 = arith.constant 0 : i32
    %c0_i32_1 = arith.constant 0 : i32
    return %c0_i32, %c0_i32_0 : i32, i32
  }
}

module attributes {stable_mosaic.version = 11 : i64} {
  func.func @_bn_relu_kernel(%arg0: i32, %arg1: i32, %arg2: memref<1x512x128xf32, #tpu.memory_space<vmem>>, %arg3: memref<1x128xf32, #tpu.memory_space<vmem>>, %arg4: memref<1x128xf32, #tpu.memory_space<vmem>>, %arg5: memref<1x128xf32, #tpu.memory_space<vmem>>, %arg6: memref<1x128xf32, #tpu.memory_space<vmem>>, %arg7: memref<1x512x128xf32, #tpu.memory_space<vmem>>) attributes {dimension_semantics = [#tpu.dimension_semantics<parallel>, #tpu.dimension_semantics<parallel>], iteration_bounds = array<i64: 4, 1>, scalar_prefetch = 0 : i64, scratch_operands = 0 : i64, tpu.core_type = #tpu.core_type<tc>, window_params = [{transform_indices = @transform_0, window_bounds = array<i64: 1, 512, 128>}, {pipeline_mode = #tpu.pipeline_mode<synchronous>, transform_indices = @transform_1, window_bounds = array<i64: 1, 128>}, {pipeline_mode = #tpu.pipeline_mode<synchronous>, transform_indices = @transform_2, window_bounds = array<i64: 1, 128>}, {pipeline_mode = #tpu.pipeline_mode<synchronous>, transform_indices = @transform_3, window_bounds = array<i64: 1, 128>}, {pipeline_mode = #tpu.pipeline_mode<synchronous>, transform_indices = @transform_4, window_bounds = array<i64: 1, 128>}, {transform_indices = @transform_5, window_bounds = array<i64: 1, 512, 128>}]} {
    %c0 = arith.constant 0 : index
    %c0_0 = arith.constant 0 : index
    %0 = vector.load %arg3[%c0, %c0_0] : memref<1x128xf32, #tpu.memory_space<vmem>>, vector<1x128xf32>
    %cst = arith.constant 4.8828125E-4 : f32
    %1 = vector.broadcast %cst : f32 to vector<1x128xf32>
    %2 = arith.mulf %0, %1 : vector<1x128xf32>
    %c0_1 = arith.constant 0 : index
    %c0_2 = arith.constant 0 : index
    %3 = vector.load %arg4[%c0_1, %c0_2] : memref<1x128xf32, #tpu.memory_space<vmem>>, vector<1x128xf32>
    %cst_3 = arith.constant 4.8828125E-4 : f32
    %4 = vector.broadcast %cst_3 : f32 to vector<1x128xf32>
    %5 = arith.mulf %3, %4 : vector<1x128xf32>
    %6 = arith.mulf %2, %2 : vector<1x128xf32>
    %7 = arith.subf %5, %6 : vector<1x128xf32>
    %cst_4 = arith.constant 0.000000e+00 : f32
    %8 = vector.broadcast %cst_4 : f32 to vector<1x128xf32>
    %9 = arith.maximumf %7, %8 : vector<1x128xf32>
    %c0_5 = arith.constant 0 : index
    %c0_6 = arith.constant 0 : index
    %10 = vector.load %arg5[%c0_5, %c0_6] : memref<1x128xf32, #tpu.memory_space<vmem>>, vector<1x128xf32>
    %cst_7 = arith.constant 9.99999974E-6 : f32
    %11 = vector.broadcast %cst_7 : f32 to vector<1x128xf32>
    %12 = arith.addf %9, %11 : vector<1x128xf32>
    %13 = math.rsqrt %12 : vector<1x128xf32>
    %14 = arith.mulf %10, %13 : vector<1x128xf32>
    %c0_8 = arith.constant 0 : index
    %c0_9 = arith.constant 0 : index
    %15 = vector.load %arg6[%c0_8, %c0_9] : memref<1x128xf32, #tpu.memory_space<vmem>>, vector<1x128xf32>
    %16 = arith.mulf %2, %14 : vector<1x128xf32>
    %17 = arith.subf %15, %16 : vector<1x128xf32>
    %c0_10 = arith.constant 0 : index
    %c0_11 = arith.constant 0 : index
    %c0_12 = arith.constant 0 : index
    %18 = vector.load %arg2[%c0_10, %c0_11, %c0_12] : memref<1x512x128xf32, #tpu.memory_space<vmem>>, vector<1x512x128xf32>
    %19 = vector.shape_cast %18 : vector<1x512x128xf32> to vector<512x128xf32>
    %20 = vector.broadcast %14 : vector<1x128xf32> to vector<512x128xf32>
    %21 = arith.mulf %19, %20 : vector<512x128xf32>
    %22 = vector.broadcast %17 : vector<1x128xf32> to vector<512x128xf32>
    %23 = arith.addf %21, %22 : vector<512x128xf32>
    %cst_13 = arith.constant 0.000000e+00 : f32
    %24 = vector.broadcast %cst_13 : f32 to vector<512x128xf32>
    %25 = arith.maximumf %23, %24 : vector<512x128xf32>
    %c0_14 = arith.constant 0 : index
    %c0_15 = arith.constant 0 : index
    %c0_16 = arith.constant 0 : index
    %26 = vector.load %arg7[%c0_14, %c0_15, %c0_16] : memref<1x512x128xf32, #tpu.memory_space<vmem>>, vector<1x512x128xf32>
    %27 = vector.shape_cast %26 : vector<1x512x128xf32> to vector<512x128xf32>
    %28 = vector.shape_cast %25 : vector<512x128xf32> to vector<1x512x128xf32>
    tpu.vector_store %arg7[%c0_14, %c0_15, %c0_16], %28 {strides = array<i32>} : memref<1x512x128xf32, #tpu.memory_space<vmem>>, vector<1x512x128xf32>,
    return
  }
  func.func @transform_0(%arg0: i32, %arg1: i32) -> (i32, i32, i32) {
    %c0_i32 = arith.constant 0 : i32
    %c0_i32_0 = arith.constant 0 : i32
    return %arg0, %arg1, %c0_i32 : i32, i32, i32
  }
  func.func @transform_1(%arg0: i32, %arg1: i32) -> (i32, i32) {
    %c0_i32 = arith.constant 0 : i32
    %c0_i32_0 = arith.constant 0 : i32
    %c0_i32_1 = arith.constant 0 : i32
    return %c0_i32, %c0_i32_0 : i32, i32
  }
  func.func @transform_2(%arg0: i32, %arg1: i32) -> (i32, i32) {
    %c0_i32 = arith.constant 0 : i32
    %c0_i32_0 = arith.constant 0 : i32
    %c0_i32_1 = arith.constant 0 : i32
    return %c0_i32, %c0_i32_0 : i32, i32
  }
  func.func @transform_3(%arg0: i32, %arg1: i32) -> (i32, i32) {
    %c0_i32 = arith.constant 0 : i32
    %c0_i32_0 = arith.constant 0 : i32
    %c0_i32_1 = arith.constant 0 : i32
    return %c0_i32, %c0_i32_0 : i32, i32
  }
  func.func @transform_4(%arg0: i32, %arg1: i32) -> (i32, i32) {
    %c0_i32 = arith.constant 0 : i32
    %c0_i32_0 = arith.constant 0 : i32
    %c0_i32_1 = arith.constant 0 : i32
    return %c0_i32, %c0_i32_0 : i32, i32
  }
  func.func @transform_5(%arg0: i32, %arg1: i32) -> (i32, i32, i32) {
    %c0_i32 = arith.constant 0 : i32
    %c0_i32_0 = arith.constant 0 : i32
    return %arg0, %arg1, %c0_i32 : i32, i32, i32
  }
}

module attributes {stable_mosaic.version = 11 : i64} {
  func.func @_matmul_bias_tanh_kernel(%arg0: i32, %arg1: i32, %arg2: memref<1x512x32xbf16, #tpu.memory_space<vmem>>, %arg3: memref<1x32x128xbf16, #tpu.memory_space<vmem>>, %arg4: memref<1x128xf32, #tpu.memory_space<vmem>>, %arg5: memref<1x512x128xf32, #tpu.memory_space<vmem>>) attributes {dimension_semantics = [#tpu.dimension_semantics<parallel>, #tpu.dimension_semantics<parallel>], iteration_bounds = array<i64: 4, 4>, scalar_prefetch = 0 : i64, scratch_operands = 0 : i64, tpu.core_type = #tpu.core_type<tc>, window_params = [{transform_indices = @transform_0, window_bounds = array<i64: 1, 512, 32>}, {transform_indices = @transform_1, window_bounds = array<i64: 1, 32, 128>}, {pipeline_mode = #tpu.pipeline_mode<synchronous>, transform_indices = @transform_2, window_bounds = array<i64: 1, 128>}, {transform_indices = @transform_3, window_bounds = array<i64: 1, 512, 128>}]} {
    %c0 = arith.constant 0 : index
    %c0_0 = arith.constant 0 : index
    %c0_1 = arith.constant 0 : index
    %0 = vector.load %arg2[%c0, %c0_0, %c0_1] : memref<1x512x32xbf16, #tpu.memory_space<vmem>>, vector<1x512x32xbf16>
    %1 = vector.shape_cast %0 : vector<1x512x32xbf16> to vector<512x32xbf16>
    %c0_2 = arith.constant 0 : index
    %c0_3 = arith.constant 0 : index
    %c0_4 = arith.constant 0 : index
    %2 = vector.load %arg3[%c0_2, %c0_3, %c0_4] : memref<1x32x128xbf16, #tpu.memory_space<vmem>>, vector<1x32x128xbf16>
    %3 = vector.shape_cast %2 : vector<1x32x128xbf16> to vector<32x128xbf16>
    %cst = arith.constant dense<0.000000e+00> : vector<512x128xf32>
    %4 = tpu.matmul %1, %3, %cst {dimension_numbers = #tpu.dot_dimension_numbers<[1], [0], [0], [1], [0, 0, 1, 1], [], []>} : vector<512x32xbf16>, vector<32x128xbf16>, vector<512x128xf32> -> vector<512x128xf32>
    %c0_5 = arith.constant 0 : index
    %c0_6 = arith.constant 0 : index
    %5 = vector.load %arg4[%c0_5, %c0_6] : memref<1x128xf32, #tpu.memory_space<vmem>>, vector<1x128xf32>
    %6 = vector.broadcast %5 : vector<1x128xf32> to vector<512x128xf32>
    %7 = arith.addf %4, %6 : vector<512x128xf32>
    %8 = math.tanh %7 : vector<512x128xf32>
    %c0_7 = arith.constant 0 : index
    %c0_8 = arith.constant 0 : index
    %c0_9 = arith.constant 0 : index
    %9 = vector.load %arg5[%c0_7, %c0_8, %c0_9] : memref<1x512x128xf32, #tpu.memory_space<vmem>>, vector<1x512x128xf32>
    %10 = vector.shape_cast %9 : vector<1x512x128xf32> to vector<512x128xf32>
    %11 = vector.shape_cast %8 : vector<512x128xf32> to vector<1x512x128xf32>
    tpu.vector_store %arg5[%c0_7, %c0_8, %c0_9], %11 {strides = array<i32>} : memref<1x512x128xf32, #tpu.memory_space<vmem>>, vector<1x512x128xf32>,
    return
  }
  func.func @transform_0(%arg0: i32, %arg1: i32) -> (i32, i32, i32) {
    %c0_i32 = arith.constant 0 : i32
    %c0_i32_0 = arith.constant 0 : i32
    return %arg0, %arg1, %c0_i32 : i32, i32, i32
  }
  func.func @transform_1(%arg0: i32, %arg1: i32) -> (i32, i32, i32) {
    %c0_i32 = arith.constant 0 : i32
    %c0_i32_0 = arith.constant 0 : i32
    %c0_i32_1 = arith.constant 0 : i32
    return %arg0, %c0_i32, %c0_i32_0 : i32, i32, i32
  }
  func.func @transform_2(%arg0: i32, %arg1: i32) -> (i32, i32) {
    %c0_i32 = arith.constant 0 : i32
    %c0_i32_0 = arith.constant 0 : i32
    %c0_i32_1 = arith.constant 0 : i32
    return %c0_i32, %c0_i32_0 : i32, i32
  }
  func.func @transform_3(%arg0: i32, %arg1: i32) -> (i32, i32, i32) {
    %c0_i32 = arith.constant 0 : i32
    %c0_i32_0 = arith.constant 0 : i32
    return %arg0, %arg1, %c0_i32 : i32, i32, i32
  }
}

</mosaic_0001>

<bundles_post_ra>
// kernel: gan_decoder_forward.10
= control target key start
LH: loop header
LB: loop body
LE: loop exit
PB: predicated region body
PF: predicated region fallthrough
CT: control target
= control target key end

     0   :  { %10 = vsyncpa [#allocation3], 0  ;;  %s703_s0 = inlined_call_operand.vmem [shape: f32[16,16,128], index: 0, kind: input, shape index: {}]   ;;  %s704_s1 = inlined_call_operand.vmem [shape: f32[1,128], index: 1, kind: input, shape index: {}]   ;;  %s705_s2 = inlined_call_operand.vmem [shape: f32[1,128], index: 2, kind: input, shape index: {}]   ;;  %s706_s3 = inlined_call_operand.hbm [shape: f32[1,128], index: 3, kind: input, shape index: {}]   ;;  %s707_s4 = inlined_call_operand.hbm [shape: f32[1,128], index: 4, kind: input, shape index: {}]   ;;  %s708_s5 = inlined_call_operand.vmem [shape: f32[16,16,128], index: 5, kind: output, shape index: {}]  }
   0x1   :  { %11 = vsyncpa [#allocation5], 0  ;;  %s615_s18 = smov 0   ;;  %s617_s19 = smov 0  }
   0x2   :  { %s619_s20 = smov 0  }
   0x3 LB: > { %s435_s21 = sadd.s32 4294967295, %s581_s20   ;;  %s29_s22 = sadd.s32 1, %s577_s19  ;;  %s581_s20 = sphi %s619_s20, %s17_s20   ;;  %s577_s19 = sphi %s617_s19, %s716_s19   ;;  %s573_s18 = sphi %s615_s18, %s715_s18  }
   0x4   : > { %p31_p0 = scmp.ge.s32.totalorder %s29_s22, 16  ;;  %p437_p1 = scmp.ge.s32.totalorder %s581_s20, 1 }
   0x5   : > { %p174_p2 = scmp.lt.s32.totalorder %s581_s20, 17  ;;  %p640_p4 = scmp.eq.s32.totalorder %s435_s21, 0 }
   0x6   : > { %s718_s22 = smov (%p31_p0, %s29_s22), 0  ;;  %s583_s25 = smov [#allocation2]  }
   0x7   : > { %p636_p3 = pnand %p437_p1, %p174_p2  ;;  %s193_s26 = sshll.u32 %s583_s25, 4  ;;  %s194_s26 = int_to_ptr.vmem [resolvable:$true] %s193_s26 }
   0x8   : > { %s712_s24 = scalar_select %p640_p4, 1, 0 }
   0x9   : > { %p460_p5 = pneg %p636_p3  ;;  %s584_s27 = smov [#allocation4]  }
   0xa   : > { %s204_s28 = sshll.u32 %s584_s27, 4  ;;  %s510_s30 = scalar_lea.vmem %s194_s26, 16  ;;  %s205_s28 = int_to_ptr.vmem [resolvable:$true] %s204_s28 }
   0xb   : > { %p648_p6 = pnand %p640_p4, %p460_p5  ;;  %p511_p8 = scmp.ne.s32.totalorder %s194_s26, %s510_s30 }
   0xc   : > { %s517_s6 = scalar_lea.vmem %s194_s26, 32  ;;  %p518_p11 = scmp.lt.s32.totalorder %s194_s26, %s194_s26 }
   0xd   : > { %p501_p7 = pneg %p648_p6  ;;  %p519_p12 = scmp.lt.s32.totalorder %s517_s6, %s510_s30 }
   0xf   : > { %p513_p9 = pnand %p511_p8, %p501_p7  ;;  %p520_p13 = por %p519_p12, %p518_p11 }
  0x11   : > { %p514_p10 = pneg %p513_p9 }
  0x13   : > { %p521_p0 = pnand %p520_p13, %p514_p10 }
  0x15   : > { %524 = shalt.err (!%p521_p0)
}
  0x16   : > { %463 = dma.hbm_to_vmem [thread:$0]  (!%p648_p6), %s706_s3, 16, %s194_s26, [#allocation3]  }
  0x17   : > { %s536_s9 = scalar_lea.vmem %s205_s28, 16  ;;  %s543_s10 = scalar_lea.vmem %s205_s28, 32 }
  0x18   : > { %p537_p1 = scmp.ne.s32.totalorder %s205_s28, %s536_s9  ;;  %p544_p8 = scmp.lt.s32.totalorder %s205_s28, %s205_s28 }
  0x19   : > { %p545_p9 = scmp.lt.s32.totalorder %s543_s10, %s536_s9 }
  0x1a   : > { %p539_p2 = pnand %p537_p1, %p501_p7 }
  0x1b   : > { %p546_p4 = por %p545_p9, %p544_p8 }
  0x1c   : > { %p540_p5 = pneg %p539_p2 }
  0x1e   : > { %p547_p11 = pnand %p546_p4, %p540_p5 }
  0x20   : > { %550 = shalt.err (!%p547_p11)
}
  0x21   : > { %466 = dma.hbm_to_vmem [thread:$0]  (!%p648_p6), %s707_s4, 16, %s205_s28, [#allocation5]  }
  0x22   : > { %230 = sbr.rel (%p636_p3) target bundleno = 80 (0x50), region = 40  ;;  %p714_p10 = scmp.ne.s32.totalorder (!%p636_p3), %s712_s24, 0 }
  0x27   : > { %564 = dma.done.wait (%p714_p10), [#allocation3], 16  }
  0x28   : > { %566 = vsyncadd (%p714_p10), [#allocation3], 4294967280 }
  0x29   : > { %568 = dma.done.wait (%p714_p10), [#allocation5], 16  }
  0x2a   : > { %570 = vsyncadd (%p714_p10), [#allocation5], 4294967280  ;;  %v290_v0 = vld [vmem:[%s704_s1] sm:$0x1]  ;;  %p271_p3 = scmp.lt.s32.totalorder %s573_s18, 15  ;;  %v307_v8 = vlaneseq }
  0x2b   : > { %v292_v1 = vld [vmem:[%s705_s2] sm:$0x1]  ;;  %v291_v2 = vmul.f32 0.03125, %v290_v0  ;;  %v301_v14 = vld [vmem:[#allocation4] sm:$0x1] }
  0x2c   : > { %v293_v3 = vmul.f32 0.03125, %v292_v1  ;;  %s720_s18 = smov (!%p271_p3, %s573_s18), 15  ;;  %v308_v9 = vshrl.u32 %v307_v8, 7  ;;  %v297_v10 = vld [vmem:[#allocation2] sm:$0x1] }
  0x2d   : > { %v294_v4 = vmul.f32 %v291_v2, %v291_v2  ;;  %s450_s17 = sshll.u32 %s720_s18, 4 }
  0x2e   : > { %s278_s24 = scalar_lea.vmem %s703_s0, %s450_s17  ;;  %v309_v11 = vsub.s32 0, %v308_v9  ;;  %s288_s26 = scalar_lea.vmem %s708_s5, %s450_s17 }
  0x2f   : > { %v295_v5 = vsub.f32 %v293_v3, %v294_v4  ;;  %v304_v15 = vld [vmem:[%s278_s24] sm:$0xff]  ;;  %v305_v16 = vld [vmem:[%s278_s24 + $0x8] sm:$0xff] }
  0x31   : > { %v296_v6 = vmax.f32 %v295_v5, 0.0 }
  0x33   : > { %v298_v7 = vadd.f32 1e-05, %v296_v6 }
  0x35   : > { %497 = vrsqrt.f32 %v298_v7 }
  0x42   : > { %v498_v12 = vpop.eup %497 }
  0x43   : > { %v300_v13 = vmul.f32 %v498_v12, %v297_v10 }
  0x45   : > { %v302_v17 = vmul.f32 %v300_v13, %v291_v2  ;;  %v310_v18 = vrot.slane %v300_v13, %v309_v11 }
  0x47   : > { %v303_v19 = vsub.f32 %v301_v14, %v302_v17  ;;  %v312_v20 = vmul.f32 %v310_v18, %v304_v15  ;;  %v313_v21 = vmul.f32 %v310_v18, %v305_v16 }
  0x49   : > { %v318_v22 = vrot.slane %v303_v19, %v309_v11 }
  0x4b   : > { %v320_v23 = vadd.f32 %v318_v22, %v312_v20  ;;  %v321_v24 = vadd.f32 %v318_v22, %v313_v21 }
  0x4d   : > { %v322_v25 = vmax.f32 %v320_v23, 0.0  ;;  %v323_v26 = vmax.f32 %v321_v24, 0.0 }
  0x4f   : > { %324 = vst [vmem:[%s288_s26] sm:$0xff] %v322_v25  ;;  %325 = vst [vmem:[%s288_s26 + $0x8] sm:$0xff] %v323_v26 }
  0x50 PF: > { %s17_s20 = sadd.s32 1, %s581_s20   ;;  %s715_s18 = smov %s577_s19 }
  0x51   : > { %p14_p4 = scmp.ge.s32.totalorder %s17_s20, 18   ;;  %s716_s19 = smov %s718_s22 }
  0x53   :  { %16 = sbr.rel (!%p14_p4) target bundleno = 3 (0x3), region = 79 }
  0x58   :  { %356 = vsyncpa [#allocation3], 1 }
  0x59   :  { %358 = vsyncpa [#allocation3 + $0x1], 1 }
  0x5a   :  { %359 = vsyncpa [#allocation5], 1 }

// kernel: gan_decoder_forward.9
= control target key start
LH: loop header
LB: loop body
LE: loop exit
PB: predicated region body
PF: predicated region fallthrough
CT: control target
= control target key end

     0   :  { %10 = vsyncpa [#allocation3], 0  ;;  %s809_s0 = inlined_call_operand.vmem [shape: bf16[16,16,16], index: 0, kind: input, shape index: {}]   ;;  %s810_s1 = inlined_call_operand.hbm [shape: bf16[16,16,128], index: 1, kind: input, shape index: {}]   ;;  %s811_s2 = inlined_call_operand.vmem [shape: f32[16,16,128], index: 2, kind: output, shape index: {0}]   ;;  %s812_s3 = inlined_call_operand.vmem [shape: f32[1,128], index: 3, kind: output, shape index: {1}]   ;;  %s813_s4 = inlined_call_operand.vmem [shape: f32[1,128], index: 4, kind: output, shape index: {2}]  }
   0x1   :  { %12 = vsyncpa [#allocation3 + $0x1], 0  ;;  %s691_s15 = smov 0   ;;  %s693_s16 = smov 0  }
   0x2   :  { %s695_s17 = smov 0   ;;  %s697_s18 = smov 0  }
   0x3   :  { %s699_s19 = smov 0   ;;  %s701_s20 = smov 0  }
   0x4 LB: > { %s487_s21 = sadd.s32 4294967295, %s658_s20   ;;  %s30_s22 = sadd.s32 1, %s654_s19  ;;  %s658_s20 = sphi %s701_s20, %s18_s20   ;;  %s654_s19 = sphi %s699_s19, %s821_s19   ;;  %s650_s18 = sphi %s697_s18, %s820_s18   ;;  %s646_s17 = sphi %s695_s17, %s819_s17   ;;  %s642_s16 = sphi %s693_s16, %s818_s16   ;;  %s638_s15 = sphi %s691_s15, %s817_s15  }
   0x5   : > { %p32_p0 = scmp.ge.s32.totalorder %s30_s22, 16  ;;  %s65_s23 = sadd.s32 1, %s646_s17 }
   0x6   : > { %p72_p1 = scmp.ne.s32.totalorder %s646_s17, %s642_s16  ;;  %p73_p2 = scmp.eq.s32.totalorder %s658_s20, 0 }
   0x7   : > { %s823_s22 = smov (%p32_p0, %s30_s22), 0  ;;  %p78_p4 = scmp.ne.s32.totalorder %s642_s16, %s638_s15 }
   0x8   : > { %p727_p3 = por %p73_p2, %p72_p1  ;;  %s62_s25 = ssub.s32 %s654_s19, %s823_s22 }
   0x9   : > { %p79_p5 = scmp.eq.s32.totalorder %s487_s21, 0  ;;  %p63_p6 = scmp.eq.s32.totalorder %s62_s25, 0 }
   0xa   : > { %p524_p8 = scmp.lt.s32.totalorder %s658_s20, 16  ;;  %s185_s28 = sand.u32 1, %s646_s17  }
   0xb   : > { %p734_p7 = por %p79_p5, %p78_p4  ;;  %s506_s29 = sshll.u32 %s654_s19, 7 }
   0xc   : > { %s740_s27 = scalar_select %p63_p6, %s646_s17, %s65_s23  }
   0xd   : > { %s491_s30 = sshll.u32 %s185_s28, 3  ;;  %s195_s7 = scalar_lea.hbm %s810_s1, %s506_s29 }
   0xe   : > { %s189_s8 = scalar_lea.vmem [#allocation2], %s491_s30  ;;  %p749_p9 = pnand %p524_p8, %p727_p3 }
   0xf   : > { %s196_s9 = sshll.u32 %s189_s8, 4  ;;  %s186_s11 = scalar_lea.sflag [#allocation3], %s185_s28  ;;  %s197_s9 = int_to_ptr.vmem [resolvable:$true] %s196_s9 }
  0x10   : > { %p582_p10 = pneg %p749_p9  ;;  %s593_s12 = scalar_lea.vmem %s197_s9, 128 }
  0x11   : > { %p594_p11 = scmp.ne.s32.totalorder %s197_s9, %s593_s12  ;;  %s660_s13 = smov [#allocation2]  }
  0x12   : > { %s598_s14 = sshll.u32 %s660_s13, 4  ;;  %s599_s14 = int_to_ptr.vmem [resolvable:$false] %s598_s14 }
  0x13   : > { %p596_p12 = pnand %p594_p11, %p582_p10  ;;  %s600_s15 = scalar_lea.vmem %s599_s14, 256 }
  0x14   : > { %p601_p0 = scmp.lt.s32.totalorder %s197_s9, %s599_s14  ;;  %p602_p1 = scmp.lt.s32.totalorder %s600_s15, %s593_s12 }
  0x15   : > { %p597_p13 = pneg %p596_p12 }
  0x16   : > { %p603_p2 = por %p602_p1, %p601_p0 }
  0x18   : > { %p604_p3 = pnand %p603_p2, %p597_p13 }
  0x1a   : > { %607 = shalt.err (!%p604_p3)
}
  0x1b   : > { %s661_s21 = smov 64   ;;  %s662_s23 = smov 4  }
  0x1c   : > { %523 = dma.hbm_to_vmem [thread:$0]  (!%p749_p9), %s195_s7, 128, %s197_s9, %s186_s11, %s661_s21, %s661_s21, %s662_s23  }
  0x1d   : > { %p494_p4 = scmp.ge.s32.totalorder %s658_s20, 1  ;;  %p204_p5 = scmp.lt.s32.totalorder %s658_s20, 17 }
  0x1f   : > { %p205_p6 = pnand %p494_p4, %p204_p5 }
  0x20   : > { %s210_s24 = sand.u32 (!%p205_p6), 1, %s642_s16  }
  0x21   : > { %208 = sbr.rel (%p205_p6) target bundleno = 264 (0x108), region = 28  ;;  %s495_s25 = sshll.u32 (!%p205_p6), %s210_s24, 3 }
  0x22   : > { %s211_s28 = scalar_lea.sflag (!%p205_p6), [#allocation3], %s210_s24  ;;  %s214_s29 = scalar_lea.vmem (!%p205_p6), [#allocation2], %s495_s25 }
  0x26   : > { %633 = dma.done.wait (%p734_p7), %s211_s28, 128  }
  0x27   : > { %635 = vsyncadd (%p734_p7), %s211_s28, 4294967168  ;;  %p253_p8 = scmp.lt.s32.totalorder %s650_s18, 15  ;;  %v663_v0 = vmov 0.0   ;;  %vm664_vm0 = vmmov 0   ;;  %v578_v1 = vld [vmem:[%s214_s29] sm:$0xff]   ;;  %vm288_vm1 = vcmask 130048  }
  0x28   : > { %512 = vmatprep.subr.bf16.mxu0 %v663_v0  ;;  %514 = vmatprep.mubr.msk.bf16.mxu0 %vm664_vm0, %v663_v0  ;;  %p335_p7 = scmp.eq.s32.totalorder %s650_s18, 0 }
  0x29   : > { %s254_s30 = scalar_select %p253_p8, %s650_s18, 15  ;;  %513 = vmatpush3.bf16.msra.mxu0 %v578_v1  ;;  %v665_v7 = vmov (%p335_p7), 0.0  }
  0x2a   : > { %341 = vst [vmem:[%s812_s3] sm:$0x1] (%p335_p7), %v665_v7  ;;  %342 = vst [vmem:[%s813_s4] sm:$0x1] (%p335_p7), %v665_v7 }
  0x2b   : > { %s507_s5 = sshll.u32 %s254_s30, 3  ;;  %s508_s26 = sshll.u32 %s254_s30, 4 }
  0x2c   : > { %s260_s8 = scalar_lea.vmem %s809_s0, %s507_s5  ;;  %s270_s11 = scalar_lea.vmem %s811_s2, %s508_s26 }
  0x2d   : > { %v579_v2 = vld [vmem:[%s260_s8] sm:$0xff]  }
  0x2e   : > { %515 = vmatmul.mubr.msk.bf16.vlgmr.msra.gmra.mxu0 %vm288_vm1, %v579_v2 }
  0xee   : > { %v326_v3 = vpop.f32.mrf.mxu0 }
  0xef   : > { %333 = vst [vmem:[%s270_s11] sm:$0xff] %v326_v3 }
  0xf0   : > { %v516_v4 = vpop.f32.mrf.mxu0  ;;  %340 = sbr.rel (!%p335_p7) target bundleno = 245 (0xf5), region = 36 }
  0xf2   : > { %v329_v5 = vpop.f32.mrf.mxu0 }
  0xf3   : > { %334 = vst [vmem:[%s270_s11 + $0x8] sm:$0xff] %v329_v5 }
  0xf4   : > { %v517_v6 = vpop.f32.mrf.mxu0 }
  0xf5 PF: > { %v344_v8 = vadd.f32 %v329_v5, %v326_v3  ;;  %v354_v9 = vmul.f32 %v326_v3, %v326_v3  ;;  %v355_v10 = vmul.f32 %v329_v5, %v329_v5  ;;  %v343_v21 = vld [vmem:[%s812_s3] sm:$0x1] }
  0xf6   : > { %v353_v24 = vld [vmem:[%s813_s4] sm:$0x1] }
  0xf7   : > { %v345_v11 = vrot.slane %v344_v8, 4  ;;  %v356_v12 = vadd.f32 %v355_v10, %v354_v9 }
  0xf9   : > { %v346_v13 = vadd.f32 %v345_v11, %v344_v8  ;;  %v357_v14 = vrot.slane %v356_v12, 4 }
  0xfb   : > { %v347_v15 = vrot.slane %v346_v13, 2  ;;  %v358_v16 = vadd.f32 %v357_v14, %v356_v12 }
  0xfd   : > { %v348_v17 = vadd.f32 %v347_v15, %v346_v13  ;;  %v359_v18 = vrot.slane %v358_v16, 2 }
  0xff   : > { %v349_v19 = vrot.slane %v348_v17, 1  ;;  %v360_v20 = vadd.f32 %v359_v18, %v358_v16 }
 0x101   : > { %v350_v22 = vadd.f32 %v349_v19, %v348_v17  ;;  %v361_v23 = vrot.slane %v360_v20, 1 }
 0x103   : > { %v351_v25 = vadd.f32 %v350_v22, %v343_v21  ;;  %v362_v26 = vadd.f32 %v361_v23, %v360_v20 }
 0x105   : > { %352 = vst [vmem:[%s812_s3] sm:$0x1] %v351_v25  ;;  %v363_v27 = vadd.f32 %v362_v26, %v353_v24 }
 0x107   : > { %364 = vst [vmem:[%s813_s4] sm:$0x1] %v363_v27 }
 0x108 PF: > { %s18_s20 = sadd.s32 1, %s658_s20   ;;  %s817_s15 = smov %s642_s16 }
 0x109   : > { %p15_p9 = scmp.ge.s32.totalorder %s18_s20, 18   ;;  %s818_s16 = smov %s646_s17 }
 0x10a   : > { %s819_s17 = smov %s740_s27  ;;  %s820_s18 = smov %s654_s19 }
 0x10b   : > { %s821_s19 = smov %s823_s22  ;;  %17 = sbr.rel (!%p15_p9) target bundleno = 4 (0x4), region = 91 }
 0x110   :  { %407 = vsyncpa [#allocation3], 1 }
 0x111   :  { %409 = vsyncpa [#allocation3 + $0x1], 1 }

// kernel: gan_decoder_forward.12
= control target key start
LH: loop header
LB: loop body
LE: loop exit
PB: predicated region body
PF: predicated region fallthrough
CT: control target
= control target key end

     0   :  { %10 = vsyncpa [#allocation3], 0  ;;  %s713_s0 = inlined_call_operand.vmem [shape: f32[4,32,128], index: 0, kind: input, shape index: {}]   ;;  %s714_s1 = inlined_call_operand.vmem [shape: f32[1,128], index: 1, kind: input, shape index: {}]   ;;  %s715_s2 = inlined_call_operand.vmem [shape: f32[1,128], index: 2, kind: input, shape index: {}]   ;;  %s716_s3 = inlined_call_operand.hbm [shape: f32[1,128], index: 3, kind: input, shape index: {}]   ;;  %s717_s4 = inlined_call_operand.hbm [shape: f32[1,128], index: 4, kind: input, shape index: {}]   ;;  %s718_s5 = inlined_call_operand.vmem [shape: f32[4,32,128], index: 5, kind: output, shape index: {}]  }
   0x1   :  { %11 = vsyncpa [#allocation5], 0  ;;  %s625_s18 = smov 0   ;;  %s627_s19 = smov 0  }
   0x2   :  { %s629_s20 = smov 0  }
   0x3 LB: > { %s445_s21 = sadd.s32 4294967295, %s591_s20   ;;  %s29_s22 = sadd.s32 1, %s587_s19  ;;  %s591_s20 = sphi %s629_s20, %s17_s20   ;;  %s587_s19 = sphi %s627_s19, %s726_s19   ;;  %s583_s18 = sphi %s625_s18, %s725_s18  }
   0x4   : > { %p31_p0 = scmp.ge.s32.totalorder %s29_s22, 4  ;;  %p447_p1 = scmp.ge.s32.totalorder %s591_s20, 1 }
   0x5   : > { %p174_p2 = scmp.lt.s32.totalorder %s591_s20, 5  ;;  %p650_p4 = scmp.eq.s32.totalorder %s445_s21, 0 }
   0x6   : > { %s728_s22 = smov (%p31_p0, %s29_s22), 0  ;;  %s593_s25 = smov [#allocation2]  }
   0x7   : > { %p646_p3 = pnand %p447_p1, %p174_p2  ;;  %s193_s26 = sshll.u32 %s593_s25, 4  ;;  %s194_s26 = int_to_ptr.vmem [resolvable:$true] %s193_s26 }
   0x8   : > { %s722_s24 = scalar_select %p650_p4, 1, 0 }
   0x9   : > { %p470_p5 = pneg %p646_p3  ;;  %s594_s27 = smov [#allocation4]  }
   0xa   : > { %s204_s28 = sshll.u32 %s594_s27, 4  ;;  %s520_s30 = scalar_lea.vmem %s194_s26, 16  ;;  %s205_s28 = int_to_ptr.vmem [resolvable:$true] %s204_s28 }
   0xb   : > { %p658_p6 = pnand %p650_p4, %p470_p5  ;;  %p521_p8 = scmp.ne.s32.totalorder %s194_s26, %s520_s30 }
   0xc   : > { %s527_s6 = scalar_lea.vmem %s194_s26, 32  ;;  %p528_p11 = scmp.lt.s32.totalorder %s194_s26, %s194_s26 }
   0xd   : > { %p511_p7 = pneg %p658_p6  ;;  %p529_p12 = scmp.lt.s32.totalorder %s527_s6, %s520_s30 }
   0xf   : > { %p523_p9 = pnand %p521_p8, %p511_p7  ;;  %p530_p13 = por %p529_p12, %p528_p11 }
  0x11   : > { %p524_p10 = pneg %p523_p9 }
  0x13   : > { %p531_p0 = pnand %p530_p13, %p524_p10 }
  0x15   : > { %534 = shalt.err (!%p531_p0)
}
  0x16   : > { %473 = dma.hbm_to_vmem [thread:$0]  (!%p658_p6), %s716_s3, 16, %s194_s26, [#allocation3]  }
  0x17   : > { %s546_s9 = scalar_lea.vmem %s205_s28, 16  ;;  %s553_s10 = scalar_lea.vmem %s205_s28, 32 }
  0x18   : > { %p547_p1 = scmp.ne.s32.totalorder %s205_s28, %s546_s9  ;;  %p554_p8 = scmp.lt.s32.totalorder %s205_s28, %s205_s28 }
  0x19   : > { %p555_p9 = scmp.lt.s32.totalorder %s553_s10, %s546_s9 }
  0x1a   : > { %p549_p2 = pnand %p547_p1, %p511_p7 }
  0x1b   : > { %p556_p4 = por %p555_p9, %p554_p8 }
  0x1c   : > { %p550_p5 = pneg %p549_p2 }
  0x1e   : > { %p557_p11 = pnand %p556_p4, %p550_p5 }
  0x20   : > { %560 = shalt.err (!%p557_p11)
}
  0x21   : > { %476 = dma.hbm_to_vmem [thread:$0]  (!%p658_p6), %s717_s4, 16, %s205_s28, [#allocation5]  }
  0x22   : > { %230 = sbr.rel (%p646_p3) target bundleno = 81 (0x51), region = 40  ;;  %p724_p10 = scmp.ne.s32.totalorder (!%p646_p3), %s722_s24, 0 }
  0x27   : > { %574 = dma.done.wait (%p724_p10), [#allocation3], 16  }
  0x28   : > { %576 = vsyncadd (%p724_p10), [#allocation3], 4294967280 }
  0x29   : > { %578 = dma.done.wait (%p724_p10), [#allocation5], 16  }
  0x2a   : > { %580 = vsyncadd (%p724_p10), [#allocation5], 4294967280  ;;  %v290_v0 = vld [vmem:[%s714_s1] sm:$0x1]  ;;  %p271_p3 = scmp.lt.s32.totalorder %s583_s18, 3  ;;  %v309_v8 = vlaneseq }
  0x2b   : > { %v292_v1 = vld [vmem:[%s715_s2] sm:$0x1]  ;;  %v291_v2 = vmul.f32 0.0078125, %v290_v0  ;;  %v301_v14 = vld [vmem:[#allocation4] sm:$0x1] }
  0x2c   : > { %v293_v3 = vmul.f32 0.0078125, %v292_v1  ;;  %s730_s18 = smov (!%p271_p3, %s583_s18), 3  ;;  %v310_v9 = vshrl.u32 %v309_v8, 7  ;;  %v297_v10 = vld [vmem:[#allocation2] sm:$0x1] }
  0x2d   : > { %v294_v4 = vmul.f32 %v291_v2, %v291_v2  ;;  %s460_s17 = sshll.u32 %s730_s18, 5 }
  0x2e   : > { %s278_s24 = scalar_lea.vmem %s713_s0, %s460_s17  ;;  %v311_v11 = vsub.s32 0, %v310_v9  ;;  %s288_s26 = scalar_lea.vmem %s718_s5, %s460_s17 }
  0x2f   : > { %v295_v5 = vsub.f32 %v293_v3, %v294_v4  ;;  %v304_v15 = vld [vmem:[%s278_s24] sm:$0xff]  ;;  %v305_v16 = vld [vmem:[%s278_s24 + $0x8] sm:$0xff]  ;;  %v306_v17 = vld [vmem:[%s278_s24 + $0x10] sm:$0xff] }
  0x30   : > { %v307_v20 = vld [vmem:[%s278_s24 + $0x18] sm:$0xff] }
  0x31   : > { %v296_v6 = vmax.f32 %v295_v5, 0.0 }
  0x33   : > { %v298_v7 = vadd.f32 1e-05, %v296_v6 }
  0x35   : > { %507 = vrsqrt.f32 %v298_v7 }
  0x42   : > { %v508_v12 = vpop.eup %507 }
  0x43   : > { %v300_v13 = vmul.f32 %v508_v12, %v297_v10 }
  0x45   : > { %v302_v18 = vmul.f32 %v300_v13, %v291_v2  ;;  %v312_v19 = vrot.slane %v300_v13, %v311_v11 }
  0x47   : > { %v303_v21 = vsub.f32 %v301_v14, %v302_v18  ;;  %v314_v22 = vmul.f32 %v312_v19, %v304_v15  ;;  %v315_v23 = vmul.f32 %v312_v19, %v305_v16  ;;  %v316_v24 = vmul.f32 %v312_v19, %v306_v17 }
  0x48   : > { %v317_v25 = vmul.f32 %v312_v19, %v307_v20 }
  0x49   : > { %v322_v26 = vrot.slane %v303_v21, %v311_v11 }
  0x4b   : > { %v324_v27 = vadd.f32 %v322_v26, %v314_v22  ;;  %v325_v28 = vadd.f32 %v322_v26, %v315_v23  ;;  %v326_v29 = vadd.f32 %v322_v26, %v316_v24  ;;  %v327_v30 = vadd.f32 %v322_v26, %v317_v25 }
  0x4d   : > { %v328_v31 = vmax.f32 %v324_v27, 0.0  ;;  %v329_v32 = vmax.f32 %v325_v28, 0.0  ;;  %v330_v33 = vmax.f32 %v326_v29, 0.0  ;;  %v331_v34 = vmax.f32 %v327_v30, 0.0 }
  0x4f   : > { %332 = vst [vmem:[%s288_s26] sm:$0xff] %v328_v31  ;;  %333 = vst [vmem:[%s288_s26 + $0x8] sm:$0xff] %v329_v32 }
  0x50   : > { %334 = vst [vmem:[%s288_s26 + $0x10] sm:$0xff] %v330_v33  ;;  %335 = vst [vmem:[%s288_s26 + $0x18] sm:$0xff] %v331_v34 }
  0x51 PF: > { %s17_s20 = sadd.s32 1, %s591_s20   ;;  %s725_s18 = smov %s587_s19 }
  0x52   : > { %p14_p4 = scmp.ge.s32.totalorder %s17_s20, 6   ;;  %s726_s19 = smov %s728_s22 }
  0x54   :  { %16 = sbr.rel (!%p14_p4) target bundleno = 3 (0x3), region = 79 }
  0x59   :  { %366 = vsyncpa [#allocation3], 1 }
  0x5a   :  { %368 = vsyncpa [#allocation3 + $0x1], 1 }
  0x5b   :  { %369 = vsyncpa [#allocation5], 1 }

// kernel: gan_decoder_forward.11
= control target key start
LH: loop header
LB: loop body
LE: loop exit
PB: predicated region body
PF: predicated region fallthrough
CT: control target
= control target key end

     0   :  { %10 = vsyncpa [#allocation3], 0  ;;  %s1060_s0 = inlined_call_operand.vmem [shape: bf16[4,32,256], index: 0, kind: input, shape index: {}]   ;;  %s1061_s1 = inlined_call_operand.hbm [shape: bf16[4,256,128], index: 1, kind: input, shape index: {}]   ;;  %s1062_s2 = inlined_call_operand.vmem [shape: f32[4,32,128], index: 2, kind: output, shape index: {0}]   ;;  %s1063_s3 = inlined_call_operand.vmem [shape: f32[1,128], index: 3, kind: output, shape index: {1}]   ;;  %s1064_s4 = inlined_call_operand.vmem [shape: f32[1,128], index: 4, kind: output, shape index: {2}]  }
   0x1   :  { %12 = vsyncpa [#allocation3 + $0x1], 0  ;;  %s915_s15 = smov 0   ;;  %s917_s16 = smov 0  }
   0x2   :  { %s919_s17 = smov 0   ;;  %s921_s18 = smov 0  }
   0x3   :  { %s923_s19 = smov 0   ;;  %s925_s20 = smov 0  }
   0x4 LB: > { %s642_s21 = sadd.s32 4294967295, %s884_s20   ;;  %s30_s22 = sadd.s32 1, %s880_s19  ;;  %s884_s20 = sphi %s925_s20, %s18_s20   ;;  %s880_s19 = sphi %s923_s19, %s1072_s19   ;;  %s876_s18 = sphi %s921_s18, %s1071_s18   ;;  %s872_s17 = sphi %s919_s17, %s1070_s17   ;;  %s868_s16 = sphi %s917_s16, %s1069_s16   ;;  %s864_s15 = sphi %s915_s15, %s1068_s15  }
   0x5   : > { %p32_p0 = scmp.ge.s32.totalorder %s30_s22, 4  ;;  %s65_s23 = sadd.s32 1, %s872_s17 }
   0x6   : > { %p72_p1 = scmp.ne.s32.totalorder %s872_s17, %s868_s16  ;;  %p73_p2 = scmp.eq.s32.totalorder %s884_s20, 0 }
   0x7   : > { %s1074_s22 = smov (%p32_p0, %s30_s22), 0  ;;  %p78_p4 = scmp.ne.s32.totalorder %s868_s16, %s864_s15 }
   0x8   : > { %p951_p3 = por %p73_p2, %p72_p1  ;;  %s62_s25 = ssub.s32 %s880_s19, %s1074_s22 }
   0x9   : > { %p79_p5 = scmp.eq.s32.totalorder %s642_s21, 0  ;;  %p63_p6 = scmp.eq.s32.totalorder %s62_s25, 0 }
   0xa   : > { %p732_p8 = scmp.lt.s32.totalorder %s884_s20, 4  ;;  %s186_s28 = sand.u32 1, %s872_s17  }
   0xb   : > { %p958_p7 = por %p79_p5, %p78_p4  ;;  %s678_s29 = sshll.u32 %s880_s19, 11 }
   0xc   : > { %s964_s27 = scalar_select %p63_p6, %s872_s17, %s65_s23  }
   0xd   : > { %s646_s30 = sshll.u32 %s186_s28, 7  ;;  %s196_s7 = scalar_lea.hbm %s1061_s1, %s678_s29 }
   0xe   : > { %s190_s8 = scalar_lea.vmem [#allocation2], %s646_s30  ;;  %p973_p9 = pnand %p732_p8, %p951_p3 }
   0xf   : > { %s197_s9 = sshll.u32 %s190_s8, 4  ;;  %s187_s11 = scalar_lea.sflag [#allocation3], %s186_s28  ;;  %s198_s9 = int_to_ptr.vmem [resolvable:$true] %s197_s9 }
  0x10   : > { %p808_p10 = pneg %p973_p9  ;;  %s819_s12 = scalar_lea.vmem %s198_s9, 2048 }
  0x11   : > { %p820_p11 = scmp.ne.s32.totalorder %s198_s9, %s819_s12  ;;  %s886_s13 = smov [#allocation2]  }
  0x12   : > { %s824_s14 = sshll.u32 %s886_s13, 4  ;;  %s825_s14 = int_to_ptr.vmem [resolvable:$false] %s824_s14 }
  0x13   : > { %p822_p12 = pnand %p820_p11, %p808_p10  ;;  %s826_s15 = scalar_lea.vmem %s825_s14, 4096 }
  0x14   : > { %p827_p0 = scmp.lt.s32.totalorder %s198_s9, %s825_s14  ;;  %p828_p1 = scmp.lt.s32.totalorder %s826_s15, %s819_s12 }
  0x15   : > { %p823_p13 = pneg %p822_p12 }
  0x16   : > { %p829_p2 = por %p828_p1, %p827_p0 }
  0x18   : > { %p830_p3 = pnand %p829_p2, %p823_p13 }
  0x1a   : > { %833 = shalt.err (!%p830_p3)
}
  0x1b   : > { %s887_s21 = smov 64   ;;  %s888_s23 = smov 4  }
  0x1c   : > { %731 = dma.hbm_to_vmem [thread:$0]  (!%p973_p9), %s196_s7, 2048, %s198_s9, %s187_s11, %s887_s21, %s887_s21, %s888_s23  }
  0x1d   : > { %p649_p4 = scmp.ge.s32.totalorder %s884_s20, 1  ;;  %p205_p5 = scmp.lt.s32.totalorder %s884_s20, 5 }
  0x1f   : > { %p206_p6 = pnand %p649_p4, %p205_p5 }
  0x20   : > { %s211_s24 = sand.u32 (!%p206_p6), 1, %s868_s16  }
  0x21   : > { %209 = sbr.rel (%p206_p6) target bundleno = 297 (0x129), region = 28  ;;  %s650_s25 = sshll.u32 (!%p206_p6), %s211_s24, 7 }
  0x22   : > { %s212_s28 = scalar_lea.sflag (!%p206_p6), [#allocation3], %s211_s24  ;;  %s984_s29 = scalar_lea.vmem (!%p206_p6), [#allocation2], %s650_s25 }
  0x26   : > { %859 = dma.done.wait (%p958_p7), %s212_s28, 2048  }
  0x27   : > { %861 = vsyncadd (%p958_p7), %s212_s28, 4294965248  ;;  %v784_v0 = vld [vmem:[%s984_s29 + $0x78] sm:$0xff]   ;;  %v786_v2 = vld [vmem:[%s984_s29 + $0x70] sm:$0xff]   ;;  %p255_p8 = scmp.lt.s32.totalorder %s876_s18, 3  ;;  %p481_p7 = scmp.eq.s32.totalorder %s876_s18, 0 }
  0x28   : > { %v785_v1 = vld [vmem:[%s984_s29 + $0x38] sm:$0xff]   ;;  %682 = vmatprep.subr.bf16.mxu0 %v784_v0  ;;  %710 = vmatprep.subr.bf16.mxu1 %v784_v0  ;;  %v787_v3 = vld [vmem:[%s984_s29 + $0x30] sm:$0xff]   ;;  %v788_v4 = vld [vmem:[%s984_s29 + $0x68] sm:$0xff]   ;;  %v889_v32 = vmov (%p481_p7), 0.0  }
  0x29   : > { %683 = vmatpush3.bf16.msra.mxu0 %v785_v1  ;;  %718 = vmatpush3.bf16.msra.mxu1 %v785_v1  ;;  %v789_v5 = vld [vmem:[%s984_s29 + $0x28] sm:$0xff]   ;;  %s998_s26 = scalar_select %p255_p8, %s876_s18, 3  ;;  %v790_v6 = vld [vmem:[%s984_s29 + $0x60] sm:$0xff]   ;;  %v792_v8 = vld [vmem:[%s984_s29 + $0x58] sm:$0xff]   ;;  %487 = vst [vmem:[%s1063_s3] sm:$0x1] (%p481_p7), %v889_v32 }
  0x2a   : > { %684 = vmatprep.subr.bf16.mxu0 %v786_v2  ;;  %711 = vmatprep.subr.bf16.mxu1 %v786_v2  ;;  %v791_v7 = vld [vmem:[%s984_s29 + $0x20] sm:$0xff]   ;;  %v793_v9 = vld [vmem:[%s984_s29 + $0x18] sm:$0xff]   ;;  %v794_v10 = vld [vmem:[%s984_s29 + $0x50] sm:$0xff]   ;;  %488 = vst [vmem:[%s1064_s4] sm:$0x1] (%p481_p7), %v889_v32 }
  0x2b   : > { %s679_s30 = sshll.u32 %s998_s26, 5  ;;  %v795_v13 = vld [vmem:[%s984_s29 + $0x10] sm:$0xff]   ;;  %v796_v14 = vld [vmem:[%s984_s29 + $0x48] sm:$0xff]   ;;  %v798_v16 = vld [vmem:[%s984_s29 + $0x40] sm:$0xff]  }
  0x2c   : > { %s263_s7 = scalar_lea.vmem %s1060_s0, %s679_s30  ;;  %v797_v15 = vld [vmem:[%s984_s29 + $0x8] sm:$0xff]   ;;  %v799_v17 = vld [vmem:[%s984_s29] sm:$0xff]   ;;  %s273_s10 = scalar_lea.vmem %s1062_s2, %s679_s30 }
  0x2d   : > { %685 = vmatpush3.bf16.msra.mxu0 %v787_v3  ;;  %719 = vmatpush3.bf16.msra.mxu1 %v787_v3  ;;  %v802_v11 = vld [vmem:[%s263_s7 + $0x4] ss:$8 sps:$4 sm:$0xff]   ;;  %v805_v12 = vld [vmem:[%s263_s7 + $0x14] ss:$8 sps:$4 sm:$0xff]   ;;  %v800_v18 = vld [vmem:[%s263_s7] ss:$8 sps:$4 sm:$0xff]  }
  0x2e   : > { %686 = vmatprep.subr.bf16.mxu0 %v788_v4  ;;  %712 = vmatprep.subr.bf16.mxu1 %v788_v4  ;;  %v803_v19 = vld [vmem:[%s263_s7 + $0x10] ss:$8 sps:$4 sm:$0xff]  }
  0x2f   : > { %460 = vmatprep.mubr.bf16.mxu0 %v802_v11  ;;  %468 = vmatprep.mubr.bf16.mxu1 %v805_v12 }
  0x31   : > { %687 = vmatpush3.bf16.msra.mxu0 %v789_v5  ;;  %720 = vmatpush3.bf16.msra.mxu1 %v789_v5 }
  0x32   : > { %688 = vmatprep.subr.bf16.mxu0 %v790_v6  ;;  %713 = vmatprep.subr.bf16.mxu1 %v790_v6 }
  0x35   : > { %689 = vmatpush3.bf16.msra.mxu0 %v791_v7  ;;  %721 = vmatpush3.bf16.msra.mxu1 %v791_v7 }
  0x36   : > { %690 = vmatprep.subr.bf16.mxu0 %v792_v8  ;;  %714 = vmatprep.subr.bf16.mxu1 %v792_v8 }
  0x39   : > { %691 = vmatpush3.bf16.msra.mxu0 %v793_v9  ;;  %722 = vmatpush3.bf16.msra.mxu1 %v793_v9 }
  0x3a   : > { %692 = vmatprep.subr.bf16.mxu0 %v794_v10  ;;  %715 = vmatprep.subr.bf16.mxu1 %v794_v10 }
  0x3d   : > { %693 = vmatpush3.bf16.msra.mxu0 %v795_v13  ;;  %723 = vmatpush3.bf16.msra.mxu1 %v795_v13 }
  0x3e   : > { %694 = vmatprep.subr.bf16.mxu0 %v796_v14  ;;  %716 = vmatprep.subr.bf16.mxu1 %v796_v14 }
  0x41   : > { %695 = vmatpush3.bf16.msra.mxu0 %v797_v15  ;;  %724 = vmatpush3.bf16.msra.mxu1 %v797_v15 }
  0x42   : > { %696 = vmatprep.subr.bf16.mxu0 %v798_v16  ;;  %717 = vmatprep.subr.bf16.mxu1 %v798_v16 }
  0x45   : > { %697 = vmatpush3.bf16.msra.mxu0 %v799_v17  ;;  %725 = vmatpush3.bf16.msra.mxu1 %v799_v17 }
  0x48   : > { %461 = vmatmul.mubr.bf16.vlgmr.msra.gmra.mxu0 %v800_v18  ;;  %469 = vmatmul.mubr.bf16.vlgmr.msra.gmra.mxu1 %v803_v19 }
 0x108   : > { %v698_v20 = vpop.f32.mrf.mxu0  ;;  %v704_v21 = vpop.f32.mrf.mxu1 }
 0x10a   : > { %v699_v22 = vpop.f32.mrf.mxu0  ;;  %v705_v23 = vpop.f32.mrf.mxu1 }
 0x10b   : > { %v700_v24 = vadd.f32 %v699_v22, %v698_v20  ;;  %v706_v25 = vadd.f32 %v705_v23, %v704_v21 }
 0x10c   : > { %v701_v26 = vpop.f32.mrf.mxu0  ;;  %v707_v27 = vpop.f32.mrf.mxu1 }
 0x10d   : > { %477 = vst [vmem:[%s273_s10] sm:$0xff] %v700_v24  ;;  %479 = vst [vmem:[%s273_s10 + $0x10] sm:$0xff] %v706_v25  ;;  %486 = sbr.rel (!%p481_p7) target bundleno = 274 (0x112), region = 36 }
 0x10e   : > { %v702_v28 = vpop.f32.mrf.mxu0  ;;  %v708_v29 = vpop.f32.mrf.mxu1 }
 0x10f   : > { %v703_v30 = vadd.f32 %v702_v28, %v701_v26  ;;  %v709_v31 = vadd.f32 %v708_v29, %v707_v27 }
 0x111   : > { %478 = vst [vmem:[%s273_s10 + $0x8] sm:$0xff] %v703_v30  ;;  %480 = vst [vmem:[%s273_s10 + $0x18] sm:$0xff] %v709_v31 }
 0x112 PF: > { %v490_v33 = vadd.f32 %v703_v30, %v700_v24  ;;  %v502_v34 = vmul.f32 %v700_v24, %v700_v24  ;;  %v503_v35 = vmul.f32 %v703_v30, %v703_v30  ;;  %v504_v36 = vmul.f32 %v706_v25, %v706_v25  ;;  %v489_v52 = vld [vmem:[%s1063_s3] sm:$0x1] }
 0x113   : > { %v505_v38 = vmul.f32 %v709_v31, %v709_v31  ;;  %v501_v55 = vld [vmem:[%s1064_s4] sm:$0x1] }
 0x114   : > { %v491_v37 = vadd.f32 %v706_v25, %v490_v33  ;;  %v506_v39 = vadd.f32 %v503_v35, %v502_v34 }
 0x116   : > { %v492_v40 = vadd.f32 %v709_v31, %v491_v37  ;;  %v507_v41 = vadd.f32 %v506_v39, %v504_v36 }
 0x118   : > { %v493_v42 = vrot.slane %v492_v40, 4  ;;  %v508_v43 = vadd.f32 %v507_v41, %v505_v38 }
 0x11a   : > { %v494_v44 = vadd.f32 %v493_v42, %v492_v40  ;;  %v509_v45 = vrot.slane %v508_v43, 4 }
 0x11c   : > { %v495_v46 = vrot.slane %v494_v44, 2  ;;  %v510_v47 = vadd.f32 %v509_v45, %v508_v43 }
 0x11e   : > { %v496_v48 = vadd.f32 %v495_v46, %v494_v44  ;;  %v511_v49 = vrot.slane %v510_v47, 2 }
 0x120   : > { %v497_v50 = vrot.slane %v496_v48, 1  ;;  %v512_v51 = vadd.f32 %v511_v49, %v510_v47 }
 0x122   : > { %v498_v53 = vadd.f32 %v497_v50, %v496_v48  ;;  %v513_v54 = vrot.slane %v512_v51, 1 }
 0x124   : > { %v499_v56 = vadd.f32 %v498_v53, %v489_v52  ;;  %v514_v57 = vadd.f32 %v513_v54, %v512_v51 }
 0x126   : > { %500 = vst [vmem:[%s1063_s3] sm:$0x1] %v499_v56  ;;  %v515_v58 = vadd.f32 %v514_v57, %v501_v55 }
 0x128   : > { %516 = vst [vmem:[%s1064_s4] sm:$0x1] %v515_v58 }
 0x129 PF: > { %s18_s20 = sadd.s32 1, %s884_s20   ;;  %s1068_s15 = smov %s868_s16 }
 0x12a   : > { %p15_p9 = scmp.ge.s32.totalorder %s18_s20, 6   ;;  %s1069_s16 = smov %s872_s17 }
 0x12b   : > { %s1070_s17 = smov %s964_s27  ;;  %s1071_s18 = smov %s880_s19 }
 0x12c   : > { %s1072_s19 = smov %s1074_s22  ;;  %17 = sbr.rel (!%p15_p9) target bundleno = 4 (0x4), region = 91 }
 0x131   :  { %559 = vsyncpa [#allocation3], 1 }
 0x132   :  { %561 = vsyncpa [#allocation3 + $0x1], 1 }

// kernel: gan_decoder_forward.14
= control target key start
LH: loop header
LB: loop body
LE: loop exit
PB: predicated region body
PF: predicated region fallthrough
CT: control target
= control target key end

     0   :  { %s550_s18 = smov 0   ;;  %s552_s19 = smov 0   ;;  %s638_s0 = inlined_call_operand.vmem [shape: f32[4,128,128], index: 0, kind: input, shape index: {}]   ;;  %s639_s1 = inlined_call_operand.vmem [shape: f32[1,128], index: 1, kind: input, shape index: {}]   ;;  %s640_s2 = inlined_call_operand.vmem [shape: f32[1,128], index: 2, kind: input, shape index: {}]   ;;  %s641_s3 = inlined_call_operand.vmem [shape: f32[1,128], index: 3, kind: input, shape index: {}]   ;;  %s642_s4 = inlined_call_operand.vmem [shape: f32[1,128], index: 4, kind: input, shape index: {}]   ;;  %s643_s5 = inlined_call_operand.vmem [shape: f32[4,128,128], index: 5, kind: output, shape index: {}]  }
   0x1   :  { %s554_s20 = smov 0  }
   0x2 LB: > { %s27_s21 = sadd.s32 1, %s514_s19  ;;  %p461_p0 = scmp.ge.s32.totalorder %s518_s20, 1  ;;  %s518_s20 = sphi %s554_s20, %s15_s20   ;;  %s514_s19 = sphi %s552_s19, %s645_s19   ;;  %s510_s18 = sphi %s550_s18, %s644_s18  }
   0x3   : > { %p29_p1 = scmp.ge.s32.totalorder %s27_s21, 4  ;;  %p208_p2 = scmp.lt.s32.totalorder %s518_s20, 5 }
   0x5   : > { %s647_s21 = smov (%p29_p1, %s27_s21), 0  ;;  %p209_p3 = pnand %p461_p0, %p208_p2 }
   0x6   : > { %p245_p4 = scmp.lt.s32.totalorder (!%p209_p3), %s510_s18, 3 }
   0x7   : > { %212 = sbr.rel (%p209_p3) target bundleno = 58 (0x3a), region = 40 }
   0xc   : > { %v264_v0 = vld [vmem:[%s639_s1] sm:$0x1]  ;;  %s649_s18 = smov (!%p245_p4, %s510_s18), 3  ;;  %v295_v8 = vlaneseq }
   0xd   : > { %v266_v1 = vld [vmem:[%s640_s2] sm:$0x1]  ;;  %v265_v2 = vmul.f32 0.001953125, %v264_v0  ;;  %s468_s26 = sshll.u32 %s649_s18, 7 }
   0xe   : > { %v267_v3 = vmul.f32 0.001953125, %v266_v1  ;;  %v296_v9 = vshrl.u32 %v295_v8, 7  ;;  %s582_s29 = scalar_lea.vmem %s638_s0, %s468_s26  ;;  %v271_v10 = vld [vmem:[%s641_s3] sm:$0x1]  ;;  %s609_s11 = scalar_lea.vmem %s643_s5, %s468_s26 }
   0xf   : > { %v268_v4 = vmul.f32 %v265_v2, %v265_v2  ;;  %v275_v14 = vld [vmem:[%s642_s4] sm:$0x1]  ;;  %v279_v16 = vld [vmem:[%s582_s29 + $0x8] sm:$0xff]  ;;  %v280_v17 = vld [vmem:[%s582_s29 + $0x10] sm:$0xff] }
  0x10   : > { %v297_v11 = vsub.s32 0, %v296_v9  ;;  %v278_v15 = vld [vmem:[%s582_s29] sm:$0xff]  ;;  %v281_v18 = vld [vmem:[%s582_s29 + $0x18] sm:$0xff]  ;;  %v283_v22 = vld [vmem:[%s582_s29 + $0x28] sm:$0xff] }
  0x11   : > { %v269_v5 = vsub.f32 %v267_v3, %v268_v4  ;;  %v282_v19 = vld [vmem:[%s582_s29 + $0x20] sm:$0xff]  ;;  %v284_v23 = vld [vmem:[%s582_s29 + $0x30] sm:$0xff]  ;;  %v285_v24 = vld [vmem:[%s582_s29 + $0x38] sm:$0xff] }
  0x12   : > { %v286_v25 = vld [vmem:[%s582_s29 + $0x40] sm:$0xff]  ;;  %v287_v26 = vld [vmem:[%s582_s29 + $0x48] sm:$0xff]  ;;  %v288_v27 = vld [vmem:[%s582_s29 + $0x50] sm:$0xff] }
  0x13   : > { %v270_v6 = vmax.f32 %v269_v5, 0.0  ;;  %v289_v32 = vld [vmem:[%s582_s29 + $0x58] sm:$0xff]  ;;  %v290_v33 = vld [vmem:[%s582_s29 + $0x60] sm:$0xff]  ;;  %v291_v34 = vld [vmem:[%s582_s29 + $0x68] sm:$0xff] }
  0x14   : > { %v292_v59 = vld [vmem:[%s582_s29 + $0x70] sm:$0xff]  ;;  %v293_v60 = vld [vmem:[%s582_s29 + $0x78] sm:$0xff] }
  0x15   : > { %v272_v7 = vadd.f32 1e-05, %v270_v6 }
  0x17   : > { %494 = vrsqrt.f32 %v272_v7 }
  0x24   : > { %v495_v12 = vpop.eup %494 }
  0x25   : > { %v274_v13 = vmul.f32 %v495_v12, %v271_v10 }
  0x27   : > { %v276_v20 = vmul.f32 %v274_v13, %v265_v2  ;;  %v298_v21 = vrot.slane %v274_v13, %v297_v11 }
  0x29   : > { %v277_v28 = vsub.f32 %v275_v14, %v276_v20  ;;  %v300_v29 = vmul.f32 %v298_v21, %v278_v15  ;;  %v301_v30 = vmul.f32 %v298_v21, %v279_v16  ;;  %v302_v31 = vmul.f32 %v298_v21, %v280_v17 }
  0x2a   : > { %v303_v35 = vmul.f32 %v298_v21, %v281_v18  ;;  %v304_v36 = vmul.f32 %v298_v21, %v282_v19  ;;  %v305_v37 = vmul.f32 %v298_v21, %v283_v22  ;;  %v306_v38 = vmul.f32 %v298_v21, %v284_v23 }
  0x2b   : > { %v320_v39 = vrot.slane %v277_v28, %v297_v11  ;;  %v307_v40 = vmul.f32 %v298_v21, %v285_v24  ;;  %v308_v41 = vmul.f32 %v298_v21, %v286_v25  ;;  %v309_v42 = vmul.f32 %v298_v21, %v287_v26 }
  0x2c   : > { %v310_v43 = vmul.f32 %v298_v21, %v288_v27  ;;  %v311_v44 = vmul.f32 %v298_v21, %v289_v32  ;;  %v312_v45 = vmul.f32 %v298_v21, %v290_v33  ;;  %v313_v46 = vmul.f32 %v298_v21, %v291_v34 }
  0x2d   : > { %v322_v47 = vadd.f32 %v320_v39, %v300_v29  ;;  %v323_v48 = vadd.f32 %v320_v39, %v301_v30  ;;  %v324_v49 = vadd.f32 %v320_v39, %v302_v31  ;;  %v325_v50 = vadd.f32 %v320_v39, %v303_v35 }
  0x2e   : > { %v326_v51 = vadd.f32 %v320_v39, %v304_v36  ;;  %v327_v52 = vadd.f32 %v320_v39, %v305_v37  ;;  %v328_v53 = vadd.f32 %v320_v39, %v306_v38  ;;  %v329_v54 = vadd.f32 %v320_v39, %v307_v40 }
  0x2f   : > { %v338_v55 = vmax.f32 %v322_v47, 0.0  ;;  %v339_v56 = vmax.f32 %v323_v48, 0.0  ;;  %v340_v57 = vmax.f32 %v324_v49, 0.0  ;;  %v341_v58 = vmax.f32 %v325_v50, 0.0 }
  0x30   : > { %v342_v61 = vmax.f32 %v326_v51, 0.0  ;;  %v343_v62 = vmax.f32 %v327_v52, 0.0  ;;  %v344_v63 = vmax.f32 %v328_v53, 0.0  ;;  %v345_v0 = vmax.f32 %v329_v54, 0.0 }
  0x31   : > { %354 = vst [vmem:[%s609_s11] sm:$0xff] %v338_v55  ;;  %355 = vst [vmem:[%s609_s11 + $0x8] sm:$0xff] %v339_v56  ;;  %v330_v1 = vadd.f32 %v320_v39, %v308_v41  ;;  %v331_v2 = vadd.f32 %v320_v39, %v309_v42  ;;  %v332_v3 = vadd.f32 %v320_v39, %v310_v43 }
  0x32   : > { %356 = vst [vmem:[%s609_s11 + $0x10] sm:$0xff] %v340_v57  ;;  %357 = vst [vmem:[%s609_s11 + $0x18] sm:$0xff] %v341_v58  ;;  %v333_v4 = vadd.f32 %v320_v39, %v311_v44  ;;  %v334_v5 = vadd.f32 %v320_v39, %v312_v45  ;;  %v335_v6 = vadd.f32 %v320_v39, %v313_v46 }
  0x33   : > { %358 = vst [vmem:[%s609_s11 + $0x20] sm:$0xff] %v342_v61  ;;  %359 = vst [vmem:[%s609_s11 + $0x28] sm:$0xff] %v343_v62  ;;  %v314_v7 = vmul.f32 %v298_v21, %v292_v59  ;;  %v315_v8 = vmul.f32 %v298_v21, %v293_v60  ;;  %v346_v9 = vmax.f32 %v330_v1, 0.0  ;;  %v347_v10 = vmax.f32 %v331_v2, 0.0 }
  0x34   : > { %360 = vst [vmem:[%s609_s11 + $0x30] sm:$0xff] %v344_v63  ;;  %361 = vst [vmem:[%s609_s11 + $0x38] sm:$0xff] %v345_v0  ;;  %v348_v11 = vmax.f32 %v332_v3, 0.0  ;;  %v349_v12 = vmax.f32 %v333_v4, 0.0  ;;  %v350_v13 = vmax.f32 %v334_v5, 0.0  ;;  %v351_v14 = vmax.f32 %v335_v6, 0.0 }
  0x35   : > { %v336_v15 = vadd.f32 %v320_v39, %v314_v7  ;;  %v337_v16 = vadd.f32 %v320_v39, %v315_v8  ;;  %362 = vst [vmem:[%s609_s11 + $0x40] sm:$0xff] %v346_v9  ;;  %363 = vst [vmem:[%s609_s11 + $0x48] sm:$0xff] %v347_v10 }
  0x36   : > { %364 = vst [vmem:[%s609_s11 + $0x50] sm:$0xff] %v348_v11  ;;  %365 = vst [vmem:[%s609_s11 + $0x58] sm:$0xff] %v349_v12 }
  0x37   : > { %366 = vst [vmem:[%s609_s11 + $0x60] sm:$0xff] %v350_v13  ;;  %367 = vst [vmem:[%s609_s11 + $0x68] sm:$0xff] %v351_v14  ;;  %v352_v17 = vmax.f32 %v336_v15, 0.0  ;;  %v353_v18 = vmax.f32 %v337_v16, 0.0 }
  0x39   : > { %368 = vst [vmem:[%s609_s11 + $0x70] sm:$0xff] %v352_v17  ;;  %369 = vst [vmem:[%s609_s11 + $0x78] sm:$0xff] %v353_v18 }
  0x3a PF: > { %s15_s20 = sadd.s32 1, %s518_s20   ;;  %s644_s18 = smov %s514_s19 }
  0x3b   : > { %p12_p5 = scmp.ge.s32.totalorder %s15_s20, 6   ;;  %s645_s19 = smov %s647_s21 }
  0x3d   :  { %14 = sbr.rel (!%p12_p5) target bundleno = 2 (0x2), region = 70 }

// kernel: gan_decoder_forward.13
= control target key start
LH: loop header
LB: loop body
LE: loop exit
PB: predicated region body
PF: predicated region fallthrough
CT: control target
= control target key end

     0   :  { %s866_s15 = smov 0   ;;  %s868_s16 = smov 0   ;;  %s969_s0 = inlined_call_operand.vmem [shape: bf16[4,128,128], index: 0, kind: input, shape index: {}]   ;;  %s970_s1 = inlined_call_operand.vmem [shape: bf16[4,128,128], index: 1, kind: input, shape index: {}]   ;;  %s971_s2 = inlined_call_operand.vmem [shape: f32[4,128,128], index: 2, kind: output, shape index: {0}]   ;;  %s972_s3 = inlined_call_operand.vmem [shape: f32[1,128], index: 3, kind: output, shape index: {1}]   ;;  %s973_s4 = inlined_call_operand.vmem [shape: f32[1,128], index: 4, kind: output, shape index: {2}]  }
   0x1   :  { %s870_s17 = smov 0  }
   0x2 LB: > { %s27_s18 = sadd.s32 1, %s834_s16  ;;  %p681_p0 = scmp.ge.s32.totalorder %s838_s17, 1  ;;  %s838_s17 = sphi %s870_s17, %s15_s17   ;;  %s834_s16 = sphi %s868_s16, %s975_s16   ;;  %s830_s15 = sphi %s866_s15, %s974_s15  }
   0x3   : > { %p29_p1 = scmp.ge.s32.totalorder %s27_s18, 4  ;;  %p188_p2 = scmp.lt.s32.totalorder %s838_s17, 5 }
   0x5   : > { %s977_s18 = smov (%p29_p1, %s27_s18), 0  ;;  %p189_p3 = pnand %p681_p0, %p188_p2 }
   0x6   : > { %p228_p4 = scmp.lt.s32.totalorder (!%p189_p3), %s830_s15, 3  ;;  %p494_p5 = scmp.eq.s32.totalorder (!%p189_p3), %s830_s15, 0 }
   0x7   : > { %192 = sbr.rel (%p189_p3) target bundleno = 304 (0x130), region = 28 }
   0xc   : > { %s888_s19 = scalar_select %p228_p4, %s830_s15, 3  ;;  %v840_v32 = vmov (%p494_p5), 0.0  }
   0xd   : > { %500 = vst [vmem:[%s972_s3] sm:$0x1] (%p494_p5), %v840_v32  ;;  %501 = vst [vmem:[%s973_s4] sm:$0x1] (%p494_p5), %v840_v32 }
   0xe   : > { %s707_s20 = sshll.u32 %s888_s19, 6  ;;  %s709_s27 = sshll.u32 %s888_s19, 7 }
   0xf   : > { %s894_s23 = scalar_lea.vmem %s970_s1, %s707_s20  ;;  %s902_s26 = scalar_lea.vmem %s969_s0, %s707_s20 }
  0x10   : > { %v800_v0 = vld [vmem:[%s894_s23 + $0x38] sm:$0xff]   ;;  %v801_v1 = vld [vmem:[%s894_s23 + $0x30] sm:$0xff]   ;;  %v802_v2 = vld [vmem:[%s894_s23 + $0x28] sm:$0xff]   ;;  %s922_s30 = scalar_lea.vmem %s971_s2, %s709_s27 }
  0x11   : > { %727 = vmatprep.subr.bf16.mxu0 %v800_v0  ;;  %759 = vmatprep.subr.bf16.mxu1 %v800_v0  ;;  %v803_v3 = vld [vmem:[%s894_s23 + $0x20] sm:$0xff]   ;;  %v804_v6 = vld [vmem:[%s894_s23 + $0x18] sm:$0xff]   ;;  %v805_v7 = vld [vmem:[%s894_s23 + $0x10] sm:$0xff]  }
  0x12   : > { %728 = vmatpush3.bf16.msra.mxu0 %v800_v0  ;;  %767 = vmatpush3.bf16.msra.mxu1 %v800_v0  ;;  %v808_v4 = vld [vmem:[%s902_s26] sm:$0xff]   ;;  %v806_v8 = vld [vmem:[%s894_s23 + $0x8] sm:$0xff]   ;;  %v812_v12 = vld [vmem:[%s902_s26 + $0x10] sm:$0xff]  }
  0x13   : > { %729 = vmatprep.subr.bf16.mxu0 %v801_v1  ;;  %760 = vmatprep.subr.bf16.mxu1 %v801_v1  ;;  %v809_v5 = vld [vmem:[%s902_s26 + $0x20] sm:$0xff]   ;;  %v810_v10 = vld [vmem:[%s902_s26 + $0x8] sm:$0xff]   ;;  %v813_v13 = vld [vmem:[%s902_s26 + $0x30] sm:$0xff]  }
  0x14   : > { %743 = vmatprep.mubr.bf16.mxu0 %v808_v4  ;;  %751 = vmatprep.mubr.bf16.mxu1 %v809_v5  ;;  %v807_v9 = vld [vmem:[%s894_s23] sm:$0xff]   ;;  %v811_v11 = vld [vmem:[%s902_s26 + $0x28] sm:$0xff]   ;;  %v814_v14 = vld [vmem:[%s902_s26 + $0x18] sm:$0xff]  }
  0x15   : > { %v815_v15 = vld [vmem:[%s902_s26 + $0x38] sm:$0xff]  }
  0x16   : > { %730 = vmatpush3.bf16.msra.mxu0 %v801_v1  ;;  %768 = vmatpush3.bf16.msra.mxu1 %v801_v1 }
  0x17   : > { %731 = vmatprep.subr.bf16.mxu0 %v802_v2  ;;  %761 = vmatprep.subr.bf16.mxu1 %v802_v2 }
  0x1a   : > { %732 = vmatpush3.bf16.msra.mxu0 %v802_v2  ;;  %769 = vmatpush3.bf16.msra.mxu1 %v802_v2 }
  0x1b   : > { %733 = vmatprep.subr.bf16.mxu0 %v803_v3  ;;  %762 = vmatprep.subr.bf16.mxu1 %v803_v3 }
  0x1e   : > { %734 = vmatpush3.bf16.msra.mxu0 %v803_v3  ;;  %770 = vmatpush3.bf16.msra.mxu1 %v803_v3 }
  0x1f   : > { %735 = vmatprep.subr.bf16.mxu0 %v804_v6  ;;  %763 = vmatprep.subr.bf16.mxu1 %v804_v6 }
  0x22   : > { %736 = vmatpush3.bf16.msra.mxu0 %v804_v6  ;;  %771 = vmatpush3.bf16.msra.mxu1 %v804_v6 }
  0x23   : > { %737 = vmatprep.subr.bf16.mxu0 %v805_v7  ;;  %764 = vmatprep.subr.bf16.mxu1 %v805_v7 }
  0x26   : > { %738 = vmatpush3.bf16.msra.mxu0 %v805_v7  ;;  %772 = vmatpush3.bf16.msra.mxu1 %v805_v7 }
  0x27   : > { %739 = vmatprep.subr.bf16.mxu0 %v806_v8  ;;  %765 = vmatprep.subr.bf16.mxu1 %v806_v8 }
  0x2a   : > { %740 = vmatpush3.bf16.msra.mxu0 %v806_v8  ;;  %773 = vmatpush3.bf16.msra.mxu1 %v806_v8 }
  0x2b   : > { %741 = vmatprep.subr.bf16.mxu0 %v807_v9  ;;  %766 = vmatprep.subr.bf16.mxu1 %v807_v9 }
  0x2e   : > { %742 = vmatpush3.bf16.msra.mxu0 %v807_v9  ;;  %774 = vmatpush3.bf16.msra.mxu1 %v807_v9 }
  0x31   : > { %744 = vmatmul.mubr.bf16.vlgmr.msra.gmra.mxu0 %v810_v10  ;;  %752 = vmatmul.mubr.bf16.vlgmr.msra.gmra.mxu1 %v811_v11 }
  0x32   : > { %747 = vmatprep.mubr.bf16.mxu0 %v812_v12  ;;  %755 = vmatprep.mubr.bf16.mxu1 %v813_v13 }
  0x39   : > { %748 = vmatmul.mubr.bf16.gmra.mxu0 %v814_v14  ;;  %756 = vmatmul.mubr.bf16.gmra.mxu1 %v815_v15 }
  0xf1   : > { %v745_v16 = vpop.f32.mrf.mxu0  ;;  %v753_v17 = vpop.f32.mrf.mxu1 }
  0xf2   : > { %480 = vst [vmem:[%s922_s30 + $0x10] sm:$0xff] %v745_v16  ;;  %488 = vst [vmem:[%s922_s30 + $0x50] sm:$0xff] %v753_v17 }
  0xf3   : > { %v415_v18 = vpop.f32.mrf.mxu0  ;;  %v447_v19 = vpop.f32.mrf.mxu1 }
  0xf4   : > { %478 = vst [vmem:[%s922_s30] sm:$0xff] %v415_v18  ;;  %486 = vst [vmem:[%s922_s30 + $0x40] sm:$0xff] %v447_v19 }
  0xf5   : > { %v746_v20 = vpop.f32.mrf.mxu0  ;;  %v754_v21 = vpop.f32.mrf.mxu1 }
  0xf6   : > { %481 = vst [vmem:[%s922_s30 + $0x18] sm:$0xff] %v746_v20  ;;  %489 = vst [vmem:[%s922_s30 + $0x58] sm:$0xff] %v754_v21 }
  0xf7   : > { %v418_v22 = vpop.f32.mrf.mxu0  ;;  %v450_v23 = vpop.f32.mrf.mxu1 }
  0xf8   : > { %479 = vst [vmem:[%s922_s30 + $0x8] sm:$0xff] %v418_v22  ;;  %487 = vst [vmem:[%s922_s30 + $0x48] sm:$0xff] %v450_v23 }
  0xf9   : > { %v749_v24 = vpop.f32.mrf.mxu0  ;;  %v757_v25 = vpop.f32.mrf.mxu1 }
  0xfa   : > { %484 = vst [vmem:[%s922_s30 + $0x30] sm:$0xff] %v749_v24  ;;  %492 = vst [vmem:[%s922_s30 + $0x70] sm:$0xff] %v757_v25 }
  0xfb   : > { %v431_v26 = vpop.f32.mrf.mxu0  ;;  %v463_v27 = vpop.f32.mrf.mxu1 }
  0xfc   : > { %482 = vst [vmem:[%s922_s30 + $0x20] sm:$0xff] %v431_v26  ;;  %490 = vst [vmem:[%s922_s30 + $0x60] sm:$0xff] %v463_v27  ;;  %499 = sbr.rel (!%p494_p5) target bundleno = 257 (0x101), region = 32 }
  0xfd   : > { %v750_v28 = vpop.f32.mrf.mxu0  ;;  %v758_v29 = vpop.f32.mrf.mxu1 }
  0xfe   : > { %485 = vst [vmem:[%s922_s30 + $0x38] sm:$0xff] %v750_v28  ;;  %493 = vst [vmem:[%s922_s30 + $0x78] sm:$0xff] %v758_v29 }
  0xff   : > { %v434_v30 = vpop.f32.mrf.mxu0  ;;  %v466_v31 = vpop.f32.mrf.mxu1 }
 0x100   : > { %483 = vst [vmem:[%s922_s30 + $0x28] sm:$0xff] %v434_v30  ;;  %491 = vst [vmem:[%s922_s30 + $0x68] sm:$0xff] %v466_v31 }
 0x101 PF: > { %v503_v33 = vadd.f32 %v418_v22, %v415_v18  ;;  %v527_v34 = vmul.f32 %v415_v18, %v415_v18  ;;  %v528_v35 = vmul.f32 %v418_v22, %v418_v22  ;;  %v529_v37 = vmul.f32 %v745_v16, %v745_v16 }
 0x102   : > { %v530_v39 = vmul.f32 %v746_v20, %v746_v20  ;;  %v531_v42 = vmul.f32 %v431_v26, %v431_v26  ;;  %v532_v45 = vmul.f32 %v434_v30, %v434_v30  ;;  %v533_v48 = vmul.f32 %v749_v24, %v749_v24 }
 0x103   : > { %v504_v36 = vadd.f32 %v745_v16, %v503_v33  ;;  %v543_v40 = vadd.f32 %v528_v35, %v527_v34  ;;  %v534_v51 = vmul.f32 %v750_v28, %v750_v28  ;;  %v535_v54 = vmul.f32 %v447_v19, %v447_v19 }
 0x104   : > { %v536_v57 = vmul.f32 %v450_v23, %v450_v23  ;;  %v537_v60 = vmul.f32 %v753_v17, %v753_v17  ;;  %v538_v63 = vmul.f32 %v754_v21, %v754_v21  ;;  %v539_v2 = vmul.f32 %v463_v27, %v463_v27 }
 0x105   : > { %v505_v38 = vadd.f32 %v746_v20, %v504_v36  ;;  %v544_v43 = vadd.f32 %v543_v40, %v529_v37  ;;  %v540_v5 = vmul.f32 %v466_v31, %v466_v31  ;;  %v541_v8 = vmul.f32 %v757_v25, %v757_v25 }
 0x106   : > { %v542_v11 = vmul.f32 %v758_v29, %v758_v29 }
 0x107   : > { %v506_v41 = vadd.f32 %v505_v38, %v431_v26  ;;  %v545_v46 = vadd.f32 %v544_v43, %v530_v39 }
 0x109   : > { %v507_v44 = vadd.f32 %v506_v41, %v434_v30  ;;  %v546_v49 = vadd.f32 %v545_v46, %v531_v42 }
 0x10b   : > { %v508_v47 = vadd.f32 %v749_v24, %v507_v44  ;;  %v547_v52 = vadd.f32 %v546_v49, %v532_v45 }
 0x10d   : > { %v509_v50 = vadd.f32 %v750_v28, %v508_v47  ;;  %v548_v55 = vadd.f32 %v547_v52, %v533_v48  ;;  %v526_v28 = vld [vmem:[%s973_s4] sm:$0x1] }
 0x10f   : > { %v510_v53 = vadd.f32 %v509_v50, %v447_v19  ;;  %v549_v58 = vadd.f32 %v548_v55, %v534_v51 }
 0x111   : > { %v511_v56 = vadd.f32 %v510_v53, %v450_v23  ;;  %v550_v61 = vadd.f32 %v549_v58, %v535_v54  ;;  %v502_v23 = vld [vmem:[%s972_s3] sm:$0x1] }
 0x113   : > { %v512_v59 = vadd.f32 %v753_v17, %v511_v56  ;;  %v551_v0 = vadd.f32 %v550_v61, %v536_v57 }
 0x115   : > { %v513_v62 = vadd.f32 %v754_v21, %v512_v59  ;;  %v552_v3 = vadd.f32 %v551_v0, %v537_v60 }
 0x117   : > { %v514_v1 = vadd.f32 %v513_v62, %v463_v27  ;;  %v553_v6 = vadd.f32 %v552_v3, %v538_v63 }
 0x119   : > { %v515_v4 = vadd.f32 %v514_v1, %v466_v31  ;;  %v554_v9 = vadd.f32 %v553_v6, %v539_v2 }
 0x11b   : > { %v516_v7 = vadd.f32 %v757_v25, %v515_v4  ;;  %v555_v12 = vadd.f32 %v554_v9, %v540_v5 }
 0x11d   : > { %v517_v10 = vadd.f32 %v758_v29, %v516_v7  ;;  %v556_v14 = vadd.f32 %v555_v12, %v541_v8 }
 0x11f   : > { %v518_v13 = vrot.slane %v517_v10, 4  ;;  %v557_v16 = vadd.f32 %v556_v14, %v542_v11 }
 0x121   : > { %v519_v15 = vadd.f32 %v518_v13, %v517_v10  ;;  %v558_v18 = vrot.slane %v557_v16, 4 }
 0x123   : > { %v520_v17 = vrot.slane %v519_v15, 2  ;;  %v559_v20 = vadd.f32 %v558_v18, %v557_v16 }
 0x125   : > { %v521_v19 = vadd.f32 %v520_v17, %v519_v15  ;;  %v560_v22 = vrot.slane %v559_v20, 2 }
 0x127   : > { %v522_v21 = vrot.slane %v521_v19, 1  ;;  %v561_v25 = vadd.f32 %v560_v22, %v559_v20 }
 0x129   : > { %v523_v24 = vadd.f32 %v522_v21, %v521_v19  ;;  %v562_v27 = vrot.slane %v561_v25, 1 }
 0x12b   : > { %v524_v26 = vadd.f32 %v523_v24, %v502_v23  ;;  %v563_v29 = vadd.f32 %v562_v27, %v561_v25 }
 0x12d   : > { %525 = vst [vmem:[%s972_s3] sm:$0x1] %v524_v26  ;;  %v564_v30 = vadd.f32 %v563_v29, %v526_v28 }
 0x12f   : > { %565 = vst [vmem:[%s973_s4] sm:$0x1] %v564_v30 }
 0x130 PF: > { %s15_s17 = sadd.s32 1, %s838_s17   ;;  %s974_s15 = smov %s834_s16 }
 0x131   : > { %p12_p6 = scmp.ge.s32.totalorder %s15_s17, 6   ;;  %s975_s16 = smov %s977_s18 }
 0x133   :  { %14 = sbr.rel (!%p12_p6) target bundleno = 2 (0x2), region = 81 }

// kernel: gan_decoder_forward.15
= control target key start
LH: loop header
LB: loop body
LE: loop exit
PB: predicated region body
PF: predicated region fallthrough
CT: control target
= control target key end

     0   :  { %s1599_s15 = smov 0   ;;  %s1601_s16 = smov 0   ;;  %s2181_s0 = inlined_call_operand.vmem [shape: bf16[4,512,64], index: 0, kind: input, shape index: {}]   ;;  %s2182_s1 = inlined_call_operand.vmem [shape: bf16[4,64,128], index: 1, kind: input, shape index: {}]   ;;  %s2183_s2 = inlined_call_operand.vmem [shape: f32[4,512,128], index: 2, kind: output, shape index: {0}]   ;;  %s2184_s3 = inlined_call_operand.vmem [shape: f32[1,128], index: 3, kind: output, shape index: {1}]   ;;  %s2185_s4 = inlined_call_operand.vmem [shape: f32[1,128], index: 4, kind: output, shape index: {2}]  }
   0x1   :  { %s1603_s17 = smov 0  }
   0x2 LB: > { %s27_s18 = sadd.s32 1, %s1567_s16  ;;  %p1290_p0 = scmp.ge.s32.totalorder %s1571_s17, 1  ;;  %s1571_s17 = sphi %s1603_s17, %s15_s17   ;;  %s1567_s16 = sphi %s1601_s16, %s2235_s16   ;;  %s1563_s15 = sphi %s1599_s15, %s2234_s15  }
   0x3   : > { %p29_p1 = scmp.ge.s32.totalorder %s27_s18, 4  ;;  %p188_p2 = scmp.lt.s32.totalorder %s1571_s17, 5 }
   0x5   : > { %s2237_s18 = smov (%p29_p1, %s27_s18), 0  ;;  %p189_p3 = pnand %p1290_p0, %p188_p2 }
   0x7   : > { %192 = sbr.rel (%p189_p3) target bundleno = 445 (0x1bd), region = 28 }
   0xc   : > { %p228_p4 = scmp.lt.s32.totalorder %s1563_s15, 3  ;;  %vm509_vm0 = vcmask 523264   ;;  %p959_p5 = scmp.eq.s32.totalorder %s1563_s15, 0 }
   0xe   : > { %s1621_s19 = scalar_select %p228_p4, %s1563_s15, 3 }
  0x10   : > { %s1368_s20 = sshll.u32 %s1621_s19, 8  ;;  %s1369_s21 = sshll.u32 %s1621_s19, 5 }
  0x11   : > { %s241_s24 = scalar_lea.vmem %s2182_s1, %s1369_s21  ;;  %s1631_s27 = scalar_lea.vmem %s2181_s0, %s1368_s20 }
  0x12   : > { %v1513_v0 = vld [vmem:[%s241_s24 + $0x18] sm:$0xff]   ;;  %v1514_v1 = vld [vmem:[%s241_s24 + $0x10] sm:$0xff]   ;;  %v1515_v2 = vld [vmem:[%s241_s24 + $0x8] sm:$0xff]   ;;  %s1370_s28 = sshll.u32 %s1621_s19, 9 }
  0x13   : > { %1408 = vmatprep.subr.bf16.mxu0 %v1513_v0  ;;  %1480 = vmatprep.subr.bf16.mxu1 %v1513_v0  ;;  %v1517_v3 = vld [vmem:[%s1631_s27] sm:$0xff]   ;;  %v1519_v6 = vld [vmem:[%s1631_s27 + $0x8] sm:$0xff]   ;;  %v1521_v8 = vld [vmem:[%s1631_s27 + $0x10] sm:$0xff]   ;;  %s1702_s5 = scalar_lea.vmem %s2183_s2, %s1370_s28 }
  0x14   : > { %1409 = vmatpush3.bf16.msra.mxu0 %v1513_v0  ;;  %1484 = vmatpush3.bf16.msra.mxu1 %v1513_v0  ;;  %v1518_v4 = vld [vmem:[%s1631_s27 + $0x80] sm:$0xff]   ;;  %v1520_v7 = vld [vmem:[%s1631_s27 + $0x88] sm:$0xff]   ;;  %v1522_v9 = vld [vmem:[%s1631_s27 + $0x90] sm:$0xff]  }
  0x15   : > { %1410 = vmatprep.subr.bf16.mxu0 %v1514_v1  ;;  %1481 = vmatprep.subr.bf16.mxu1 %v1514_v1  ;;  %v1516_v5 = vld [vmem:[%s241_s24] sm:$0xff]   ;;  %v1523_v10 = vld [vmem:[%s1631_s27 + $0x18] sm:$0xff]   ;;  %v1527_v14 = vld [vmem:[%s1631_s27 + $0x28] sm:$0xff]  }
  0x16   : > { %1416 = vmatprep.mubr.msk.bf16.mxu0 %vm509_vm0, %v1517_v3  ;;  %1448 = vmatprep.mubr.msk.bf16.mxu1 %vm509_vm0, %v1518_v4  ;;  %v1524_v11 = vld [vmem:[%s1631_s27 + $0x98] sm:$0xff]   ;;  %v1525_v12 = vld [vmem:[%s1631_s27 + $0x20] sm:$0xff]   ;;  %v1528_v15 = vld [vmem:[%s1631_s27 + $0xa8] sm:$0xff]  }
  0x17   : > { %v1526_v13 = vld [vmem:[%s1631_s27 + $0xa0] sm:$0xff]   ;;  %v1529_v16 = vld [vmem:[%s1631_s27 + $0x30] sm:$0xff]   ;;  %v1531_v18 = vld [vmem:[%s1631_s27 + $0x38] sm:$0xff]  }
  0x18   : > { %1411 = vmatpush3.bf16.msra.mxu0 %v1514_v1  ;;  %1485 = vmatpush3.bf16.msra.mxu1 %v1514_v1  ;;  %v1530_v17 = vld [vmem:[%s1631_s27 + $0xb0] sm:$0xff]   ;;  %v1532_v19 = vld [vmem:[%s1631_s27 + $0xb8] sm:$0xff]   ;;  %v1533_v20 = vld [vmem:[%s1631_s27 + $0x40] sm:$0xff]  }
  0x19   : > { %1412 = vmatprep.subr.bf16.mxu0 %v1515_v2  ;;  %1482 = vmatprep.subr.bf16.mxu1 %v1515_v2  ;;  %v1534_v21 = vld [vmem:[%s1631_s27 + $0xc0] sm:$0xff]   ;;  %v1535_v22 = vld [vmem:[%s1631_s27 + $0x48] sm:$0xff]   ;;  %v1537_v24 = vld [vmem:[%s1631_s27 + $0x50] sm:$0xff]  }
  0x1a   : > { %v1536_v23 = vld [vmem:[%s1631_s27 + $0xc8] sm:$0xff]   ;;  %v1538_v25 = vld [vmem:[%s1631_s27 + $0xd0] sm:$0xff]   ;;  %v1539_v26 = vld [vmem:[%s1631_s27 + $0x58] sm:$0xff]  }
  0x1b   : > { %v1540_v27 = vld [vmem:[%s1631_s27 + $0xd8] sm:$0xff]   ;;  %v1541_v28 = vld [vmem:[%s1631_s27 + $0x60] sm:$0xff]   ;;  %v1543_v30 = vld [vmem:[%s1631_s27 + $0x68] sm:$0xff]  }
  0x1c   : > { %1413 = vmatpush3.bf16.msra.mxu0 %v1515_v2  ;;  %1486 = vmatpush3.bf16.msra.mxu1 %v1515_v2  ;;  %v1542_v29 = vld [vmem:[%s1631_s27 + $0xe0] sm:$0xff]   ;;  %v1544_v31 = vld [vmem:[%s1631_s27 + $0xe8] sm:$0xff]   ;;  %v1545_v32 = vld [vmem:[%s1631_s27 + $0x70] sm:$0xff]  }
  0x1d   : > { %1414 = vmatprep.subr.bf16.mxu0 %v1516_v5  ;;  %1483 = vmatprep.subr.bf16.mxu1 %v1516_v5  ;;  %v1546_v33 = vld [vmem:[%s1631_s27 + $0xf0] sm:$0xff]   ;;  %v1547_v34 = vld [vmem:[%s1631_s27 + $0x78] sm:$0xff]  }
  0x1e   : > { %v1548_v35 = vld [vmem:[%s1631_s27 + $0xf8] sm:$0xff]  }
  0x20   : > { %1415 = vmatpush3.bf16.msra.mxu0 %v1516_v5  ;;  %1487 = vmatpush3.bf16.msra.mxu1 %v1516_v5 }
  0x23   : > { %1417 = vmatmul.mubr.msk.bf16.vlgmr.msra.gmra.mxu0 %vm509_vm0, %v1519_v6  ;;  %1449 = vmatmul.mubr.msk.bf16.vlgmr.msra.gmra.mxu1 %vm509_vm0, %v1520_v7 }
  0x24   : > { %1420 = vmatprep.mubr.msk.bf16.mxu0 %vm509_vm0, %v1521_v8  ;;  %1452 = vmatprep.mubr.msk.bf16.mxu1 %vm509_vm0, %v1522_v9 }
  0x2b   : > { %1421 = vmatmul.mubr.msk.bf16.gmra.mxu0 %vm509_vm0, %v1523_v10  ;;  %1453 = vmatmul.mubr.msk.bf16.gmra.mxu1 %vm509_vm0, %v1524_v11 }
  0x2c   : > { %1424 = vmatprep.mubr.msk.bf16.mxu0 %vm509_vm0, %v1525_v12  ;;  %1456 = vmatprep.mubr.msk.bf16.mxu1 %vm509_vm0, %v1526_v13 }
  0x33   : > { %1425 = vmatmul.mubr.msk.bf16.gmra.mxu0 %vm509_vm0, %v1527_v14  ;;  %1457 = vmatmul.mubr.msk.bf16.gmra.mxu1 %vm509_vm0, %v1528_v15 }
  0x34   : > { %1428 = vmatprep.mubr.msk.bf16.mxu0 %vm509_vm0, %v1529_v16  ;;  %1460 = vmatprep.mubr.msk.bf16.mxu1 %vm509_vm0, %v1530_v17 }
  0x3b   : > { %1429 = vmatmul.mubr.msk.bf16.gmra.mxu0 %vm509_vm0, %v1531_v18  ;;  %1461 = vmatmul.mubr.msk.bf16.gmra.mxu1 %vm509_vm0, %v1532_v19 }
  0x3c   : > { %1432 = vmatprep.mubr.msk.bf16.mxu0 %vm509_vm0, %v1533_v20  ;;  %1464 = vmatprep.mubr.msk.bf16.mxu1 %vm509_vm0, %v1534_v21 }
  0x43   : > { %1433 = vmatmul.mubr.msk.bf16.gmra.mxu0 %vm509_vm0, %v1535_v22  ;;  %1465 = vmatmul.mubr.msk.bf16.gmra.mxu1 %vm509_vm0, %v1536_v23 }
  0x44   : > { %1436 = vmatprep.mubr.msk.bf16.mxu0 %vm509_vm0, %v1537_v24  ;;  %1468 = vmatprep.mubr.msk.bf16.mxu1 %vm509_vm0, %v1538_v25 }
  0x4b   : > { %1437 = vmatmul.mubr.msk.bf16.gmra.mxu0 %vm509_vm0, %v1539_v26  ;;  %1469 = vmatmul.mubr.msk.bf16.gmra.mxu1 %vm509_vm0, %v1540_v27 }
  0x4c   : > { %1440 = vmatprep.mubr.msk.bf16.mxu0 %vm509_vm0, %v1541_v28  ;;  %1472 = vmatprep.mubr.msk.bf16.mxu1 %vm509_vm0, %v1542_v29 }
  0x53   : > { %1441 = vmatmul.mubr.msk.bf16.gmra.mxu0 %vm509_vm0, %v1543_v30  ;;  %1473 = vmatmul.mubr.msk.bf16.gmra.mxu1 %vm509_vm0, %v1544_v31 }
  0x54   : > { %1444 = vmatprep.mubr.msk.bf16.mxu0 %vm509_vm0, %v1545_v32  ;;  %1476 = vmatprep.mubr.msk.bf16.mxu1 %vm509_vm0, %v1546_v33 }
  0x5b   : > { %1445 = vmatmul.mubr.msk.bf16.gmra.mxu0 %vm509_vm0, %v1547_v34  ;;  %1477 = vmatmul.mubr.msk.bf16.gmra.mxu1 %vm509_vm0, %v1548_v35 }
  0xe3   : > { %v1704_v36 = vpop.f32.mrf.mxu0  ;;  %v1706_v37 = vpop.f32.mrf.mxu1 }
  0xe4   : > { %897 = vst [vmem:[%s1702_s5 + $0x10] sm:$0xff] %v1704_v36  ;;  %929 = vst [vmem:[%s1702_s5 + $0x110] sm:$0xff] %v1706_v37 }
  0xe5   : > { %v1712_v38 = vpop.f32.mrf.mxu0  ;;  %v1714_v39 = vpop.f32.mrf.mxu1 }
  0xe6   : > { %895 = vst [vmem:[%s1702_s5] sm:$0xff] %v1712_v38  ;;  %927 = vst [vmem:[%s1702_s5 + $0x100] sm:$0xff] %v1714_v39 }
  0xe7   : > { %v1720_v40 = vpop.f32.mrf.mxu0  ;;  %v1722_v41 = vpop.f32.mrf.mxu1 }
  0xe8   : > { %898 = vst [vmem:[%s1702_s5 + $0x18] sm:$0xff] %v1720_v40  ;;  %930 = vst [vmem:[%s1702_s5 + $0x118] sm:$0xff] %v1722_v41 }
  0xe9   : > { %v1728_v42 = vpop.f32.mrf.mxu0  ;;  %v1730_v43 = vpop.f32.mrf.mxu1 }
  0xea   : > { %896 = vst [vmem:[%s1702_s5 + $0x8] sm:$0xff] %v1728_v42  ;;  %928 = vst [vmem:[%s1702_s5 + $0x108] sm:$0xff] %v1730_v43 }
  0xeb   : > { %v1736_v44 = vpop.f32.mrf.mxu0  ;;  %v1738_v45 = vpop.f32.mrf.mxu1 }
  0xec   : > { %901 = vst [vmem:[%s1702_s5 + $0x30] sm:$0xff] %v1736_v44  ;;  %933 = vst [vmem:[%s1702_s5 + $0x130] sm:$0xff] %v1738_v45 }
  0xed   : > { %v1744_v46 = vpop.f32.mrf.mxu0  ;;  %v1746_v47 = vpop.f32.mrf.mxu1 }
  0xee   : > { %899 = vst [vmem:[%s1702_s5 + $0x20] sm:$0xff] %v1744_v46  ;;  %931 = vst [vmem:[%s1702_s5 + $0x120] sm:$0xff] %v1746_v47 }
  0xef   : > { %v1752_v48 = vpop.f32.mrf.mxu0  ;;  %v1754_v49 = vpop.f32.mrf.mxu1 }
  0xf0   : > { %902 = vst [vmem:[%s1702_s5 + $0x38] sm:$0xff] %v1752_v48  ;;  %934 = vst [vmem:[%s1702_s5 + $0x138] sm:$0xff] %v1754_v49 }
  0xf1   : > { %v1760_v50 = vpop.f32.mrf.mxu0  ;;  %v1762_v51 = vpop.f32.mrf.mxu1 }
  0xf2   : > { %900 = vst [vmem:[%s1702_s5 + $0x28] sm:$0xff] %v1760_v50  ;;  %932 = vst [vmem:[%s1702_s5 + $0x128] sm:$0xff] %v1762_v51 }
  0xf3   : > { %v1768_v52 = vpop.f32.mrf.mxu0  ;;  %v1770_v53 = vpop.f32.mrf.mxu1 }
  0xf4   : > { %905 = vst [vmem:[%s1702_s5 + $0x50] sm:$0xff] %v1768_v52  ;;  %937 = vst [vmem:[%s1702_s5 + $0x150] sm:$0xff] %v1770_v53 }
  0xf5   : > { %v1776_v54 = vpop.f32.mrf.mxu0  ;;  %v1778_v55 = vpop.f32.mrf.mxu1 }
  0xf6   : > { %903 = vst [vmem:[%s1702_s5 + $0x40] sm:$0xff] %v1776_v54  ;;  %935 = vst [vmem:[%s1702_s5 + $0x140] sm:$0xff] %v1778_v55 }
  0xf7   : > { %v1784_v56 = vpop.f32.mrf.mxu0  ;;  %v1786_v57 = vpop.f32.mrf.mxu1 }
  0xf8   : > { %906 = vst [vmem:[%s1702_s5 + $0x58] sm:$0xff] %v1784_v56  ;;  %938 = vst [vmem:[%s1702_s5 + $0x158] sm:$0xff] %v1786_v57 }
  0xf9   : > { %v1792_v58 = vpop.f32.mrf.mxu0  ;;  %v1794_v59 = vpop.f32.mrf.mxu1 }
  0xfa   : > { %904 = vst [vmem:[%s1702_s5 + $0x48] sm:$0xff] %v1792_v58  ;;  %936 = vst [vmem:[%s1702_s5 + $0x148] sm:$0xff] %v1794_v59 }
  0xfb   : > { %v1800_v60 = vpop.f32.mrf.mxu0  ;;  %v1802_v61 = vpop.f32.mrf.mxu1 }
  0xfc   : > { %909 = vst [vmem:[%s1702_s5 + $0x70] sm:$0xff] %v1800_v60  ;;  %941 = vst [vmem:[%s1702_s5 + $0x170] sm:$0xff] %v1802_v61 }
  0xfd   : > { %v1808_v62 = vpop.f32.mrf.mxu0  ;;  %v1810_v63 = vpop.f32.mrf.mxu1 }
  0xfe   : > { %907 = vst [vmem:[%s1702_s5 + $0x60] sm:$0xff] %v1808_v62  ;;  %939 = vst [vmem:[%s1702_s5 + $0x160] sm:$0xff] %v1810_v63 }
  0xff   : > { %v1816_v0 = vpop.f32.mrf.mxu0  ;;  %v1818_v1 = vpop.f32.mrf.mxu1 }
 0x100   : > { %910 = vst [vmem:[%s1702_s5 + $0x78] sm:$0xff] %v1816_v0  ;;  %942 = vst [vmem:[%s1702_s5 + $0x178] sm:$0xff] %v1818_v1 }
 0x101   : > { %v1824_v2 = vpop.f32.mrf.mxu0  ;;  %v1826_v3 = vpop.f32.mrf.mxu1 }
 0x102   : > { %908 = vst [vmem:[%s1702_s5 + $0x68] sm:$0xff] %v1824_v2  ;;  %940 = vst [vmem:[%s1702_s5 + $0x168] sm:$0xff] %v1826_v3 }
 0x103   : > { %v1832_v4 = vpop.f32.mrf.mxu0  ;;  %v1834_v5 = vpop.f32.mrf.mxu1 }
 0x104   : > { %913 = vst [vmem:[%s1702_s5 + $0x90] sm:$0xff] %v1832_v4  ;;  %945 = vst [vmem:[%s1702_s5 + $0x190] sm:$0xff] %v1834_v5 }
 0x105   : > { %v1840_v6 = vpop.f32.mrf.mxu0  ;;  %v1842_v7 = vpop.f32.mrf.mxu1 }
 0x106   : > { %911 = vst [vmem:[%s1702_s5 + $0x80] sm:$0xff] %v1840_v6  ;;  %943 = vst [vmem:[%s1702_s5 + $0x180] sm:$0xff] %v1842_v7 }
 0x107   : > { %v1848_v8 = vpop.f32.mrf.mxu0  ;;  %v1850_v9 = vpop.f32.mrf.mxu1 }
 0x108   : > { %914 = vst [vmem:[%s1702_s5 + $0x98] sm:$0xff] %v1848_v8  ;;  %946 = vst [vmem:[%s1702_s5 + $0x198] sm:$0xff] %v1850_v9 }
 0x109   : > { %v1856_v10 = vpop.f32.mrf.mxu0  ;;  %v1858_v11 = vpop.f32.mrf.mxu1 }
 0x10a   : > { %912 = vst [vmem:[%s1702_s5 + $0x88] sm:$0xff] %v1856_v10  ;;  %944 = vst [vmem:[%s1702_s5 + $0x188] sm:$0xff] %v1858_v11 }
 0x10b   : > { %v1864_v12 = vpop.f32.mrf.mxu0  ;;  %v1866_v13 = vpop.f32.mrf.mxu1 }
 0x10c   : > { %2210 = vst [vmem:[#allocation2_spill] sm:$0xff] %v1866_v13  ;;  %917 = vst [vmem:[%s1702_s5 + $0xb0] sm:$0xff] %v1864_v12 }
 0x10d   : > { %949 = vst [vmem:[%s1702_s5 + $0x1b0] sm:$0xff] %v1866_v13  ;;  %v1872_v14 = vpop.f32.mrf.mxu0  ;;  %v1874_v15 = vpop.f32.mrf.mxu1 }
 0x10e   : > { %2211 = vst [vmem:[#allocation3_spill] sm:$0xff] %v1874_v15  ;;  %915 = vst [vmem:[%s1702_s5 + $0xa0] sm:$0xff] %v1872_v14 }
 0x10f   : > { %947 = vst [vmem:[%s1702_s5 + $0x1a0] sm:$0xff] %v1874_v15  ;;  %v1880_v16 = vpop.f32.mrf.mxu0  ;;  %v1882_v17 = vpop.f32.mrf.mxu1 }
 0x110   : > { %2212 = vst [vmem:[#allocation4_spill] sm:$0xff] %v1882_v17  ;;  %918 = vst [vmem:[%s1702_s5 + $0xb8] sm:$0xff] %v1880_v16 }
 0x111   : > { %950 = vst [vmem:[%s1702_s5 + $0x1b8] sm:$0xff] %v1882_v17  ;;  %v1888_v18 = vpop.f32.mrf.mxu0  ;;  %v1890_v19 = vpop.f32.mrf.mxu1 }
 0x112   : > { %2213 = vst [vmem:[#allocation5_spill] sm:$0xff] %v1890_v19  ;;  %916 = vst [vmem:[%s1702_s5 + $0xa8] sm:$0xff] %v1888_v18 }
 0x113   : > { %948 = vst [vmem:[%s1702_s5 + $0x1a8] sm:$0xff] %v1890_v19  ;;  %v1896_v20 = vpop.f32.mrf.mxu0  ;;  %v1898_v21 = vpop.f32.mrf.mxu1 }
 0x114   : > { %2214 = vst [vmem:[#allocation6_spill] sm:$0xff] %v1898_v21  ;;  %921 = vst [vmem:[%s1702_s5 + $0xd0] sm:$0xff] %v1896_v20 }
 0x115   : > { %953 = vst [vmem:[%s1702_s5 + $0x1d0] sm:$0xff] %v1898_v21  ;;  %v1904_v22 = vpop.f32.mrf.mxu0  ;;  %v1906_v23 = vpop.f32.mrf.mxu1 }
 0x116   : > { %2215 = vst [vmem:[#allocation7_spill] sm:$0xff] %v1906_v23  ;;  %919 = vst [vmem:[%s1702_s5 + $0xc0] sm:$0xff] %v1904_v22 }
 0x117   : > { %951 = vst [vmem:[%s1702_s5 + $0x1c0] sm:$0xff] %v1906_v23  ;;  %v1912_v24 = vpop.f32.mrf.mxu0  ;;  %v1914_v25 = vpop.f32.mrf.mxu1 }
 0x118   : > { %2216 = vst [vmem:[#allocation8_spill] sm:$0xff] %v1914_v25  ;;  %922 = vst [vmem:[%s1702_s5 + $0xd8] sm:$0xff] %v1912_v24 }
 0x119   : > { %954 = vst [vmem:[%s1702_s5 + $0x1d8] sm:$0xff] %v1914_v25  ;;  %v1920_v26 = vpop.f32.mrf.mxu0  ;;  %v1922_v27 = vpop.f32.mrf.mxu1 }
 0x11a   : > { %2217 = vst [vmem:[#allocation9_spill] sm:$0xff] %v1922_v27  ;;  %920 = vst [vmem:[%s1702_s5 + $0xc8] sm:$0xff] %v1920_v26 }
 0x11b   : > { %952 = vst [vmem:[%s1702_s5 + $0x1c8] sm:$0xff] %v1922_v27  ;;  %v1928_v28 = vpop.f32.mrf.mxu0  ;;  %v1930_v29 = vpop.f32.mrf.mxu1 }
 0x11c   : > { %2218 = vst [vmem:[#allocation10_spill] sm:$0xff] %v1930_v29  ;;  %925 = vst [vmem:[%s1702_s5 + $0xf0] sm:$0xff] %v1928_v28 }
 0x11d   : > { %957 = vst [vmem:[%s1702_s5 + $0x1f0] sm:$0xff] %v1930_v29  ;;  %v1936_v30 = vpop.f32.mrf.mxu0  ;;  %v1938_v31 = vpop.f32.mrf.mxu1  ;;  %v1573_v29 = vmov (%p959_p5), 0.0  }
 0x11e   : > { %2219 = vst [vmem:[#allocation11_spill] sm:$0xff] %v1938_v31  ;;  %923 = vst [vmem:[%s1702_s5 + $0xe0] sm:$0xff] %v1936_v30 }
 0x11f   : > { %955 = vst [vmem:[%s1702_s5 + $0x1e0] sm:$0xff] %v1938_v31  ;;  %v1944_v32 = vpop.f32.mrf.mxu0  ;;  %v1946_v33 = vpop.f32.mrf.mxu1  ;;  %964 = sbr.rel (!%p959_p5) target bundleno = 292 (0x124), region = 32  ;;  %965 = vst [vmem:[%s2184_s3] sm:$0x1] (%p959_p5), %v1573_v29 }
 0x120   : > { %2220 = vst [vmem:[#allocation12_spill] sm:$0xff] %v1946_v33  ;;  %926 = vst [vmem:[%s1702_s5 + $0xf8] sm:$0xff] %v1944_v32 }
 0x121   : > { %958 = vst [vmem:[%s1702_s5 + $0x1f8] sm:$0xff] %v1946_v33  ;;  %v1952_v34 = vpop.f32.mrf.mxu0  ;;  %v1954_v35 = vpop.f32.mrf.mxu1  ;;  %966 = vst [vmem:[%s2185_s4] sm:$0x1] (%p959_p5), %v1573_v29 }
 0x122   : > { %2221 = vst [vmem:[#allocation13_spill] sm:$0xff] %v1954_v35  ;;  %924 = vst [vmem:[%s1702_s5 + $0xe8] sm:$0xff] %v1952_v34 }
 0x123   : > { %956 = vst [vmem:[%s1702_s5 + $0x1e8] sm:$0xff] %v1954_v35 }
 0x124 PF: > { %v968_v33 = vadd.f32 %v1728_v42, %v1712_v38  ;;  %v1040_v29 = vmul.f32 %v1712_v38, %v1712_v38  ;;  %v1041_v13 = vmul.f32 %v1728_v42, %v1728_v42  ;;  %v1045_v42 = vmul.f32 %v1760_v50, %v1760_v50 }
 0x126   : > { %v969_v31 = vadd.f32 %v1704_v36, %v968_v33 }
 0x128   : > { %v970_v35 = vadd.f32 %v1720_v40, %v969_v31  ;;  %v1042_v31 = vmul.f32 %v1704_v36, %v1704_v36 }
 0x12a   : > { %v971_v25 = vadd.f32 %v970_v35, %v1744_v46 }
 0x12c   : > { %v972_v21 = vadd.f32 %v971_v25, %v1760_v50  ;;  %v1104_v25 = vadd.f32 %v1041_v13, %v1040_v29  ;;  %v1047_v13 = vmul.f32 %v1752_v48, %v1752_v48 }
 0x12e   : > { %v973_v27 = vadd.f32 %v1736_v44, %v972_v21  ;;  %v1043_v21 = vmul.f32 %v1720_v40, %v1720_v40  ;;  %v1105_v38 = vadd.f32 %v1104_v25, %v1042_v31  ;;  %v1048_v31 = vmul.f32 %v1776_v54, %v1776_v54 }
 0x12f   : > { %v1050_v25 = vmul.f32 %v1768_v52, %v1768_v52 }
 0x130   : > { %v974_v23 = vadd.f32 %v1752_v48, %v973_v27 }
 0x132   : > { %v975_v17 = vadd.f32 %v974_v23, %v1776_v54  ;;  %v1044_v23 = vmul.f32 %v1744_v46, %v1744_v46 }
 0x134   : > { %v976_v33 = vadd.f32 %v975_v17, %v1792_v58  ;;  %v1106_v17 = vadd.f32 %v1105_v38, %v1043_v21  ;;  %v1052_v38 = vmul.f32 %v1808_v62, %v1808_v62 }
 0x136   : > { %v977_v35 = vadd.f32 %v1768_v52, %v976_v33  ;;  %v1046_v33 = vmul.f32 %v1736_v44, %v1736_v44  ;;  %v1107_v15 = vadd.f32 %v1106_v17, %v1044_v23  ;;  %v1053_v17 = vmul.f32 %v1824_v2, %v1824_v2 }
 0x138   : > { %v978_v27 = vadd.f32 %v1784_v56, %v977_v35  ;;  %v1108_v29 = vadd.f32 %v1107_v15, %v1045_v42  ;;  %v1051_v15 = vmul.f32 %v1784_v56, %v1784_v56 }
 0x13a   : > { %v979_v19 = vadd.f32 %v978_v27, %v1808_v62  ;;  %v1109_v35 = vadd.f32 %v1108_v29, %v1046_v33  ;;  %v1054_v33 = vmul.f32 %v1800_v60, %v1800_v60 }
 0x13c   : > { %v980_v36 = vadd.f32 %v979_v19, %v1824_v2  ;;  %v1049_v19 = vmul.f32 %v1792_v58, %v1792_v58  ;;  %v1110_v21 = vadd.f32 %v1109_v35, %v1047_v13  ;;  %v1055_v13 = vmul.f32 %v1816_v0, %v1816_v0 }
 0x13d   : > { %v1057_v35 = vmul.f32 %v1856_v10, %v1856_v10 }
 0x13e   : > { %v981_v40 = vadd.f32 %v1800_v60, %v980_v36  ;;  %v1111_v27 = vadd.f32 %v1110_v21, %v1048_v31 }
 0x140   : > { %v982_v46 = vadd.f32 %v1816_v0, %v981_v40  ;;  %v1112_v23 = vadd.f32 %v1111_v27, %v1049_v19  ;;  %v1058_v19 = vmul.f32 %v1832_v4, %v1832_v4  ;;  %v1060_v27 = vmul.f32 %v1872_v14, %v1872_v14 }
 0x142   : > { %v983_v50 = vadd.f32 %v982_v46, %v1840_v6  ;;  %v1113_v42 = vadd.f32 %v1112_v23, %v1050_v25  ;;  %v1056_v46 = vmul.f32 %v1840_v6, %v1840_v6 }
 0x144   : > { %v984_v44 = vadd.f32 %v983_v50, %v1856_v10  ;;  %v1114_v36 = vadd.f32 %v1113_v42, %v1051_v15  ;;  %v1061_v15 = vmul.f32 %v1888_v18, %v1888_v18  ;;  %v1063_v42 = vmul.f32 %v1880_v16, %v1880_v16 }
 0x146   : > { %v985_v48 = vadd.f32 %v1832_v4, %v984_v44  ;;  %v1115_v40 = vadd.f32 %v1114_v36, %v1052_v38  ;;  %v1059_v44 = vmul.f32 %v1848_v8, %v1848_v8 }
 0x148   : > { %v986_v54 = vadd.f32 %v1848_v8, %v985_v48  ;;  %v1116_v29 = vadd.f32 %v1115_v40, %v1053_v17  ;;  %v1064_v17 = vmul.f32 %v1904_v22, %v1904_v22  ;;  %v1066_v40 = vmul.f32 %v1896_v20, %v1896_v20 }
 0x14a   : > { %v987_v58 = vadd.f32 %v986_v54, %v1872_v14  ;;  %v1117_v31 = vadd.f32 %v1116_v29, %v1054_v33  ;;  %v1062_v54 = vmul.f32 %v1864_v12, %v1864_v12 }
 0x14c   : > { %v988_v52 = vadd.f32 %v987_v58, %v1888_v18  ;;  %v1118_v50 = vadd.f32 %v1117_v31, %v1055_v13  ;;  %v1067_v13 = vmul.f32 %v1912_v24, %v1912_v24  ;;  %v1069_v31 = vmul.f32 %v1952_v34, %v1952_v34 }
 0x14e   : > { %v989_v56 = vadd.f32 %v1864_v12, %v988_v52  ;;  %v1119_v21 = vadd.f32 %v1118_v50, %v1056_v46  ;;  %v1065_v52 = vmul.f32 %v1920_v26, %v1920_v26 }
 0x150   : > { %v990_v62 = vadd.f32 %v1880_v16, %v989_v56  ;;  %v1120_v25 = vadd.f32 %v1119_v21, %v1057_v35  ;;  %v1070_v35 = vmul.f32 %v1928_v28, %v1928_v28  ;;  %v1072_v21 = vmul.f32 %v1714_v39, %v1714_v39 }
 0x152   : > { %v991_v2 = vadd.f32 %v990_v62, %v1904_v22  ;;  %v1121_v48 = vadd.f32 %v1120_v25, %v1058_v19  ;;  %v1068_v62 = vmul.f32 %v1936_v30, %v1936_v30 }
 0x154   : > { %v992_v60 = vadd.f32 %v991_v2, %v1920_v26  ;;  %v1122_v23 = vadd.f32 %v1121_v48, %v1059_v44  ;;  %v1073_v44 = vmul.f32 %v1730_v43, %v1730_v43  ;;  %v1075_v48 = vmul.f32 %v1722_v41, %v1722_v41 }
 0x156   : > { %v993_v0 = vadd.f32 %v1896_v20, %v992_v60  ;;  %v1123_v38 = vadd.f32 %v1122_v23, %v1060_v27  ;;  %v1071_v60 = vmul.f32 %v1944_v32, %v1944_v32 }
 0x158   : > { %v994_v6 = vadd.f32 %v1912_v24, %v993_v0  ;;  %v1124_v58 = vadd.f32 %v1123_v38, %v1061_v15  ;;  %v1076_v15 = vmul.f32 %v1746_v47, %v1746_v47  ;;  %v1078_v38 = vmul.f32 %v1738_v45, %v1738_v45 }
 0x15a   : > { %v995_v10 = vadd.f32 %v994_v6, %v1936_v30  ;;  %v1125_v36 = vadd.f32 %v1124_v58, %v1062_v54  ;;  %v1074_v6 = vmul.f32 %v1706_v37, %v1706_v37 }
 0x15c   : > { %v996_v4 = vadd.f32 %v995_v10, %v1952_v34  ;;  %v1126_v33 = vadd.f32 %v1125_v36, %v1063_v42  ;;  %v1079_v42 = vmul.f32 %v1754_v49, %v1754_v49  ;;  %v1081_v36 = vmul.f32 %v1794_v59, %v1794_v59 }
 0x15e   : > { %v997_v8 = vadd.f32 %v1928_v28, %v996_v4  ;;  %v1127_v56 = vadd.f32 %v1126_v33, %v1064_v17  ;;  %v1077_v4 = vmul.f32 %v1762_v51, %v1762_v51 }
 0x160   : > { %v998_v14 = vadd.f32 %v1944_v32, %v997_v8  ;;  %v1128_v29 = vadd.f32 %v1127_v56, %v1065_v52  ;;  %v1082_v52 = vmul.f32 %v1770_v53, %v1770_v53  ;;  %v1084_v56 = vmul.f32 %v1810_v63, %v1810_v63 }
 0x162   : > { %v999_v18 = vadd.f32 %v998_v14, %v1714_v39  ;;  %v1129_v46 = vadd.f32 %v1128_v29, %v1066_v40  ;;  %v1080_v14 = vmul.f32 %v1778_v55, %v1778_v55  ;;  %v1085_v29 = vmul.f32 %v1826_v3, %v1826_v3 }
 0x164   : > { %v1000_v12 = vadd.f32 %v999_v18, %v1730_v43  ;;  %v1130_v2 = vadd.f32 %v1129_v46, %v1067_v13  ;;  %v1086_v46 = vmul.f32 %v1802_v61, %v1802_v61 }
 0x166   : > { %v1001_v16 = vadd.f32 %v1706_v37, %v1000_v12  ;;  %v1131_v50 = vadd.f32 %v1130_v2, %v1068_v62  ;;  %v1083_v12 = vmul.f32 %v1786_v57, %v1786_v57  ;;  %v1087_v2 = vmul.f32 %v1818_v1, %v1818_v1 }
 0x168   : > { %v1002_v22 = vadd.f32 %v1722_v41, %v1001_v16  ;;  %v1132_v19 = vadd.f32 %v1131_v50, %v1069_v31  ;;  %v1088_v50 = vmul.f32 %v1842_v7, %v1842_v7 }
 0x16a   : > { %v1003_v26 = vadd.f32 %v1002_v22, %v1746_v47  ;;  %v1133_v0 = vadd.f32 %v1132_v19, %v1070_v35  ;;  %v1089_v19 = vmul.f32 %v1858_v11, %v1858_v11 }
 0x16c   : > { %v1004_v20 = vadd.f32 %v1003_v26, %v1762_v51  ;;  %v1134_v25 = vadd.f32 %v1133_v0, %v1071_v60  ;;  %v1090_v0 = vmul.f32 %v1834_v5, %v1834_v5 }
 0x16e   : > { %v1005_v24 = vadd.f32 %v1738_v45, %v1004_v20  ;;  %v1135_v27 = vadd.f32 %v1134_v25, %v1072_v21  ;;  %v1091_v25 = vmul.f32 %v1850_v9, %v1850_v9 }
 0x170   : > { %v1006_v30 = vadd.f32 %v1754_v49, %v1005_v24  ;;  %v1136_v10 = vadd.f32 %v1135_v27, %v1073_v44 }
 0x172   : > { %v1007_v34 = vadd.f32 %v1006_v30, %v1778_v55  ;;  %v1137_v23 = vadd.f32 %v1136_v10, %v1074_v6 }
 0x174   : > { %v1008_v28 = vadd.f32 %v1007_v34, %v1794_v59  ;;  %v1138_v54 = vadd.f32 %v1137_v23, %v1075_v48  ;;  %v2222_v59 = vld [vmem:[#allocation3_spill] sm:$0xff] }
 0x175   : > { %v1092_v27 = vmul.f32 %v2222_v59, %v2222_v59 }
 0x176   : > { %v1009_v32 = vadd.f32 %v1770_v53, %v1008_v28  ;;  %v1139_v8 = vadd.f32 %v1138_v54, %v1076_v15  ;;  %v2223_v53 = vld [vmem:[#allocation5_spill] sm:$0xff] }
 0x177   : > { %v1093_v10 = vmul.f32 %v2223_v53, %v2223_v53 }
 0x178   : > { %v1010_v39 = vadd.f32 %v1786_v57, %v1009_v32  ;;  %v1140_v58 = vadd.f32 %v1139_v8, %v1077_v4  ;;  %v2224_v57 = vld [vmem:[#allocation2_spill] sm:$0xff] }
 0x179   : > { %v1094_v23 = vmul.f32 %v2224_v57, %v2224_v57 }
 0x17a   : > { %v1011_v43 = vadd.f32 %v1010_v39, %v1810_v63  ;;  %v1141_v17 = vadd.f32 %v1140_v58, %v1078_v38  ;;  %v2225_v63 = vld [vmem:[#allocation4_spill] sm:$0xff] }
 0x17b   : > { %v1095_v54 = vmul.f32 %v2225_v63, %v2225_v63  ;;  %v2233_v38 = vld [vmem:[#allocation12_spill] sm:$0xff] }
 0x17c   : > { %v1012_v37 = vadd.f32 %v1011_v43, %v1826_v3  ;;  %v1142_v18 = vadd.f32 %v1141_v17, %v1079_v42  ;;  %v2226_v3 = vld [vmem:[#allocation7_spill] sm:$0xff] }
 0x17e   : > { %v1013_v41 = vadd.f32 %v1802_v61, %v1012_v37  ;;  %v1143_v33 = vadd.f32 %v1142_v18, %v1080_v14  ;;  %v2227_v61 = vld [vmem:[#allocation9_spill] sm:$0xff] }
 0x180   : > { %v1014_v47 = vadd.f32 %v1818_v1, %v1013_v41  ;;  %v1144_v40 = vadd.f32 %v1143_v33, %v1081_v36  ;;  %v2228_v1 = vld [vmem:[#allocation6_spill] sm:$0xff]  ;;  %v1096_v41 = vmul.f32 %v2226_v3, %v2226_v3 }
 0x182   : > { %v1015_v51 = vadd.f32 %v1014_v47, %v1842_v7  ;;  %v1145_v16 = vadd.f32 %v1144_v40, %v1082_v52  ;;  %v2229_v7 = vld [vmem:[#allocation8_spill] sm:$0xff]  ;;  %v1097_v47 = vmul.f32 %v2227_v61, %v2227_v61 }
 0x184   : > { %v1016_v45 = vadd.f32 %v1015_v51, %v1858_v11  ;;  %v1146_v22 = vadd.f32 %v1145_v16, %v1083_v12  ;;  %v2230_v11 = vld [vmem:[#allocation11_spill] sm:$0xff]  ;;  %v1098_v51 = vmul.f32 %v2228_v1, %v2228_v1  ;;  %v967_v16 = vld [vmem:[%s2184_s3] sm:$0x1] }
 0x186   : > { %v1017_v49 = vadd.f32 %v1834_v5, %v1016_v45  ;;  %v1147_v26 = vadd.f32 %v1146_v22, %v1084_v56  ;;  %v2231_v5 = vld [vmem:[#allocation13_spill] sm:$0xff]  ;;  %v1099_v45 = vmul.f32 %v2229_v7, %v2229_v7 }
 0x188   : > { %v1018_v55 = vadd.f32 %v1850_v9, %v1017_v49  ;;  %v1148_v20 = vadd.f32 %v1147_v26, %v1085_v29  ;;  %v2232_v9 = vld [vmem:[#allocation10_spill] sm:$0xff]  ;;  %v1100_v49 = vmul.f32 %v2230_v11, %v2230_v11 }
 0x18a   : > { %v1019_v13 = vadd.f32 %v1018_v55, %v2222_v59  ;;  %v1149_v24 = vadd.f32 %v1148_v20, %v1086_v46  ;;  %v1101_v55 = vmul.f32 %v2231_v5, %v2231_v5 }
 0x18c   : > { %v1020_v62 = vadd.f32 %v1019_v13, %v2223_v53  ;;  %v1150_v30 = vadd.f32 %v1149_v24, %v1087_v2  ;;  %v1102_v13 = vmul.f32 %v2232_v9, %v2232_v9  ;;  %v1103_v53 = vmul.f32 %v2233_v38, %v2233_v38 }
 0x18e   : > { %v1021_v31 = vadd.f32 %v2224_v57, %v1020_v62  ;;  %v1151_v34 = vadd.f32 %v1150_v30, %v1088_v50 }
 0x190   : > { %v1022_v35 = vadd.f32 %v2225_v63, %v1021_v31  ;;  %v1152_v28 = vadd.f32 %v1151_v34, %v1089_v19 }
 0x192   : > { %v1023_v60 = vadd.f32 %v1022_v35, %v2226_v3  ;;  %v1153_v32 = vadd.f32 %v1152_v28, %v1090_v0  ;;  %v1039_v35 = vld [vmem:[%s2185_s4] sm:$0x1] }
 0x194   : > { %v1024_v21 = vadd.f32 %v1023_v60, %v2227_v61  ;;  %v1154_v39 = vadd.f32 %v1153_v32, %v1091_v25 }
 0x196   : > { %v1025_v44 = vadd.f32 %v2228_v1, %v1024_v21  ;;  %v1155_v43 = vadd.f32 %v1154_v39, %v1092_v27 }
 0x198   : > { %v1026_v6 = vadd.f32 %v2229_v7, %v1025_v44  ;;  %v1156_v37 = vadd.f32 %v1155_v43, %v1093_v10 }
 0x19a   : > { %v1027_v48 = vadd.f32 %v1026_v6, %v2230_v11  ;;  %v1157_v42 = vadd.f32 %v1156_v37, %v1094_v23 }
 0x19c   : > { %v1028_v15 = vadd.f32 %v1027_v48, %v2231_v5  ;;  %v1158_v14 = vadd.f32 %v1157_v42, %v1095_v54 }
 0x19e   : > { %v1029_v4 = vadd.f32 %v2232_v9, %v1028_v15  ;;  %v1159_v36 = vadd.f32 %v1158_v14, %v1096_v41 }
 0x1a0   : > { %v1030_v8 = vadd.f32 %v2233_v38, %v1029_v4  ;;  %v1160_v52 = vadd.f32 %v1159_v36, %v1097_v47 }
 0x1a2   : > { %v1031_v58 = vrot.slane %v1030_v8, 4  ;;  %v1161_v12 = vadd.f32 %v1160_v52, %v1098_v51 }
 0x1a4   : > { %v1032_v17 = vadd.f32 %v1031_v58, %v1030_v8  ;;  %v1162_v56 = vadd.f32 %v1161_v12, %v1099_v45 }
 0x1a6   : > { %v1033_v18 = vrot.slane %v1032_v17, 2  ;;  %v1163_v29 = vadd.f32 %v1162_v56, %v1100_v49 }
 0x1a8   : > { %v1034_v33 = vadd.f32 %v1033_v18, %v1032_v17  ;;  %v1164_v62 = vadd.f32 %v1163_v29, %v1101_v55 }
 0x1aa   : > { %v1035_v40 = vrot.slane %v1034_v33, 1  ;;  %v1165_v46 = vadd.f32 %v1164_v62, %v1102_v13 }
 0x1ac   : > { %v1036_v59 = vadd.f32 %v1035_v40, %v1034_v33  ;;  %v1166_v26 = vadd.f32 %v1165_v46, %v1103_v53 }
 0x1ae   : > { %v1037_v22 = vadd.f32 %v1036_v59, %v967_v16  ;;  %v1167_v57 = vrot.slane %v1166_v26, 4 }
 0x1b0   : > { %1038 = vst [vmem:[%s2184_s3] sm:$0x1] %v1037_v22  ;;  %v1168_v31 = vadd.f32 %v1167_v57, %v1166_v26 }
 0x1b2   : > { %v1169_v2 = vrot.slane %v1168_v31, 2 }
 0x1b4   : > { %v1170_v20 = vadd.f32 %v1169_v2, %v1168_v31 }
 0x1b6   : > { %v1171_v63 = vrot.slane %v1170_v20, 1 }
 0x1b8   : > { %v1172_v50 = vadd.f32 %v1171_v63, %v1170_v20 }
 0x1ba   : > { %v1173_v24 = vadd.f32 %v1172_v50, %v1039_v35 }
 0x1bc   : > { %1174 = vst [vmem:[%s2185_s4] sm:$0x1] %v1173_v24 }
 0x1bd PF: > { %s15_s17 = sadd.s32 1, %s1571_s17   ;;  %s2234_s15 = smov %s1567_s16 }
 0x1be   : > { %p12_p6 = scmp.ge.s32.totalorder %s15_s17, 6   ;;  %s2235_s16 = smov %s2237_s18 }
 0x1c0   :  { %14 = sbr.rel (!%p12_p6) target bundleno = 2 (0x2), region = 81 }

// kernel: gan_decoder_forward.16
= control target key start
LH: loop header
LB: loop body
LE: loop exit
PB: predicated region body
PF: predicated region fallthrough
CT: control target
= control target key end

     0   :  { %s790_s18 = smov 0   ;;  %s792_s19 = smov 0   ;;  %s1106_s0 = inlined_call_operand.vmem [shape: f32[4,512,128], index: 0, kind: input, shape index: {}]   ;;  %s1107_s1 = inlined_call_operand.vmem [shape: f32[1,128], index: 1, kind: input, shape index: {}]   ;;  %s1108_s2 = inlined_call_operand.vmem [shape: f32[1,128], index: 2, kind: input, shape index: {}]   ;;  %s1109_s3 = inlined_call_operand.vmem [shape: f32[1,128], index: 3, kind: input, shape index: {}]   ;;  %s1110_s4 = inlined_call_operand.vmem [shape: f32[1,128], index: 4, kind: input, shape index: {}]   ;;  %s1111_s5 = inlined_call_operand.vmem [shape: f32[4,512,128], index: 5, kind: output, shape index: {}]  }
   0x1   :  { %s794_s20 = smov 0  }
   0x2 LB: > { %s27_s21 = sadd.s32 1, %s754_s19  ;;  %p701_p0 = scmp.ge.s32.totalorder %s758_s20, 1  ;;  %s758_s20 = sphi %s794_s20, %s15_s20   ;;  %s754_s19 = sphi %s792_s19, %s1113_s19   ;;  %s750_s18 = sphi %s790_s18, %s1112_s18  }
   0x3   : > { %p29_p1 = scmp.ge.s32.totalorder %s27_s21, 4  ;;  %p208_p2 = scmp.lt.s32.totalorder %s758_s20, 5 }
   0x5   : > { %s1115_s21 = smov (%p29_p1, %s27_s21), 0  ;;  %p209_p3 = pnand %p701_p0, %p208_p2 }
   0x6   : > { %p245_p4 = scmp.lt.s32.totalorder (!%p209_p3), %s750_s18, 3 }
   0x7   : > { %212 = sbr.rel (%p209_p3) target bundleno = 95 (0x5f), region = 40 }
   0xc   : > { %v264_v0 = vld [vmem:[%s1107_s1] sm:$0x1]  ;;  %s1117_s18 = smov (!%p245_p4, %s750_s18), 3  ;;  %v343_v8 = vlaneseq }
   0xd   : > { %v266_v1 = vld [vmem:[%s1108_s2] sm:$0x1]  ;;  %v265_v2 = vmul.f32 0.00048828125, %v264_v0  ;;  %s708_s26 = sshll.u32 %s1117_s18, 9 }
   0xe   : > { %v267_v3 = vmul.f32 0.00048828125, %v266_v1  ;;  %v344_v9 = vshrl.u32 %v343_v8, 7  ;;  %s822_s29 = scalar_lea.vmem %s1106_s0, %s708_s26  ;;  %v271_v10 = vld [vmem:[%s1109_s3] sm:$0x1]  ;;  %s871_s11 = scalar_lea.vmem %s1111_s5, %s708_s26 }
   0xf   : > { %v268_v4 = vmul.f32 %v265_v2, %v265_v2  ;;  %v275_v14 = vld [vmem:[%s1110_s4] sm:$0x1]  ;;  %v279_v16 = vld [vmem:[%s822_s29 + $0x8] sm:$0xff]  ;;  %v280_v17 = vld [vmem:[%s822_s29 + $0x10] sm:$0xff] }
  0x10   : > { %v345_v11 = vsub.s32 0, %v344_v9  ;;  %v278_v15 = vld [vmem:[%s822_s29] sm:$0xff]  ;;  %v281_v18 = vld [vmem:[%s822_s29 + $0x18] sm:$0xff]  ;;  %v283_v22 = vld [vmem:[%s822_s29 + $0x28] sm:$0xff] }
  0x11   : > { %v269_v5 = vsub.f32 %v267_v3, %v268_v4  ;;  %v282_v19 = vld [vmem:[%s822_s29 + $0x20] sm:$0xff]  ;;  %v284_v23 = vld [vmem:[%s822_s29 + $0x30] sm:$0xff]  ;;  %v285_v24 = vld [vmem:[%s822_s29 + $0x38] sm:$0xff] }
  0x12   : > { %v286_v25 = vld [vmem:[%s822_s29 + $0x40] sm:$0xff]  ;;  %v287_v26 = vld [vmem:[%s822_s29 + $0x48] sm:$0xff]  ;;  %v288_v27 = vld [vmem:[%s822_s29 + $0x50] sm:$0xff] }
  0x13   : > { %v270_v6 = vmax.f32 %v269_v5, 0.0  ;;  %v289_v32 = vld [vmem:[%s822_s29 + $0x58] sm:$0xff]  ;;  %v290_v33 = vld [vmem:[%s822_s29 + $0x60] sm:$0xff]  ;;  %v291_v34 = vld [vmem:[%s822_s29 + $0x68] sm:$0xff] }
  0x14   : > { %v292_v59 = vld [vmem:[%s822_s29 + $0x70] sm:$0xff]  ;;  %v293_v60 = vld [vmem:[%s822_s29 + $0x78] sm:$0xff]  ;;  %v294_v5 = vld [vmem:[%s822_s29 + $0x80] sm:$0xff] }
  0x15   : > { %v272_v7 = vadd.f32 1e-05, %v270_v6 }
  0x17   : > { %734 = vrsqrt.f32 %v272_v7 }
  0x24   : > { %v735_v12 = vpop.eup %734 }
  0x25   : > { %v274_v13 = vmul.f32 %v735_v12, %v271_v10  ;;  %v295_v10 = vld [vmem:[%s822_s29 + $0x88] sm:$0xff]  ;;  %v297_v12 = vld [vmem:[%s822_s29 + $0x98] sm:$0xff] }
  0x27   : > { %v276_v20 = vmul.f32 %v274_v13, %v265_v2  ;;  %v835_v21 = vrot.slane %v274_v13, %v345_v11 }
  0x29   : > { %v277_v28 = vsub.f32 %v275_v14, %v276_v20  ;;  %v348_v29 = vmul.f32 %v835_v21, %v278_v15  ;;  %v349_v30 = vmul.f32 %v835_v21, %v279_v16  ;;  %v350_v31 = vmul.f32 %v835_v21, %v280_v17  ;;  %v298_v17 = vld [vmem:[%s822_s29 + $0xa0] sm:$0xff] }
  0x2a   : > { %v351_v35 = vmul.f32 %v835_v21, %v281_v18  ;;  %v352_v36 = vmul.f32 %v835_v21, %v282_v19  ;;  %v353_v37 = vmul.f32 %v835_v21, %v283_v22  ;;  %v354_v38 = vmul.f32 %v835_v21, %v284_v23  ;;  %v299_v18 = vld [vmem:[%s822_s29 + $0xa8] sm:$0xff] }
  0x2b   : > { %v853_v39 = vrot.slane %v277_v28, %v345_v11  ;;  %v355_v40 = vmul.f32 %v835_v21, %v285_v24  ;;  %v356_v41 = vmul.f32 %v835_v21, %v286_v25  ;;  %v357_v42 = vmul.f32 %v835_v21, %v287_v26  ;;  %v296_v11 = vld [vmem:[%s822_s29 + $0x90] sm:$0xff] }
  0x2c   : > { %v358_v43 = vmul.f32 %v835_v21, %v288_v27  ;;  %v359_v44 = vmul.f32 %v835_v21, %v289_v32  ;;  %v360_v45 = vmul.f32 %v835_v21, %v290_v33  ;;  %v361_v46 = vmul.f32 %v835_v21, %v291_v34  ;;  %v300_v28 = vld [vmem:[%s822_s29 + $0xb0] sm:$0xff] }
  0x2d   : > { %v418_v47 = vadd.f32 %v853_v39, %v348_v29  ;;  %v419_v48 = vadd.f32 %v853_v39, %v349_v30  ;;  %v420_v49 = vadd.f32 %v853_v39, %v350_v31  ;;  %v421_v50 = vadd.f32 %v853_v39, %v351_v35  ;;  %v301_v29 = vld [vmem:[%s822_s29 + $0xb8] sm:$0xff] }
  0x2e   : > { %v422_v51 = vadd.f32 %v853_v39, %v352_v36  ;;  %v423_v52 = vadd.f32 %v853_v39, %v353_v37  ;;  %v424_v53 = vadd.f32 %v853_v39, %v354_v38  ;;  %v425_v54 = vadd.f32 %v853_v39, %v355_v40  ;;  %v302_v38 = vld [vmem:[%s822_s29 + $0xc0] sm:$0xff] }
  0x2f   : > { %v482_v55 = vmax.f32 %v418_v47, 0.0  ;;  %v483_v56 = vmax.f32 %v419_v48, 0.0  ;;  %v484_v57 = vmax.f32 %v420_v49, 0.0  ;;  %v485_v58 = vmax.f32 %v421_v50, 0.0 }
  0x30   : > { %v486_v61 = vmax.f32 %v422_v51, 0.0  ;;  %v487_v62 = vmax.f32 %v423_v52, 0.0  ;;  %v488_v63 = vmax.f32 %v424_v53, 0.0  ;;  %v489_v0 = vmax.f32 %v425_v54, 0.0  ;;  %v306_v51 = vld [vmem:[%s822_s29 + $0xe0] sm:$0xff]  ;;  %v307_v52 = vld [vmem:[%s822_s29 + $0xe8] sm:$0xff] }
  0x31   : > { %546 = vst [vmem:[%s871_s11] sm:$0xff] %v482_v55  ;;  %547 = vst [vmem:[%s871_s11 + $0x8] sm:$0xff] %v483_v56  ;;  %v426_v1 = vadd.f32 %v853_v39, %v356_v41  ;;  %v427_v2 = vadd.f32 %v853_v39, %v357_v42  ;;  %v428_v3 = vadd.f32 %v853_v39, %v358_v43 }
  0x32   : > { %548 = vst [vmem:[%s871_s11 + $0x10] sm:$0xff] %v484_v57  ;;  %549 = vst [vmem:[%s871_s11 + $0x18] sm:$0xff] %v485_v58  ;;  %v429_v4 = vadd.f32 %v853_v39, %v359_v44  ;;  %v430_v6 = vadd.f32 %v853_v39, %v360_v45  ;;  %v431_v7 = vadd.f32 %v853_v39, %v361_v46  ;;  %v303_v44 = vld [vmem:[%s822_s29 + $0xc8] sm:$0xff]  ;;  %v304_v45 = vld [vmem:[%s822_s29 + $0xd0] sm:$0xff] }
  0x33   : > { %550 = vst [vmem:[%s871_s11 + $0x20] sm:$0xff] %v486_v61  ;;  %551 = vst [vmem:[%s871_s11 + $0x28] sm:$0xff] %v487_v62  ;;  %v362_v8 = vmul.f32 %v835_v21, %v292_v59  ;;  %v363_v9 = vmul.f32 %v835_v21, %v293_v60  ;;  %v490_v13 = vmax.f32 %v426_v1, 0.0  ;;  %v491_v14 = vmax.f32 %v427_v2, 0.0  ;;  %v305_v46 = vld [vmem:[%s822_s29 + $0xd8] sm:$0xff]  ;;  %v308_v61 = vld [vmem:[%s822_s29 + $0xf0] sm:$0xff] }
  0x34   : > { %552 = vst [vmem:[%s871_s11 + $0x30] sm:$0xff] %v488_v63  ;;  %553 = vst [vmem:[%s871_s11 + $0x38] sm:$0xff] %v489_v0  ;;  %v492_v15 = vmax.f32 %v428_v3, 0.0  ;;  %v493_v16 = vmax.f32 %v429_v4, 0.0  ;;  %v494_v19 = vmax.f32 %v430_v6, 0.0  ;;  %v495_v20 = vmax.f32 %v431_v7, 0.0 }
  0x35   : > { %v432_v22 = vadd.f32 %v853_v39, %v362_v8  ;;  %v433_v23 = vadd.f32 %v853_v39, %v363_v9  ;;  %554 = vst [vmem:[%s871_s11 + $0x40] sm:$0xff] %v490_v13  ;;  %555 = vst [vmem:[%s871_s11 + $0x48] sm:$0xff] %v491_v14  ;;  %v364_v24 = vmul.f32 %v835_v21, %v294_v5  ;;  %v309_v62 = vld [vmem:[%s822_s29 + $0xf8] sm:$0xff]  ;;  %v310_v7 = vld [vmem:[%s822_s29 + $0x100] sm:$0xff] }
  0x36   : > { %556 = vst [vmem:[%s871_s11 + $0x50] sm:$0xff] %v492_v15  ;;  %557 = vst [vmem:[%s871_s11 + $0x58] sm:$0xff] %v493_v16  ;;  %v365_v25 = vmul.f32 %v835_v21, %v295_v10  ;;  %v366_v26 = vmul.f32 %v835_v21, %v296_v11  ;;  %v367_v27 = vmul.f32 %v835_v21, %v297_v12  ;;  %v311_v12 = vld [vmem:[%s822_s29 + $0x108] sm:$0xff]  ;;  %v312_v13 = vld [vmem:[%s822_s29 + $0x110] sm:$0xff] }
  0x37   : > { %558 = vst [vmem:[%s871_s11 + $0x60] sm:$0xff] %v494_v19  ;;  %559 = vst [vmem:[%s871_s11 + $0x68] sm:$0xff] %v495_v20  ;;  %v496_v30 = vmax.f32 %v432_v22, 0.0  ;;  %v497_v31 = vmax.f32 %v433_v23, 0.0  ;;  %v368_v32 = vmul.f32 %v835_v21, %v298_v17  ;;  %v369_v33 = vmul.f32 %v835_v21, %v299_v18  ;;  %v313_v14 = vld [vmem:[%s822_s29 + $0x118] sm:$0xff]  ;;  %v314_v19 = vld [vmem:[%s822_s29 + $0x120] sm:$0xff] }
  0x38   : > { %v434_v34 = vadd.f32 %v853_v39, %v364_v24  ;;  %v435_v35 = vadd.f32 %v853_v39, %v365_v25  ;;  %v436_v36 = vadd.f32 %v853_v39, %v366_v26  ;;  %v437_v37 = vadd.f32 %v853_v39, %v367_v27  ;;  %v315_v20 = vld [vmem:[%s822_s29 + $0x128] sm:$0xff] }
  0x39   : > { %560 = vst [vmem:[%s871_s11 + $0x70] sm:$0xff] %v496_v30  ;;  %561 = vst [vmem:[%s871_s11 + $0x78] sm:$0xff] %v497_v31  ;;  %v438_v40 = vadd.f32 %v853_v39, %v368_v32  ;;  %v439_v41 = vadd.f32 %v853_v39, %v369_v33  ;;  %v370_v42 = vmul.f32 %v835_v21, %v300_v28  ;;  %v316_v30 = vld [vmem:[%s822_s29 + $0x130] sm:$0xff]  ;;  %v317_v31 = vld [vmem:[%s822_s29 + $0x138] sm:$0xff] }
  0x3a   : > { %v371_v43 = vmul.f32 %v835_v21, %v301_v29  ;;  %v498_v47 = vmax.f32 %v434_v34, 0.0  ;;  %v499_v48 = vmax.f32 %v435_v35, 0.0  ;;  %v500_v49 = vmax.f32 %v436_v36, 0.0 }
  0x3b   : > { %v501_v50 = vmax.f32 %v437_v37, 0.0  ;;  %v502_v53 = vmax.f32 %v438_v40, 0.0  ;;  %v503_v54 = vmax.f32 %v439_v41, 0.0  ;;  %v440_v55 = vadd.f32 %v853_v39, %v370_v42  ;;  %v318_v41 = vld [vmem:[%s822_s29 + $0x140] sm:$0xff] }
  0x3c   : > { %v441_v56 = vadd.f32 %v853_v39, %v371_v43  ;;  %562 = vst [vmem:[%s871_s11 + $0x80] sm:$0xff] %v498_v47  ;;  %563 = vst [vmem:[%s871_s11 + $0x88] sm:$0xff] %v499_v48  ;;  %v372_v57 = vmul.f32 %v835_v21, %v302_v38  ;;  %v373_v58 = vmul.f32 %v835_v21, %v303_v44  ;;  %v320_v47 = vld [vmem:[%s822_s29 + $0x150] sm:$0xff]  ;;  %v321_v48 = vld [vmem:[%s822_s29 + $0x158] sm:$0xff] }
  0x3d   : > { %564 = vst [vmem:[%s871_s11 + $0x90] sm:$0xff] %v500_v49  ;;  %565 = vst [vmem:[%s871_s11 + $0x98] sm:$0xff] %v501_v50  ;;  %v374_v59 = vmul.f32 %v835_v21, %v304_v45  ;;  %v375_v60 = vmul.f32 %v835_v21, %v305_v46  ;;  %v504_v63 = vmax.f32 %v440_v55, 0.0  ;;  %v376_v1 = vmul.f32 %v835_v21, %v306_v51  ;;  %v319_v46 = vld [vmem:[%s822_s29 + $0x148] sm:$0xff] }
  0x3e   : > { %566 = vst [vmem:[%s871_s11 + $0xa0] sm:$0xff] %v502_v53  ;;  %567 = vst [vmem:[%s871_s11 + $0xa8] sm:$0xff] %v503_v54  ;;  %v505_v0 = vmax.f32 %v441_v56, 0.0  ;;  %v377_v2 = vmul.f32 %v835_v21, %v307_v52  ;;  %v442_v3 = vadd.f32 %v853_v39, %v372_v57  ;;  %v443_v4 = vadd.f32 %v853_v39, %v373_v58  ;;  %v322_v53 = vld [vmem:[%s822_s29 + $0x160] sm:$0xff]  ;;  %v323_v54 = vld [vmem:[%s822_s29 + $0x168] sm:$0xff] }
  0x3f   : > { %v444_v5 = vadd.f32 %v853_v39, %v374_v59  ;;  %v445_v6 = vadd.f32 %v853_v39, %v375_v60  ;;  %568 = vst [vmem:[%s871_s11 + $0xb0] sm:$0xff] %v504_v63  ;;  %v446_v8 = vadd.f32 %v853_v39, %v376_v1  ;;  %v378_v10 = vmul.f32 %v835_v21, %v308_v61  ;;  %v324_v63 = vld [vmem:[%s822_s29 + $0x170] sm:$0xff] }
  0x40   : > { %569 = vst [vmem:[%s871_s11 + $0xb8] sm:$0xff] %v505_v0  ;;  %v447_v9 = vadd.f32 %v853_v39, %v377_v2  ;;  %v379_v11 = vmul.f32 %v835_v21, %v309_v62  ;;  %v506_v15 = vmax.f32 %v442_v3, 0.0  ;;  %v507_v16 = vmax.f32 %v443_v4, 0.0  ;;  %v325_v0 = vld [vmem:[%s822_s29 + $0x178] sm:$0xff] }
  0x41   : > { %v508_v17 = vmax.f32 %v444_v5, 0.0  ;;  %v509_v18 = vmax.f32 %v445_v6, 0.0  ;;  %v510_v22 = vmax.f32 %v446_v8, 0.0  ;;  %v448_v24 = vadd.f32 %v853_v39, %v378_v10 }
  0x42   : > { %v511_v23 = vmax.f32 %v447_v9, 0.0  ;;  %v449_v25 = vadd.f32 %v853_v39, %v379_v11  ;;  %570 = vst [vmem:[%s871_s11 + $0xc0] sm:$0xff] %v506_v15  ;;  %571 = vst [vmem:[%s871_s11 + $0xc8] sm:$0xff] %v507_v16  ;;  %v380_v26 = vmul.f32 %v835_v21, %v310_v7  ;;  %v381_v27 = vmul.f32 %v835_v21, %v311_v12  ;;  %v326_v9 = vld [vmem:[%s822_s29 + $0x180] sm:$0xff]  ;;  %v328_v15 = vld [vmem:[%s822_s29 + $0x190] sm:$0xff] }
  0x43   : > { %572 = vst [vmem:[%s871_s11 + $0xd0] sm:$0xff] %v508_v17  ;;  %573 = vst [vmem:[%s871_s11 + $0xd8] sm:$0xff] %v509_v18  ;;  %v382_v28 = vmul.f32 %v835_v21, %v312_v13  ;;  %v383_v29 = vmul.f32 %v835_v21, %v313_v14  ;;  %v512_v32 = vmax.f32 %v448_v24, 0.0  ;;  %v384_v34 = vmul.f32 %v835_v21, %v314_v19  ;;  %v327_v14 = vld [vmem:[%s822_s29 + $0x188] sm:$0xff]  ;;  %v329_v16 = vld [vmem:[%s822_s29 + $0x198] sm:$0xff] }
  0x44   : > { %574 = vst [vmem:[%s871_s11 + $0xe0] sm:$0xff] %v510_v22  ;;  %575 = vst [vmem:[%s871_s11 + $0xe8] sm:$0xff] %v511_v23  ;;  %v513_v33 = vmax.f32 %v449_v25, 0.0  ;;  %v385_v35 = vmul.f32 %v835_v21, %v315_v20  ;;  %v450_v36 = vadd.f32 %v853_v39, %v380_v26  ;;  %v451_v37 = vadd.f32 %v853_v39, %v381_v27  ;;  %v330_v22 = vld [vmem:[%s822_s29 + $0x1a0] sm:$0xff]  ;;  %v331_v23 = vld [vmem:[%s822_s29 + $0x1a8] sm:$0xff] }
  0x45   : > { %v452_v38 = vadd.f32 %v853_v39, %v382_v28  ;;  %v453_v40 = vadd.f32 %v853_v39, %v383_v29  ;;  %576 = vst [vmem:[%s871_s11 + $0xf0] sm:$0xff] %v512_v32  ;;  %v454_v42 = vadd.f32 %v853_v39, %v384_v34  ;;  %v386_v44 = vmul.f32 %v835_v21, %v316_v30  ;;  %v332_v32 = vld [vmem:[%s822_s29 + $0x1b0] sm:$0xff] }
  0x46   : > { %577 = vst [vmem:[%s871_s11 + $0xf8] sm:$0xff] %v513_v33  ;;  %v455_v43 = vadd.f32 %v853_v39, %v385_v35  ;;  %v387_v45 = vmul.f32 %v835_v21, %v317_v31  ;;  %v514_v49 = vmax.f32 %v450_v36, 0.0  ;;  %v515_v50 = vmax.f32 %v451_v37, 0.0  ;;  %v333_v33 = vld [vmem:[%s822_s29 + $0x1b8] sm:$0xff] }
  0x47   : > { %v516_v51 = vmax.f32 %v452_v38, 0.0  ;;  %v517_v52 = vmax.f32 %v453_v40, 0.0  ;;  %v518_v55 = vmax.f32 %v454_v42, 0.0  ;;  %v456_v57 = vadd.f32 %v853_v39, %v386_v44 }
  0x48   : > { %v519_v56 = vmax.f32 %v455_v43, 0.0  ;;  %v457_v58 = vadd.f32 %v853_v39, %v387_v45  ;;  %578 = vst [vmem:[%s871_s11 + $0x100] sm:$0xff] %v514_v49  ;;  %579 = vst [vmem:[%s871_s11 + $0x108] sm:$0xff] %v515_v50  ;;  %v388_v59 = vmul.f32 %v835_v21, %v318_v41  ;;  %v389_v60 = vmul.f32 %v835_v21, %v319_v46  ;;  %v334_v43 = vld [vmem:[%s822_s29 + $0x1c0] sm:$0xff]  ;;  %v336_v49 = vld [vmem:[%s822_s29 + $0x1d0] sm:$0xff] }
  0x49   : > { %580 = vst [vmem:[%s871_s11 + $0x110] sm:$0xff] %v516_v51  ;;  %581 = vst [vmem:[%s871_s11 + $0x118] sm:$0xff] %v517_v52  ;;  %v390_v61 = vmul.f32 %v835_v21, %v320_v47  ;;  %v391_v62 = vmul.f32 %v835_v21, %v321_v48  ;;  %v520_v1 = vmax.f32 %v456_v57, 0.0  ;;  %v392_v3 = vmul.f32 %v835_v21, %v322_v53  ;;  %v335_v48 = vld [vmem:[%s822_s29 + $0x1c8] sm:$0xff]  ;;  %v337_v50 = vld [vmem:[%s822_s29 + $0x1d8] sm:$0xff] }
  0x4a   : > { %582 = vst [vmem:[%s871_s11 + $0x120] sm:$0xff] %v518_v55  ;;  %583 = vst [vmem:[%s871_s11 + $0x128] sm:$0xff] %v519_v56  ;;  %v521_v2 = vmax.f32 %v457_v58, 0.0  ;;  %v393_v4 = vmul.f32 %v835_v21, %v323_v54  ;;  %v458_v5 = vadd.f32 %v853_v39, %v388_v59  ;;  %v459_v6 = vadd.f32 %v853_v39, %v389_v60  ;;  %v338_v55 = vld [vmem:[%s822_s29 + $0x1e0] sm:$0xff]  ;;  %v339_v56 = vld [vmem:[%s822_s29 + $0x1e8] sm:$0xff] }
  0x4b   : > { %v460_v7 = vadd.f32 %v853_v39, %v390_v61  ;;  %v461_v8 = vadd.f32 %v853_v39, %v391_v62  ;;  %584 = vst [vmem:[%s871_s11 + $0x130] sm:$0xff] %v520_v1  ;;  %v462_v10 = vadd.f32 %v853_v39, %v392_v3  ;;  %v394_v12 = vmul.f32 %v835_v21, %v324_v63  ;;  %v340_v1 = vld [vmem:[%s822_s29 + $0x1f0] sm:$0xff] }
  0x4c   : > { %585 = vst [vmem:[%s871_s11 + $0x138] sm:$0xff] %v521_v2  ;;  %v463_v11 = vadd.f32 %v853_v39, %v393_v4  ;;  %v395_v13 = vmul.f32 %v835_v21, %v325_v0  ;;  %v522_v17 = vmax.f32 %v458_v5, 0.0  ;;  %v523_v18 = vmax.f32 %v459_v6, 0.0  ;;  %v341_v2 = vld [vmem:[%s822_s29 + $0x1f8] sm:$0xff] }
  0x4d   : > { %v524_v19 = vmax.f32 %v460_v7, 0.0  ;;  %v525_v20 = vmax.f32 %v461_v8, 0.0  ;;  %v526_v24 = vmax.f32 %v462_v10, 0.0  ;;  %v464_v26 = vadd.f32 %v853_v39, %v394_v12 }
  0x4e   : > { %v527_v25 = vmax.f32 %v463_v11, 0.0  ;;  %v465_v27 = vadd.f32 %v853_v39, %v395_v13  ;;  %586 = vst [vmem:[%s871_s11 + $0x140] sm:$0xff] %v522_v17  ;;  %587 = vst [vmem:[%s871_s11 + $0x148] sm:$0xff] %v523_v18  ;;  %v396_v28 = vmul.f32 %v835_v21, %v326_v9  ;;  %v397_v29 = vmul.f32 %v835_v21, %v327_v14 }
  0x4f   : > { %588 = vst [vmem:[%s871_s11 + $0x150] sm:$0xff] %v524_v19  ;;  %589 = vst [vmem:[%s871_s11 + $0x158] sm:$0xff] %v525_v20  ;;  %v398_v30 = vmul.f32 %v835_v21, %v328_v15  ;;  %v399_v31 = vmul.f32 %v835_v21, %v329_v16  ;;  %v528_v34 = vmax.f32 %v464_v26, 0.0  ;;  %v400_v36 = vmul.f32 %v835_v21, %v330_v22 }
  0x50   : > { %590 = vst [vmem:[%s871_s11 + $0x160] sm:$0xff] %v526_v24  ;;  %591 = vst [vmem:[%s871_s11 + $0x168] sm:$0xff] %v527_v25  ;;  %v529_v35 = vmax.f32 %v465_v27, 0.0  ;;  %v401_v37 = vmul.f32 %v835_v21, %v331_v23  ;;  %v466_v38 = vadd.f32 %v853_v39, %v396_v28  ;;  %v467_v40 = vadd.f32 %v853_v39, %v397_v29 }
  0x51   : > { %v468_v41 = vadd.f32 %v853_v39, %v398_v30  ;;  %v469_v42 = vadd.f32 %v853_v39, %v399_v31  ;;  %592 = vst [vmem:[%s871_s11 + $0x170] sm:$0xff] %v528_v34  ;;  %v470_v44 = vadd.f32 %v853_v39, %v400_v36  ;;  %v402_v46 = vmul.f32 %v835_v21, %v332_v32 }
  0x52   : > { %593 = vst [vmem:[%s871_s11 + $0x178] sm:$0xff] %v529_v35  ;;  %v471_v45 = vadd.f32 %v853_v39, %v401_v37  ;;  %v403_v47 = vmul.f32 %v835_v21, %v333_v33  ;;  %v530_v51 = vmax.f32 %v466_v38, 0.0  ;;  %v531_v52 = vmax.f32 %v467_v40, 0.0 }
  0x53   : > { %v532_v53 = vmax.f32 %v468_v41, 0.0  ;;  %v533_v54 = vmax.f32 %v469_v42, 0.0  ;;  %v534_v57 = vmax.f32 %v470_v44, 0.0  ;;  %v472_v59 = vadd.f32 %v853_v39, %v402_v46 }
  0x54   : > { %v535_v58 = vmax.f32 %v471_v45, 0.0  ;;  %v473_v60 = vadd.f32 %v853_v39, %v403_v47  ;;  %594 = vst [vmem:[%s871_s11 + $0x180] sm:$0xff] %v530_v51  ;;  %595 = vst [vmem:[%s871_s11 + $0x188] sm:$0xff] %v531_v52  ;;  %v404_v61 = vmul.f32 %v835_v21, %v334_v43  ;;  %v405_v62 = vmul.f32 %v835_v21, %v335_v48 }
  0x55   : > { %596 = vst [vmem:[%s871_s11 + $0x190] sm:$0xff] %v532_v53  ;;  %597 = vst [vmem:[%s871_s11 + $0x198] sm:$0xff] %v533_v54  ;;  %v406_v63 = vmul.f32 %v835_v21, %v336_v49  ;;  %v407_v0 = vmul.f32 %v835_v21, %v337_v50  ;;  %v536_v3 = vmax.f32 %v472_v59, 0.0  ;;  %v408_v5 = vmul.f32 %v835_v21, %v338_v55 }
  0x56   : > { %598 = vst [vmem:[%s871_s11 + $0x1a0] sm:$0xff] %v534_v57  ;;  %599 = vst [vmem:[%s871_s11 + $0x1a8] sm:$0xff] %v535_v58  ;;  %v537_v4 = vmax.f32 %v473_v60, 0.0  ;;  %v409_v6 = vmul.f32 %v835_v21, %v339_v56  ;;  %v474_v7 = vadd.f32 %v853_v39, %v404_v61  ;;  %v475_v8 = vadd.f32 %v853_v39, %v405_v62 }
  0x57   : > { %v476_v9 = vadd.f32 %v853_v39, %v406_v63  ;;  %v477_v10 = vadd.f32 %v853_v39, %v407_v0  ;;  %600 = vst [vmem:[%s871_s11 + $0x1b0] sm:$0xff] %v536_v3  ;;  %v478_v11 = vadd.f32 %v853_v39, %v408_v5  ;;  %v410_v13 = vmul.f32 %v835_v21, %v340_v1 }
  0x58   : > { %601 = vst [vmem:[%s871_s11 + $0x1b8] sm:$0xff] %v537_v4  ;;  %v479_v12 = vadd.f32 %v853_v39, %v409_v6  ;;  %v411_v14 = vmul.f32 %v835_v21, %v341_v2  ;;  %v538_v15 = vmax.f32 %v474_v7, 0.0  ;;  %v539_v16 = vmax.f32 %v475_v8, 0.0 }
  0x59   : > { %v540_v17 = vmax.f32 %v476_v9, 0.0  ;;  %v541_v18 = vmax.f32 %v477_v10, 0.0  ;;  %v542_v19 = vmax.f32 %v478_v11, 0.0  ;;  %v480_v22 = vadd.f32 %v853_v39, %v410_v13 }
  0x5a   : > { %v543_v20 = vmax.f32 %v479_v12, 0.0  ;;  %v481_v23 = vadd.f32 %v853_v39, %v411_v14  ;;  %602 = vst [vmem:[%s871_s11 + $0x1c0] sm:$0xff] %v538_v15  ;;  %603 = vst [vmem:[%s871_s11 + $0x1c8] sm:$0xff] %v539_v16 }
  0x5b   : > { %604 = vst [vmem:[%s871_s11 + $0x1d0] sm:$0xff] %v540_v17  ;;  %605 = vst [vmem:[%s871_s11 + $0x1d8] sm:$0xff] %v541_v18  ;;  %v544_v24 = vmax.f32 %v480_v22, 0.0 }
  0x5c   : > { %606 = vst [vmem:[%s871_s11 + $0x1e0] sm:$0xff] %v542_v19  ;;  %607 = vst [vmem:[%s871_s11 + $0x1e8] sm:$0xff] %v543_v20  ;;  %v545_v21 = vmax.f32 %v481_v23, 0.0 }
  0x5d   : > { %608 = vst [vmem:[%s871_s11 + $0x1f0] sm:$0xff] %v544_v24 }
  0x5e   : > { %609 = vst [vmem:[%s871_s11 + $0x1f8] sm:$0xff] %v545_v21 }
  0x5f PF: > { %s15_s20 = sadd.s32 1, %s758_s20   ;;  %s1112_s18 = smov %s754_s19 }
  0x60   : > { %p12_p5 = scmp.ge.s32.totalorder %s15_s20, 6   ;;  %s1113_s19 = smov %s1115_s21 }
  0x62   :  { %14 = sbr.rel (!%p12_p5) target bundleno = 2 (0x2), region = 70 }

// kernel: gan_decoder_forward.17
= control target key start
LH: loop header
LB: loop body
LE: loop exit
PB: predicated region body
PF: predicated region fallthrough
CT: control target
= control target key end

     0   :  { %s1545_s12 = smov 0   ;;  %s1547_s13 = smov 0   ;;  %s1804_s0 = inlined_call_operand.vmem [shape: bf16[4,2048,32], index: 0, kind: input, shape index: {}]   ;;  %s1805_s1 = inlined_call_operand.vmem [shape: bf16[4,32,128], index: 1, kind: input, shape index: {}]   ;;  %s1806_s2 = inlined_call_operand.vmem [shape: f32[1,128], index: 2, kind: input, shape index: {}]   ;;  %s1807_s3 = inlined_call_operand.vmem [shape: f32[4,2048,128], index: 3, kind: output, shape index: {}]  }
   0x1   :  { %s1549_s14 = smov 0   ;;  %s1551_s15 = smov 0  }
   0x2   :  { %s1553_s16 = smov 0  }
   0x3 LB: > { %s22_s17 = sadd.s32 1, %s1515_s14  ;;  %s25_s18 = sadd.s32 1, %s1519_s15  ;;  %s1523_s16 = sphi %s1553_s16, %s13_s16   ;;  %s1519_s15 = sphi %s1551_s15, %s1811_s15   ;;  %s1515_s14 = sphi %s1549_s14, %s1810_s14   ;;  %s1511_s13 = sphi %s1547_s13, %s1809_s13   ;;  %s1507_s12 = sphi %s1545_s12, %s1808_s12  }
   0x4   : > { %p23_p0 = scmp.ge.s32.totalorder %s22_s17, 4  ;;  %p1098_p1 = scmp.ge.s32.totalorder %s1523_s16, 1 }
   0x5   : > { %p168_p2 = scmp.lt.s32.totalorder %s1523_s16, 17 }
   0x6   : > { %s1813_s17 = smov (%p23_p0, %s22_s17), 0  ;;  %s1815_s18 = smov (!%p23_p0, %s25_s18), %s1519_s15 }
   0x7   : > { %p169_p3 = pnand %p1098_p1, %p168_p2  ;;  %p27_p4 = scmp.ge.s32.totalorder %s1815_s18, 4 }
   0x8   : > { %s1099_s19 = sshll.u32 (!%p169_p3), %s1507_s12, 6  ;;  %p206_p5 = scmp.lt.s32.totalorder (!%p169_p3), %s1511_s13, 3 }
   0x9   : > { %s1817_s18 = smov (%p27_p4, %s1815_s18), 0  ;;  %172 = sbr.rel (%p169_p3) target bundleno = 299 (0x12b), region = 32 }
   0xa   : > { %p208_p6 = scmp.lt.s32.totalorder (!%p169_p3), %s1099_s19, 255 }
   0xe   : > { %s1819_s13 = smov (!%p206_p5, %s1511_s13), 3  ;;  %s1821_s19 = smov (!%p208_p6, %s1099_s19), 255  ;;  %vm478_vm0 = vcmask 261120   ;;  %v1653_v34 = vld [vmem:[%s1806_s2] ss:$0 sm:$0xff] }
   0xf   : > { %s1100_s20 = sshll.u32 %s1819_s13, 8  ;;  %s1176_s21 = sshll.u32 %s1819_s13, 4 }
  0x10   : > { %s1575_s22 = sadd.s32 %s1100_s20, %s1821_s19  ;;  %s219_s25 = scalar_lea.vmem %s1805_s1, %s1176_s21 }
  0x11   : > { %s1101_s26 = sshll.u32 %s1575_s22, 2  ;;  %v1323_v0 = vld [vmem:[%s219_s25 + $0x8] sm:$0xff]   ;;  %v1324_v1 = vld [vmem:[%s219_s25] sm:$0xff]   ;;  %s1106_s5 = sshll.u32 %s1575_s22, 3 }
  0x12   : > { %s1584_s29 = scalar_lea.vmem %s1804_s0, %s1101_s26  ;;  %1211 = vmatprep.subr.bf16.mxu0 %v1323_v0  ;;  %1279 = vmatprep.subr.bf16.mxu1 %v1323_v0  ;;  %s1673_s8 = scalar_lea.vmem %s1807_s3, %s1106_s5 }
  0x13   : > { %v1325_v2 = vld [vmem:[%s1584_s29] sm:$0xff]   ;;  %1212 = vmatpush3.bf16.msra.mxu0 %v1323_v0  ;;  %1281 = vmatpush3.bf16.msra.mxu1 %v1323_v0  ;;  %v1327_v4 = vld [vmem:[%s1584_s29 + $0x8] sm:$0xff]   ;;  %v1329_v6 = vld [vmem:[%s1584_s29 + $0x10] sm:$0xff]  }
  0x14   : > { %v1326_v3 = vld [vmem:[%s1584_s29 + $0x80] sm:$0xff]   ;;  %1213 = vmatprep.subr.bf16.mxu0 %v1324_v1  ;;  %1280 = vmatprep.subr.bf16.mxu1 %v1324_v1  ;;  %v1328_v5 = vld [vmem:[%s1584_s29 + $0x88] sm:$0xff]   ;;  %v1330_v7 = vld [vmem:[%s1584_s29 + $0x90] sm:$0xff]  }
  0x15   : > { %1215 = vmatprep.mubr.msk.bf16.mxu0 %vm478_vm0, %v1325_v2  ;;  %1247 = vmatprep.mubr.msk.bf16.mxu1 %vm478_vm0, %v1326_v3  ;;  %v1331_v8 = vld [vmem:[%s1584_s29 + $0x18] sm:$0xff]   ;;  %v1333_v10 = vld [vmem:[%s1584_s29 + $0x20] sm:$0xff]   ;;  %v1335_v12 = vld [vmem:[%s1584_s29 + $0x28] sm:$0xff]  }
  0x16   : > { %v1332_v9 = vld [vmem:[%s1584_s29 + $0x98] sm:$0xff]   ;;  %v1334_v11 = vld [vmem:[%s1584_s29 + $0xa0] sm:$0xff]   ;;  %v1336_v13 = vld [vmem:[%s1584_s29 + $0xa8] sm:$0xff]  }
  0x17   : > { %1214 = vmatpush3.bf16.msra.mxu0 %v1324_v1  ;;  %1282 = vmatpush3.bf16.msra.mxu1 %v1324_v1  ;;  %v1337_v14 = vld [vmem:[%s1584_s29 + $0x30] sm:$0xff]   ;;  %v1339_v16 = vld [vmem:[%s1584_s29 + $0x38] sm:$0xff]   ;;  %v1341_v18 = vld [vmem:[%s1584_s29 + $0x40] sm:$0xff]  }
  0x18   : > { %v1338_v15 = vld [vmem:[%s1584_s29 + $0xb0] sm:$0xff]   ;;  %v1340_v17 = vld [vmem:[%s1584_s29 + $0xb8] sm:$0xff]   ;;  %v1342_v19 = vld [vmem:[%s1584_s29 + $0xc0] sm:$0xff]  }
  0x19   : > { %v1343_v20 = vld [vmem:[%s1584_s29 + $0x48] sm:$0xff]   ;;  %v1345_v22 = vld [vmem:[%s1584_s29 + $0x50] sm:$0xff]   ;;  %v1347_v24 = vld [vmem:[%s1584_s29 + $0x58] sm:$0xff]  }
  0x1a   : > { %1216 = vmatmul.mubr.msk.bf16.vlgmr.msra.gmra.mxu0 %vm478_vm0, %v1327_v4  ;;  %1248 = vmatmul.mubr.msk.bf16.vlgmr.msra.gmra.mxu1 %vm478_vm0, %v1328_v5  ;;  %v1344_v21 = vld [vmem:[%s1584_s29 + $0xc8] sm:$0xff]   ;;  %v1346_v23 = vld [vmem:[%s1584_s29 + $0xd0] sm:$0xff]   ;;  %v1348_v25 = vld [vmem:[%s1584_s29 + $0xd8] sm:$0xff]  }
  0x1b   : > { %1219 = vmatprep.mubr.msk.bf16.mxu0 %vm478_vm0, %v1329_v6  ;;  %1251 = vmatprep.mubr.msk.bf16.mxu1 %vm478_vm0, %v1330_v7  ;;  %v1349_v26 = vld [vmem:[%s1584_s29 + $0x60] sm:$0xff]   ;;  %v1351_v28 = vld [vmem:[%s1584_s29 + $0x68] sm:$0xff]   ;;  %v1353_v30 = vld [vmem:[%s1584_s29 + $0x70] sm:$0xff]  }
  0x1c   : > { %v1350_v27 = vld [vmem:[%s1584_s29 + $0xe0] sm:$0xff]   ;;  %v1352_v29 = vld [vmem:[%s1584_s29 + $0xe8] sm:$0xff]   ;;  %v1354_v31 = vld [vmem:[%s1584_s29 + $0xf0] sm:$0xff]  }
  0x1d   : > { %v1355_v32 = vld [vmem:[%s1584_s29 + $0x78] sm:$0xff]  }
  0x1e   : > { %v1356_v33 = vld [vmem:[%s1584_s29 + $0xf8] sm:$0xff]  }
  0x22   : > { %1220 = vmatmul.mubr.msk.bf16.gmra.mxu0 %vm478_vm0, %v1331_v8  ;;  %1252 = vmatmul.mubr.msk.bf16.gmra.mxu1 %vm478_vm0, %v1332_v9 }
  0x23   : > { %1223 = vmatprep.mubr.msk.bf16.mxu0 %vm478_vm0, %v1333_v10  ;;  %1255 = vmatprep.mubr.msk.bf16.mxu1 %vm478_vm0, %v1334_v11 }
  0x2a   : > { %1224 = vmatmul.mubr.msk.bf16.gmra.mxu0 %vm478_vm0, %v1335_v12  ;;  %1256 = vmatmul.mubr.msk.bf16.gmra.mxu1 %vm478_vm0, %v1336_v13 }
  0x2b   : > { %1227 = vmatprep.mubr.msk.bf16.mxu0 %vm478_vm0, %v1337_v14  ;;  %1259 = vmatprep.mubr.msk.bf16.mxu1 %vm478_vm0, %v1338_v15 }
  0x32   : > { %1228 = vmatmul.mubr.msk.bf16.gmra.mxu0 %vm478_vm0, %v1339_v16  ;;  %1260 = vmatmul.mubr.msk.bf16.gmra.mxu1 %vm478_vm0, %v1340_v17 }
  0x33   : > { %1231 = vmatprep.mubr.msk.bf16.mxu0 %vm478_vm0, %v1341_v18  ;;  %1263 = vmatprep.mubr.msk.bf16.mxu1 %vm478_vm0, %v1342_v19 }
  0x3a   : > { %1232 = vmatmul.mubr.msk.bf16.gmra.mxu0 %vm478_vm0, %v1343_v20  ;;  %1264 = vmatmul.mubr.msk.bf16.gmra.mxu1 %vm478_vm0, %v1344_v21 }
  0x3b   : > { %1235 = vmatprep.mubr.msk.bf16.mxu0 %vm478_vm0, %v1345_v22  ;;  %1267 = vmatprep.mubr.msk.bf16.mxu1 %vm478_vm0, %v1346_v23 }
  0x42   : > { %1236 = vmatmul.mubr.msk.bf16.gmra.mxu0 %vm478_vm0, %v1347_v24  ;;  %1268 = vmatmul.mubr.msk.bf16.gmra.mxu1 %vm478_vm0, %v1348_v25 }
  0x43   : > { %1239 = vmatprep.mubr.msk.bf16.mxu0 %vm478_vm0, %v1349_v26  ;;  %1271 = vmatprep.mubr.msk.bf16.mxu1 %vm478_vm0, %v1350_v27 }
  0x4a   : > { %1240 = vmatmul.mubr.msk.bf16.gmra.mxu0 %vm478_vm0, %v1351_v28  ;;  %1272 = vmatmul.mubr.msk.bf16.gmra.mxu1 %vm478_vm0, %v1352_v29 }
  0x4b   : > { %1243 = vmatprep.mubr.msk.bf16.mxu0 %vm478_vm0, %v1353_v30  ;;  %1275 = vmatprep.mubr.msk.bf16.mxu1 %vm478_vm0, %v1354_v31 }
  0x52   : > { %1244 = vmatmul.mubr.msk.bf16.gmra.mxu0 %vm478_vm0, %v1355_v32  ;;  %1276 = vmatmul.mubr.msk.bf16.gmra.mxu1 %vm478_vm0, %v1356_v33 }
  0xda   : > { %v1217_v35 = vpop.f32.mrf.mxu0  ;;  %v1249_v36 = vpop.f32.mrf.mxu1 }
  0xdb   : > { %v618_v37 = vadd.f32 %v1217_v35, %v1653_v34  ;;  %v746_v38 = vadd.f32 %v1249_v36, %v1653_v34 }
  0xdc   : > { %v609_v39 = vpop.f32.mrf.mxu0  ;;  %v737_v40 = vpop.f32.mrf.mxu1 }
  0xdd   : > { %1357 = vtanh.f32 %v618_v37  ;;  %v610_v41 = vadd.f32 %v1653_v34, %v609_v39  ;;  %v738_v42 = vadd.f32 %v1653_v34, %v737_v40 }
  0xde   : > { %1359 = vtanh.f32 %v746_v38  ;;  %v1218_v43 = vpop.f32.mrf.mxu0  ;;  %v1250_v44 = vpop.f32.mrf.mxu1 }
  0xdf   : > { %1361 = vtanh.f32 %v610_v41  ;;  %v621_v45 = vadd.f32 %v1218_v43, %v1653_v34  ;;  %v749_v46 = vadd.f32 %v1250_v44, %v1653_v34 }
  0xe0   : > { %1363 = vtanh.f32 %v738_v42  ;;  %v612_v47 = vpop.f32.mrf.mxu0  ;;  %v740_v48 = vpop.f32.mrf.mxu1 }
  0xe1   : > { %1365 = vtanh.f32 %v621_v45  ;;  %v613_v49 = vadd.f32 %v1653_v34, %v612_v47  ;;  %v741_v50 = vadd.f32 %v1653_v34, %v740_v48 }
  0xe2   : > { %1367 = vtanh.f32 %v749_v46  ;;  %v1221_v51 = vpop.f32.mrf.mxu0  ;;  %v1253_v52 = vpop.f32.mrf.mxu1 }
  0xe3   : > { %1369 = vtanh.f32 %v613_v49  ;;  %v634_v53 = vadd.f32 %v1221_v51, %v1653_v34  ;;  %v762_v54 = vadd.f32 %v1253_v52, %v1653_v34 }
  0xe4   : > { %1371 = vtanh.f32 %v741_v50  ;;  %v625_v55 = vpop.f32.mrf.mxu0  ;;  %v753_v56 = vpop.f32.mrf.mxu1 }
  0xe5   : > { %1373 = vtanh.f32 %v634_v53  ;;  %v626_v57 = vadd.f32 %v1653_v34, %v625_v55  ;;  %v754_v58 = vadd.f32 %v1653_v34, %v753_v56 }
  0xe6   : > { %1375 = vtanh.f32 %v762_v54  ;;  %v1222_v59 = vpop.f32.mrf.mxu0  ;;  %v1254_v60 = vpop.f32.mrf.mxu1 }
  0xe7   : > { %1377 = vtanh.f32 %v626_v57  ;;  %v637_v61 = vadd.f32 %v1222_v59, %v1653_v34  ;;  %v765_v62 = vadd.f32 %v1254_v60, %v1653_v34 }
  0xe8   : > { %1379 = vtanh.f32 %v754_v58  ;;  %v628_v63 = vpop.f32.mrf.mxu0  ;;  %v756_v0 = vpop.f32.mrf.mxu1 }
  0xe9   : > { %1381 = vtanh.f32 %v637_v61  ;;  %v629_v1 = vadd.f32 %v1653_v34, %v628_v63  ;;  %v757_v2 = vadd.f32 %v1653_v34, %v756_v0 }
  0xea   : > { %v1358_v3 = vpop.eup %1357  ;;  %1383 = vtanh.f32 %v765_v62  ;;  %v1225_v4 = vpop.f32.mrf.mxu0 }
  0xeb   : > { %v1257_v5 = vpop.f32.mrf.mxu1  ;;  %v1360_v6 = vpop.eup %1359  ;;  %930 = vst [vmem:[%s1673_s8 + $0x10] sm:$0xff] %v1358_v3  ;;  %1385 = vtanh.f32 %v629_v1  ;;  %v650_v7 = vadd.f32 %v1225_v4, %v1653_v34 }
  0xec   : > { %v778_v8 = vadd.f32 %v1257_v5, %v1653_v34  ;;  %v1362_v9 = vpop.eup %1361  ;;  %962 = vst [vmem:[%s1673_s8 + $0x110] sm:$0xff] %v1360_v6  ;;  %1387 = vtanh.f32 %v757_v2  ;;  %v641_v10 = vpop.f32.mrf.mxu0 }
  0xed   : > { %v769_v11 = vpop.f32.mrf.mxu1  ;;  %v1364_v12 = vpop.eup %1363  ;;  %928 = vst [vmem:[%s1673_s8] sm:$0xff] %v1362_v9  ;;  %1389 = vtanh.f32 %v650_v7  ;;  %v642_v13 = vadd.f32 %v1653_v34, %v641_v10 }
  0xee   : > { %v770_v14 = vadd.f32 %v1653_v34, %v769_v11  ;;  %v1366_v15 = vpop.eup %1365  ;;  %960 = vst [vmem:[%s1673_s8 + $0x100] sm:$0xff] %v1364_v12  ;;  %1391 = vtanh.f32 %v778_v8  ;;  %v1226_v16 = vpop.f32.mrf.mxu0 }
  0xef   : > { %v1258_v17 = vpop.f32.mrf.mxu1  ;;  %v1368_v18 = vpop.eup %1367  ;;  %931 = vst [vmem:[%s1673_s8 + $0x18] sm:$0xff] %v1366_v15  ;;  %1393 = vtanh.f32 %v642_v13  ;;  %v653_v19 = vadd.f32 %v1226_v16, %v1653_v34 }
  0xf0   : > { %v781_v20 = vadd.f32 %v1258_v17, %v1653_v34  ;;  %v1370_v21 = vpop.eup %1369  ;;  %963 = vst [vmem:[%s1673_s8 + $0x118] sm:$0xff] %v1368_v18  ;;  %1395 = vtanh.f32 %v770_v14  ;;  %v644_v22 = vpop.f32.mrf.mxu0 }
  0xf1   : > { %v772_v23 = vpop.f32.mrf.mxu1  ;;  %v1372_v24 = vpop.eup %1371  ;;  %929 = vst [vmem:[%s1673_s8 + $0x8] sm:$0xff] %v1370_v21  ;;  %1397 = vtanh.f32 %v653_v19  ;;  %v645_v25 = vadd.f32 %v1653_v34, %v644_v22 }
  0xf2   : > { %v773_v26 = vadd.f32 %v1653_v34, %v772_v23  ;;  %v1374_v27 = vpop.eup %1373  ;;  %961 = vst [vmem:[%s1673_s8 + $0x108] sm:$0xff] %v1372_v24  ;;  %1399 = vtanh.f32 %v781_v20  ;;  %v1229_v28 = vpop.f32.mrf.mxu0 }
  0xf3   : > { %v1261_v29 = vpop.f32.mrf.mxu1  ;;  %v1376_v30 = vpop.eup %1375  ;;  %934 = vst [vmem:[%s1673_s8 + $0x30] sm:$0xff] %v1374_v27  ;;  %1401 = vtanh.f32 %v645_v25  ;;  %v666_v31 = vadd.f32 %v1229_v28, %v1653_v34 }
  0xf4   : > { %v794_v32 = vadd.f32 %v1261_v29, %v1653_v34  ;;  %v1378_v33 = vpop.eup %1377  ;;  %966 = vst [vmem:[%s1673_s8 + $0x130] sm:$0xff] %v1376_v30  ;;  %1403 = vtanh.f32 %v773_v26  ;;  %v657_v35 = vpop.f32.mrf.mxu0 }
  0xf5   : > { %v785_v36 = vpop.f32.mrf.mxu1  ;;  %v1380_v37 = vpop.eup %1379  ;;  %932 = vst [vmem:[%s1673_s8 + $0x20] sm:$0xff] %v1378_v33  ;;  %1405 = vtanh.f32 %v666_v31  ;;  %v658_v38 = vadd.f32 %v1653_v34, %v657_v35 }
  0xf6   : > { %v786_v39 = vadd.f32 %v1653_v34, %v785_v36  ;;  %v1382_v40 = vpop.eup %1381  ;;  %964 = vst [vmem:[%s1673_s8 + $0x120] sm:$0xff] %v1380_v37  ;;  %1407 = vtanh.f32 %v794_v32  ;;  %v1230_v41 = vpop.f32.mrf.mxu0 }
  0xf7   : > { %v1262_v42 = vpop.f32.mrf.mxu1  ;;  %v1384_v43 = vpop.eup %1383  ;;  %935 = vst [vmem:[%s1673_s8 + $0x38] sm:$0xff] %v1382_v40  ;;  %1409 = vtanh.f32 %v658_v38  ;;  %v669_v44 = vadd.f32 %v1230_v41, %v1653_v34 }
  0xf8   : > { %v797_v45 = vadd.f32 %v1262_v42, %v1653_v34  ;;  %v1386_v46 = vpop.eup %1385  ;;  %967 = vst [vmem:[%s1673_s8 + $0x138] sm:$0xff] %v1384_v43  ;;  %1411 = vtanh.f32 %v786_v39  ;;  %v660_v47 = vpop.f32.mrf.mxu0 }
  0xf9   : > { %v788_v48 = vpop.f32.mrf.mxu1  ;;  %v1388_v49 = vpop.eup %1387  ;;  %933 = vst [vmem:[%s1673_s8 + $0x28] sm:$0xff] %v1386_v46  ;;  %1413 = vtanh.f32 %v669_v44  ;;  %v661_v50 = vadd.f32 %v1653_v34, %v660_v47 }
  0xfa   : > { %v789_v51 = vadd.f32 %v1653_v34, %v788_v48  ;;  %v1390_v52 = vpop.eup %1389  ;;  %965 = vst [vmem:[%s1673_s8 + $0x128] sm:$0xff] %v1388_v49  ;;  %1415 = vtanh.f32 %v797_v45  ;;  %v1233_v53 = vpop.f32.mrf.mxu0 }
  0xfb   : > { %v1265_v54 = vpop.f32.mrf.mxu1  ;;  %v1392_v55 = vpop.eup %1391  ;;  %938 = vst [vmem:[%s1673_s8 + $0x50] sm:$0xff] %v1390_v52  ;;  %1417 = vtanh.f32 %v661_v50  ;;  %v682_v56 = vadd.f32 %v1233_v53, %v1653_v34 }
  0xfc   : > { %v810_v57 = vadd.f32 %v1265_v54, %v1653_v34  ;;  %v1394_v58 = vpop.eup %1393  ;;  %970 = vst [vmem:[%s1673_s8 + $0x150] sm:$0xff] %v1392_v55  ;;  %1419 = vtanh.f32 %v789_v51  ;;  %v673_v59 = vpop.f32.mrf.mxu0 }
  0xfd   : > { %v801_v60 = vpop.f32.mrf.mxu1  ;;  %v1396_v61 = vpop.eup %1395  ;;  %936 = vst [vmem:[%s1673_s8 + $0x40] sm:$0xff] %v1394_v58  ;;  %1421 = vtanh.f32 %v682_v56  ;;  %v674_v62 = vadd.f32 %v1653_v34, %v673_v59 }
  0xfe   : > { %v802_v63 = vadd.f32 %v1653_v34, %v801_v60  ;;  %v1398_v0 = vpop.eup %1397  ;;  %968 = vst [vmem:[%s1673_s8 + $0x140] sm:$0xff] %v1396_v61  ;;  %1423 = vtanh.f32 %v810_v57  ;;  %v1234_v1 = vpop.f32.mrf.mxu0 }
  0xff   : > { %v1266_v2 = vpop.f32.mrf.mxu1  ;;  %v1400_v3 = vpop.eup %1399  ;;  %939 = vst [vmem:[%s1673_s8 + $0x58] sm:$0xff] %v1398_v0  ;;  %1425 = vtanh.f32 %v674_v62  ;;  %v685_v4 = vadd.f32 %v1234_v1, %v1653_v34 }
 0x100   : > { %v813_v5 = vadd.f32 %v1266_v2, %v1653_v34  ;;  %v1402_v6 = vpop.eup %1401  ;;  %971 = vst [vmem:[%s1673_s8 + $0x158] sm:$0xff] %v1400_v3  ;;  %1427 = vtanh.f32 %v802_v63  ;;  %v676_v7 = vpop.f32.mrf.mxu0 }
 0x101   : > { %v804_v8 = vpop.f32.mrf.mxu1  ;;  %v1404_v9 = vpop.eup %1403  ;;  %937 = vst [vmem:[%s1673_s8 + $0x48] sm:$0xff] %v1402_v6  ;;  %1429 = vtanh.f32 %v685_v4  ;;  %v677_v10 = vadd.f32 %v1653_v34, %v676_v7 }
 0x102   : > { %v805_v11 = vadd.f32 %v1653_v34, %v804_v8  ;;  %v1406_v12 = vpop.eup %1405  ;;  %969 = vst [vmem:[%s1673_s8 + $0x148] sm:$0xff] %v1404_v9  ;;  %1431 = vtanh.f32 %v813_v5  ;;  %v1237_v13 = vpop.f32.mrf.mxu0 }
 0x103   : > { %v1269_v14 = vpop.f32.mrf.mxu1  ;;  %v1408_v15 = vpop.eup %1407  ;;  %942 = vst [vmem:[%s1673_s8 + $0x70] sm:$0xff] %v1406_v12  ;;  %1433 = vtanh.f32 %v677_v10  ;;  %v698_v16 = vadd.f32 %v1237_v13, %v1653_v34 }
 0x104   : > { %v826_v17 = vadd.f32 %v1269_v14, %v1653_v34  ;;  %v1410_v18 = vpop.eup %1409  ;;  %974 = vst [vmem:[%s1673_s8 + $0x170] sm:$0xff] %v1408_v15  ;;  %1435 = vtanh.f32 %v805_v11  ;;  %v689_v19 = vpop.f32.mrf.mxu0 }
 0x105   : > { %v817_v20 = vpop.f32.mrf.mxu1  ;;  %v1412_v21 = vpop.eup %1411  ;;  %940 = vst [vmem:[%s1673_s8 + $0x60] sm:$0xff] %v1410_v18  ;;  %1437 = vtanh.f32 %v698_v16  ;;  %v690_v22 = vadd.f32 %v1653_v34, %v689_v19 }
 0x106   : > { %v818_v23 = vadd.f32 %v1653_v34, %v817_v20  ;;  %v1414_v24 = vpop.eup %1413  ;;  %972 = vst [vmem:[%s1673_s8 + $0x160] sm:$0xff] %v1412_v21  ;;  %1439 = vtanh.f32 %v826_v17  ;;  %v1238_v25 = vpop.f32.mrf.mxu0 }
 0x107   : > { %v1270_v26 = vpop.f32.mrf.mxu1  ;;  %v1416_v27 = vpop.eup %1415  ;;  %943 = vst [vmem:[%s1673_s8 + $0x78] sm:$0xff] %v1414_v24  ;;  %1441 = vtanh.f32 %v690_v22  ;;  %v701_v28 = vadd.f32 %v1238_v25, %v1653_v34 }
 0x108   : > { %v829_v29 = vadd.f32 %v1270_v26, %v1653_v34  ;;  %v1418_v30 = vpop.eup %1417  ;;  %975 = vst [vmem:[%s1673_s8 + $0x178] sm:$0xff] %v1416_v27  ;;  %1443 = vtanh.f32 %v818_v23  ;;  %v692_v31 = vpop.f32.mrf.mxu0 }
 0x109   : > { %v820_v32 = vpop.f32.mrf.mxu1  ;;  %v1420_v33 = vpop.eup %1419  ;;  %941 = vst [vmem:[%s1673_s8 + $0x68] sm:$0xff] %v1418_v30  ;;  %1445 = vtanh.f32 %v701_v28  ;;  %v693_v35 = vadd.f32 %v1653_v34, %v692_v31 }
 0x10a   : > { %v821_v36 = vadd.f32 %v1653_v34, %v820_v32  ;;  %v1422_v37 = vpop.eup %1421  ;;  %973 = vst [vmem:[%s1673_s8 + $0x168] sm:$0xff] %v1420_v33  ;;  %1447 = vtanh.f32 %v829_v29  ;;  %v1241_v38 = vpop.f32.mrf.mxu0 }
 0x10b   : > { %v1273_v39 = vpop.f32.mrf.mxu1  ;;  %v1424_v40 = vpop.eup %1423  ;;  %946 = vst [vmem:[%s1673_s8 + $0x90] sm:$0xff] %v1422_v37  ;;  %1449 = vtanh.f32 %v693_v35  ;;  %v714_v41 = vadd.f32 %v1241_v38, %v1653_v34 }
 0x10c   : > { %v842_v42 = vadd.f32 %v1273_v39, %v1653_v34  ;;  %v1426_v43 = vpop.eup %1425  ;;  %978 = vst [vmem:[%s1673_s8 + $0x190] sm:$0xff] %v1424_v40  ;;  %1451 = vtanh.f32 %v821_v36  ;;  %v705_v44 = vpop.f32.mrf.mxu0 }
 0x10d   : > { %v833_v45 = vpop.f32.mrf.mxu1  ;;  %v1428_v46 = vpop.eup %1427  ;;  %944 = vst [vmem:[%s1673_s8 + $0x80] sm:$0xff] %v1426_v43  ;;  %1453 = vtanh.f32 %v714_v41  ;;  %v706_v47 = vadd.f32 %v1653_v34, %v705_v44 }
 0x10e   : > { %v834_v48 = vadd.f32 %v1653_v34, %v833_v45  ;;  %v1430_v49 = vpop.eup %1429  ;;  %976 = vst [vmem:[%s1673_s8 + $0x180] sm:$0xff] %v1428_v46  ;;  %1455 = vtanh.f32 %v842_v42  ;;  %v1242_v50 = vpop.f32.mrf.mxu0 }
 0x10f   : > { %v1274_v51 = vpop.f32.mrf.mxu1  ;;  %v1432_v52 = vpop.eup %1431  ;;  %947 = vst [vmem:[%s1673_s8 + $0x98] sm:$0xff] %v1430_v49  ;;  %1457 = vtanh.f32 %v706_v47  ;;  %v717_v53 = vadd.f32 %v1242_v50, %v1653_v34 }
 0x110   : > { %v845_v54 = vadd.f32 %v1274_v51, %v1653_v34  ;;  %v1434_v55 = vpop.eup %1433  ;;  %979 = vst [vmem:[%s1673_s8 + $0x198] sm:$0xff] %v1432_v52  ;;  %1459 = vtanh.f32 %v834_v48  ;;  %v708_v56 = vpop.f32.mrf.mxu0 }
 0x111   : > { %v836_v57 = vpop.f32.mrf.mxu1  ;;  %v1436_v58 = vpop.eup %1435  ;;  %945 = vst [vmem:[%s1673_s8 + $0x88] sm:$0xff] %v1434_v55  ;;  %1461 = vtanh.f32 %v717_v53  ;;  %v709_v59 = vadd.f32 %v1653_v34, %v708_v56 }
 0x112   : > { %v837_v60 = vadd.f32 %v1653_v34, %v836_v57  ;;  %v1438_v61 = vpop.eup %1437  ;;  %977 = vst [vmem:[%s1673_s8 + $0x188] sm:$0xff] %v1436_v58  ;;  %1463 = vtanh.f32 %v845_v54  ;;  %v1245_v62 = vpop.f32.mrf.mxu0 }
 0x113   : > { %v1277_v63 = vpop.f32.mrf.mxu1  ;;  %v1440_v0 = vpop.eup %1439  ;;  %950 = vst [vmem:[%s1673_s8 + $0xb0] sm:$0xff] %v1438_v61  ;;  %1465 = vtanh.f32 %v709_v59  ;;  %v730_v1 = vadd.f32 %v1245_v62, %v1653_v34 }
 0x114   : > { %v858_v2 = vadd.f32 %v1277_v63, %v1653_v34  ;;  %v1442_v3 = vpop.eup %1441  ;;  %982 = vst [vmem:[%s1673_s8 + $0x1b0] sm:$0xff] %v1440_v0  ;;  %1467 = vtanh.f32 %v837_v60  ;;  %v721_v4 = vpop.f32.mrf.mxu0 }
 0x115   : > { %v849_v5 = vpop.f32.mrf.mxu1  ;;  %v1444_v6 = vpop.eup %1443  ;;  %948 = vst [vmem:[%s1673_s8 + $0xa0] sm:$0xff] %v1442_v3  ;;  %1469 = vtanh.f32 %v730_v1  ;;  %v722_v7 = vadd.f32 %v1653_v34, %v721_v4 }
 0x116   : > { %v850_v8 = vadd.f32 %v1653_v34, %v849_v5  ;;  %v1446_v9 = vpop.eup %1445  ;;  %980 = vst [vmem:[%s1673_s8 + $0x1a0] sm:$0xff] %v1444_v6  ;;  %1471 = vtanh.f32 %v858_v2  ;;  %v1246_v10 = vpop.f32.mrf.mxu0 }
 0x117   : > { %v1278_v11 = vpop.f32.mrf.mxu1  ;;  %v1448_v12 = vpop.eup %1447  ;;  %951 = vst [vmem:[%s1673_s8 + $0xb8] sm:$0xff] %v1446_v9  ;;  %1473 = vtanh.f32 %v722_v7  ;;  %v733_v13 = vadd.f32 %v1246_v10, %v1653_v34 }
 0x118   : > { %v861_v14 = vadd.f32 %v1278_v11, %v1653_v34  ;;  %v1450_v15 = vpop.eup %1449  ;;  %983 = vst [vmem:[%s1673_s8 + $0x1b8] sm:$0xff] %v1448_v12  ;;  %1475 = vtanh.f32 %v850_v8  ;;  %v724_v16 = vpop.f32.mrf.mxu0 }
 0x119   : > { %v852_v17 = vpop.f32.mrf.mxu1  ;;  %v1452_v18 = vpop.eup %1451  ;;  %949 = vst [vmem:[%s1673_s8 + $0xa8] sm:$0xff] %v1450_v15  ;;  %1477 = vtanh.f32 %v733_v13  ;;  %v725_v19 = vadd.f32 %v1653_v34, %v724_v16 }
 0x11a   : > { %v853_v20 = vadd.f32 %v1653_v34, %v852_v17  ;;  %v1454_v21 = vpop.eup %1453  ;;  %981 = vst [vmem:[%s1673_s8 + $0x1a8] sm:$0xff] %v1452_v18  ;;  %1479 = vtanh.f32 %v861_v14 }
 0x11b   : > { %v1456_v22 = vpop.eup %1455  ;;  %954 = vst [vmem:[%s1673_s8 + $0xd0] sm:$0xff] %v1454_v21  ;;  %1481 = vtanh.f32 %v725_v19 }
 0x11c   : > { %v1458_v23 = vpop.eup %1457  ;;  %986 = vst [vmem:[%s1673_s8 + $0x1d0] sm:$0xff] %v1456_v22  ;;  %1483 = vtanh.f32 %v853_v20 }
 0x11d   : > { %v1460_v24 = vpop.eup %1459  ;;  %952 = vst [vmem:[%s1673_s8 + $0xc0] sm:$0xff] %v1458_v23 }
 0x11e   : > { %v1462_v25 = vpop.eup %1461  ;;  %984 = vst [vmem:[%s1673_s8 + $0x1c0] sm:$0xff] %v1460_v24 }
 0x11f   : > { %v1464_v34 = vpop.eup %1463  ;;  %955 = vst [vmem:[%s1673_s8 + $0xd8] sm:$0xff] %v1462_v25 }
 0x120   : > { %v1466_v26 = vpop.eup %1465  ;;  %987 = vst [vmem:[%s1673_s8 + $0x1d8] sm:$0xff] %v1464_v34 }
 0x121   : > { %v1468_v27 = vpop.eup %1467  ;;  %953 = vst [vmem:[%s1673_s8 + $0xc8] sm:$0xff] %v1466_v26 }
 0x122   : > { %v1470_v28 = vpop.eup %1469  ;;  %985 = vst [vmem:[%s1673_s8 + $0x1c8] sm:$0xff] %v1468_v27 }
 0x123   : > { %v1472_v29 = vpop.eup %1471  ;;  %958 = vst [vmem:[%s1673_s8 + $0xf0] sm:$0xff] %v1470_v28 }
 0x124   : > { %v1474_v30 = vpop.eup %1473  ;;  %990 = vst [vmem:[%s1673_s8 + $0x1f0] sm:$0xff] %v1472_v29 }
 0x125   : > { %v1476_v31 = vpop.eup %1475  ;;  %956 = vst [vmem:[%s1673_s8 + $0xe0] sm:$0xff] %v1474_v30 }
 0x126   : > { %v1478_v32 = vpop.eup %1477  ;;  %988 = vst [vmem:[%s1673_s8 + $0x1e0] sm:$0xff] %v1476_v31 }
 0x127   : > { %v1480_v33 = vpop.eup %1479  ;;  %959 = vst [vmem:[%s1673_s8 + $0xf8] sm:$0xff] %v1478_v32 }
 0x128   : > { %v1482_v35 = vpop.eup %1481  ;;  %991 = vst [vmem:[%s1673_s8 + $0x1f8] sm:$0xff] %v1480_v33 }
 0x129   : > { %v1484_v36 = vpop.eup %1483  ;;  %957 = vst [vmem:[%s1673_s8 + $0xe8] sm:$0xff] %v1482_v35 }
 0x12a   : > { %989 = vst [vmem:[%s1673_s8 + $0x1e8] sm:$0xff] %v1484_v36 }
 0x12b PF: > { %s13_s16 = sadd.s32 1, %s1523_s16   ;;  %s1808_s12 = smov %s1515_s14 }
 0x12c   : > { %p10_p7 = scmp.ge.s32.totalorder %s13_s16, 18   ;;  %s1809_s13 = smov %s1519_s15 }
 0x12d   : > { %s1810_s14 = smov %s1813_s17  ;;  %s1811_s15 = smov %s1817_s18 }
 0x12e   :  { %12 = sbr.rel (!%p10_p7) target bundleno = 3 (0x3), region = 65 }

</bundles_post_ra>
